<compile_context>
chip_gen: v7x
topology: tpu7x:2x2x1
jax: 0.10.0
libtpu: 0.0.40
codegen_flags: <defaults>
</compile_context>

<pallas_src>
import functools

import jax
import jax.numpy as jnp
import numpy as np
from jax import lax
from jax.experimental import pallas as pl
from jax.experimental.pallas import tpu as pltpu


def _round_up(x, m):
    return ((x + m - 1) // m) * m


def _vmem_limit_bytes():
    """Per-generation scoped-VMEM limit: ~3/4 of physical, capped at 96 MiB."""
    try:
        cap = pltpu.get_tpu_info().vmem_capacity_bytes
        return int(min(96 * 2**20, (cap * 3) // 4))
    except Exception:
        return 48 * 2**20          # safe on every generation


# ----------------------------------------------------------------------------
# Kernel 1: 2-layer LSTM, time-chunked grid.
#   * layer-1 input projection for the whole chunk is one big MXU matmul
#   * per step only three small matmuls: h1_prev@w1h and h2_prev@w2h (both
#     depend only on previous-step state -> overlap), then h1_new@w2x
#   * h/c state carried in vregs inside the chunk; persisted across chunks in
#     small VMEM scratch (h in bf16, c in f32)
# ----------------------------------------------------------------------------
def _lstm2_kernel(x_ref, w1x_ref, b1_ref, w1h_ref, w2x_ref, w2h_ref, b2_ref,
                  out_ref, xg, h1s, c1s, h2s, c2s, *, bpad, tc):
    Hp = h1s.shape[-1]

    # One MXU call for all timesteps of this chunk (off the serial chain).
    xg[...] = (jnp.dot(x_ref[...], w1x_ref[...],
                       preferred_element_type=jnp.float32)
               + b1_ref[...])

    @pl.when(pl.program_id(0) == 0)
    def _():
        h1s[...] = jnp.zeros_like(h1s)
        c1s[...] = jnp.zeros_like(c1s)
        h2s[...] = jnp.zeros_like(h2s)
        c2s[...] = jnp.zeros_like(c2s)

    b2 = b2_ref[...]                                   # hoisted load

    def gates(g):
        # PyTorch gate order i, f, g, o.  Hp is a multiple of 128 -> lane-aligned.
        i = jax.nn.sigmoid(g[:, 0 * Hp:1 * Hp])
        f = jax.nn.sigmoid(g[:, 1 * Hp:2 * Hp])
        gg = jnp.tanh(g[:, 2 * Hp:3 * Hp])
        o = jax.nn.sigmoid(g[:, 3 * Hp:4 * Hp])
        return i, f, gg, o

    def step(t, carry):
        h1, c1, h2, c2 = carry                          # h bf16, c f32 (vregs)
        row = pl.multiple_of(t * bpad, bpad)

        # Both recurrent dots use only previous-step state -> issue together.
        rec1 = jnp.dot(h1, w1h_ref[...], preferred_element_type=jnp.float32)
        rec2 = jnp.dot(h2, w2h_ref[...], preferred_element_type=jnp.float32)

        # Layer 1.
        g1 = xg[pl.ds(row, bpad), :] + rec1
        i1, f1, g1g, o1 = gates(g1)
        c1n = f1 * c1 + i1 * g1g
        h1n = (o1 * jnp.tanh(c1n)).astype(jnp.bfloat16)

        # Layer 2: only dot(h1n, w2x) waits on the freshly computed h1n.
        g2 = (jnp.dot(h1n, w2x_ref[...], preferred_element_type=jnp.float32)
              + (rec2 + b2))
        i2, f2, g2g, o2 = gates(g2)
        c2n = f2 * c2 + i2 * g2g
        h2n = (o2 * jnp.tanh(c2n)).astype(jnp.bfloat16)

        out_ref[pl.ds(row, bpad), :] = h2n              # bf16 lane-dense store
        return (h1n, c1n, h2n, c2n)

    carry0 = (h1s[...], c1s[...], h2s[...], c2s[...])
    h1, c1, h2, c2 = lax.fori_loop(0, tc, step, carry0, unroll=True)

    # Persist state for the next time-chunk.
    h1s[...] = h1
    c1s[...] = c1
    h2s[...] = h2
    c2s[...] = c2


def lstm2_forward(x, w1x, b1, w1h, w2x, w2h, b2, *, bpad, tc, vmem_limit):
    NB, E = x.shape                        # NB = Tp * Bp
    Hp = w1h.shape[0]
    G = 4 * Hp
    n_chunks = NB // (tc * bpad)
    rows = tc * bpad
    return pl.pallas_call(
        functools.partial(_lstm2_kernel, bpad=bpad, tc=tc),
        out_shape=jax.ShapeDtypeStruct((NB, Hp), jnp.bfloat16),
        grid=(n_chunks,),
        in_specs=[
            pl.BlockSpec((rows, E), lambda t: (t, 0)),
            pl.BlockSpec((E, G), lambda t: (0, 0)),
            pl.BlockSpec((1, G), lambda t: (0, 0)),
            pl.BlockSpec((Hp, G), lambda t: (0, 0)),
            pl.BlockSpec((Hp, G), lambda t: (0, 0)),
            pl.BlockSpec((Hp, G), lambda t: (0, 0)),
            pl.BlockSpec((1, G), lambda t: (0, 0)),
        ],
        out_specs=pl.BlockSpec((rows, Hp), lambda t: (t, 0)),
        scratch_shapes=[
            pltpu.VMEM((rows, G), jnp.float32),    # precomputed layer-1 gates
            pltpu.VMEM((bpad, Hp), jnp.bfloat16),  # h1 (persists across chunks)
            pltpu.VMEM((bpad, Hp), jnp.float32),   # c1
            pltpu.VMEM((bpad, Hp), jnp.bfloat16),  # h2
            pltpu.VMEM((bpad, Hp), jnp.float32),   # c2
        ],
        compiler_params=pltpu.CompilerParams(
            dimension_semantics=("arbitrary",),
            vmem_limit_bytes=vmem_limit),
    )(x, w1x, b1, w1h, w2x, w2h, b2)


# ----------------------------------------------------------------------------
# Kernel 2: Linear(H -> V) + LogSoftmax(dim=-1).
# Grid = (row_tiles, 2 passes, vocab_tiles).  Pass 0 streams the vocab tiles
# accumulating the online max / sum-exp in small f32 scratch; pass 1 streams
# them again and writes normalized log-probs.  The vocab mask is baked into
# the padded bias (-1e30); padded wfc columns are exactly 0.
# ----------------------------------------------------------------------------
def _fc_logsoftmax_kernel(x_ref, w_ref, b_ref, out_ref, m_sc, s_sc):
    p = pl.program_id(1)
    j = pl.program_id(2)

    logits = (jnp.dot(x_ref[...], w_ref[...],
                      preferred_element_type=jnp.float32)
              + b_ref[...])

    @pl.when((p == 0) & (j == 0))
    def _():
        m_sc[...] = jnp.full_like(m_sc, -jnp.inf)
        s_sc[...] = jnp.zeros_like(s_sc)

    @pl.when(p == 0)
    def _():
        m_new = jnp.maximum(m_sc[...], jnp.max(logits, axis=-1, keepdims=True))
        s_sc[...] = (s_sc[...] * jnp.exp(m_sc[...] - m_new)
                     + jnp.sum(jnp.exp(logits - m_new), axis=-1, keepdims=True))
        m_sc[...] = m_new

    @pl.when(p == 1)
    def _():
        # TODO(synk): bf16 exp (v6e/v7x) / bf16 output would be faster but may
        #             exceed the 2e-3 log-prob tolerance; kept in f32.
        lse = m_sc[...] + jnp.log(s_sc[...])
        out_ref[...] = logits - lse


def fc_logsoftmax(x, w, b, *, tile_v, vmem_limit):
    N, Hp = x.shape
    Vp = w.shape[1]
    tile_n = min(256, _round_up(N, 8))     # fixed row tile (no gcd degeneracy)
    Np = _round_up(N, tile_n)
    if Np != N:
        x = jnp.pad(x, ((0, Np - N), (0, 0)))

    out = pl.pallas_call(
        _fc_logsoftmax_kernel,
        out_shape=jax.ShapeDtypeStruct((Np, Vp), jnp.float32),
        grid=(Np // tile_n, 2, Vp // tile_v),
        in_specs=[
            pl.BlockSpec((tile_n, Hp), lambda i, p, j: (i, 0)),
            pl.BlockSpec((Hp, tile_v), lambda i, p, j: (0, j)),
            pl.BlockSpec((1, tile_v), lambda i, p, j: (0, j)),
        ],
        # Pass 0 keeps a single resident (unwritten) output block; pass 1
        # walks the vocab tiles so every block is written back exactly once.
        out_specs=pl.BlockSpec((tile_n, tile_v), lambda i, p, j: (i, j * p)),
        scratch_shapes=[
            pltpu.VMEM((tile_n, 1), jnp.float32),   # running max
            pltpu.VMEM((tile_n, 1), jnp.float32),   # running sum-exp
        ],
        compiler_params=pltpu.CompilerParams(
            dimension_semantics=("parallel", "arbitrary", "arbitrary"),
            vmem_limit_bytes=vmem_limit),
    )(x, w, b)
    return out[:N]


# ----------------------------------------------------------------------------
# Parameter init (deterministic, unpadded "true" model params).
# ----------------------------------------------------------------------------
def init_params(key, embed_size, hidden_size, vocab_size):
    E, H, V = embed_size, hidden_size, vocab_size
    ks = jax.random.split(key, 12)
    s = 0.1
    return {
        "embed": jax.random.normal(ks[0], (V, E), jnp.float32) * s,
        # LSTM weights stored pre-transposed: x @ W gives (B, 4H).
        "w1x": jax.random.normal(ks[1], (E, 4 * H), jnp.float32) * s,
        "w1h": jax.random.normal(ks[2], (H, 4 * H), jnp.float32) * s,
        "b1": (jax.random.normal(ks[3], (1, 4 * H), jnp.float32) * s
               + jax.random.normal(ks[4], (1, 4 * H), jnp.float32) * s),
        "w2x": jax.random.normal(ks[5], (H, 4 * H), jnp.float32) * s,
        "w2h": jax.random.normal(ks[6], (H, 4 * H), jnp.float32) * s,
        "b2": (jax.random.normal(ks[7], (1, 4 * H), jnp.float32) * s
               + jax.random.normal(ks[8], (1, 4 * H), jnp.float32) * s),
        "wfc": jax.random.normal(ks[9], (H, V), jnp.float32) * s,
        "bfc": jax.random.normal(ks[10], (1, V), jnp.float32) * s,
    }


# ----------------------------------------------------------------------------
# Padding helpers.  Gate blocks padded per-gate so PyTorch gate order is
# preserved; padded gate weights/biases are zero -> padded hidden units stay
# exactly 0.  Padded vocab columns: wfc 0, bfc -1e30 (mask baked into bias).
# ----------------------------------------------------------------------------
def _pad_gate_cols(w, H, Hp):
    d = w.shape[0]
    w4 = jnp.pad(w.reshape(d, 4, H), ((0, 0), (0, 0), (0, Hp - H)))
    return w4.reshape(d, 4 * Hp)


def prepare_padded_params(params, H, Hp, V, Vp):
    bf = jnp.bfloat16
    w1h = jnp.pad(params["w1h"], ((0, Hp - H), (0, 0)))
    w2x = jnp.pad(params["w2x"], ((0, Hp - H), (0, 0)))
    w2h = jnp.pad(params["w2h"], ((0, Hp - H), (0, 0)))
    return {
        "w1x": _pad_gate_cols(params["w1x"], H, Hp).astype(bf),   # (E, 4Hp)
        "b1": _pad_gate_cols(params["b1"], H, Hp),                 # (1, 4Hp) f32
        "w1h": _pad_gate_cols(w1h, H, Hp).astype(bf),              # (Hp, 4Hp)
        "w2x": _pad_gate_cols(w2x, H, Hp).astype(bf),              # (Hp, 4Hp)
        "w2h": _pad_gate_cols(w2h, H, Hp).astype(bf),              # (Hp, 4Hp)
        "b2": _pad_gate_cols(params["b2"], H, Hp),                 # (1, 4Hp) f32
        "wfc": jnp.pad(params["wfc"],
                       ((0, Hp - H), (0, Vp - V))).astype(bf),     # (Hp, Vp)
        "bfc": jnp.pad(params["bfc"], ((0, 0), (0, Vp - V)),
                       constant_values=-1e30),                     # (1, Vp) f32
    }


# ----------------------------------------------------------------------------
# Full forward.
# ----------------------------------------------------------------------------
def decoder_forward(params, features, captions):
    B, E = features.shape
    H = params["w1h"].shape[0]
    V = params["wfc"].shape[1]
    Hp = _round_up(H, 128)
    Bp = _round_up(B, 8)
    tile_v = min(_round_up(V, 128), 2048)
    Vp = _round_up(V, tile_v)

    pp = prepare_padded_params(params, H, Hp, V, Vp)
    vmem = _vmem_limit_bytes()

    feat = features.reshape(B, 1, E)
    emb = jnp.take(params["embed"], captions, axis=0)        # glue gather (plain JAX)
    inputs = jnp.concatenate([feat, emb[:, :-1, :]], axis=1)  # (B, T, E)
    T = inputs.shape[1]

    # Time chunking: one chunk for short sequences, 8-step chunks otherwise.
    Tc = T if T <= 16 else 8
    Tp = _round_up(T, Tc)

    # Time-major, sublane-padded batch, zero-padded tail timesteps.
    x = jnp.pad(inputs, ((0, Bp - B), (0, Tp - T), (0, 0)))
    x = jnp.transpose(x, (1, 0, 2)).reshape(Tp * Bp, E).astype(jnp.bfloat16)

    lstm_out = lstm2_forward(x, pp["w1x"], pp["b1"], pp["w1h"], pp["w2x"],
                             pp["w2h"], pp["b2"], bpad=Bp, tc=Tc,
                             vmem_limit=vmem)                 # (Tp*Bp, Hp) bf16

    scores = fc_logsoftmax(lstm_out, pp["wfc"], pp["bfc"],
                           tile_v=tile_v, vmem_limit=vmem)    # (Tp*Bp, Vp) f32
    scores = scores.reshape(Tp, Bp, Vp)[:T, :B, :V]
    return jnp.transpose(scores, (1, 0, 2))                   # (B, T, V)


def reference_forward(params, features, captions):
    """Pure-JAX reference of the same forward (bf16 matmul inputs, f32 accum)."""
    B, E = features.shape
    H = params["w1h"].shape[0]

    def dot32(a, b):
        return jnp.dot(a.astype(jnp.bfloat16), b.astype(jnp.bfloat16),
                       preferred_element_type=jnp.float32)

    feat = features.reshape(B, 1, E)
    emb = jnp.take(params["embed"], captions, axis=0)
    inputs = jnp.concatenate([feat, emb[:, :-1, :]], axis=1)
    T = inputs.shape[1]

    def cell(x, h, c, wx, wh, b):
        g = dot32(x, wx) + dot32(h, wh) + b
        i = jax.nn.sigmoid(g[:, :H])
        f = jax.nn.sigmoid(g[:, H:2 * H])
        gg = jnp.tanh(g[:, 2 * H:3 * H])
        o = jax.nn.sigmoid(g[:, 3 * H:])
        c = f * c + i * gg
        h = o * jnp.tanh(c)
        return h, c

    h1 = c1 = h2 = c2 = jnp.zeros((B, H), jnp.float32)
    outs = []
    for t in range(T):
        xt = inputs[:, t, :]
        h1, c1 = cell(xt, h1, c1, params["w1x"], params["w1h"], params["b1"])
        h2, c2 = cell(h1, h2, c2, params["w2x"], params["w2h"], params["b2"])
        outs.append(h2)
    lstm_out = jnp.stack(outs, axis=1)                         # (B, T, H)
    logits = dot32(lstm_out, params["wfc"]) + params["bfc"]
    return jax.nn.log_softmax(logits, axis=-1)


if __name__ == "__main__":
    embed_size, hidden_size, vocab_size = 32, 32, 64
    B, T = 2, 8

    key = jax.random.PRNGKey(0)
    kp, kf, kc = jax.random.split(key, 3)
    params = init_params(kp, embed_size, hidden_size, vocab_size)
    features = jax.random.normal(kf, (B, embed_size), jnp.float32)
    captions = jax.random.randint(kc, (B, T), 0, vocab_size, dtype=jnp.int32)

    out = jax.jit(decoder_forward)(params, features, captions)
    out = jax.block_until_ready(out)

    ref = reference_forward(params, features, captions)
    np.testing.assert_allclose(np.asarray(out), np.asarray(ref),
                               rtol=2e-3, atol=2e-3)
    assert out.shape == (B, T, vocab_size)
    print("KERNEL_OK")
</pallas_src>

<mosaic_0001>
module attributes {stable_mosaic.version = 11 : i64} {
  func.func @_fc_logsoftmax_kernel(%arg0: i32, %arg1: i32, %arg2: i32, %arg3: memref<64x128xbf16, #tpu.memory_space<vmem>>, %arg4: memref<128x128xbf16, #tpu.memory_space<vmem>>, %arg5: memref<1x128xf32, #tpu.memory_space<vmem>>, %arg6: memref<64x128xf32, #tpu.memory_space<vmem>>, %arg7: memref<64x1xf32, #tpu.memory_space<vmem>>, %arg8: memref<64x1xf32, #tpu.memory_space<vmem>>) attributes {dimension_semantics = [#tpu.dimension_semantics<parallel>, #tpu.dimension_semantics<arbitrary>, #tpu.dimension_semantics<arbitrary>], iteration_bounds = array<i64: 1, 2, 1>, scalar_prefetch = 0 : i64, scratch_operands = 2 : i64, tpu.core_type = #tpu.core_type<tc>, window_params = [{transform_indices = @transform_0, window_bounds = array<i64: 64, 128>}, {transform_indices = @transform_1, window_bounds = array<i64: 128, 128>}, {transform_indices = @transform_2, window_bounds = array<i64: 1, 128>}, {transform_indices = @transform_3, window_bounds = array<i64: 64, 128>}]} {
    %c0 = arith.constant 0 : index
    %c0_0 = arith.constant 0 : index
    %0 = vector.load %arg3[%c0, %c0_0] : memref<64x128xbf16, #tpu.memory_space<vmem>>, vector<64x128xbf16>
    %c0_1 = arith.constant 0 : index
    %c0_2 = arith.constant 0 : index
    %1 = vector.load %arg4[%c0_1, %c0_2] : memref<128x128xbf16, #tpu.memory_space<vmem>>, vector<128x128xbf16>
    %cst = arith.constant dense<0.000000e+00> : vector<64x128xf32>
    %2 = tpu.matmul %0, %1, %cst {dimension_numbers = #tpu.dot_dimension_numbers<[1], [0], [0], [1], [0, 0, 1, 1], [], []>} : vector<64x128xbf16>, vector<128x128xbf16>, vector<64x128xf32> -> vector<64x128xf32>
    %c0_3 = arith.constant 0 : index
    %c0_4 = arith.constant 0 : index
    %3 = vector.load %arg5[%c0_3, %c0_4] : memref<1x128xf32, #tpu.memory_space<vmem>>, vector<1x128xf32>
    %4 = vector.broadcast %3 : vector<1x128xf32> to vector<64x128xf32>
    %5 = arith.addf %2, %4 : vector<64x128xf32>
    %c0_i32 = arith.constant 0 : i32
    %6 = arith.cmpi eq, %arg1, %c0_i32 : i32
    %c0_i32_5 = arith.constant 0 : i32
    %7 = arith.cmpi eq, %arg2, %c0_i32_5 : i32
    %8 = arith.andi %6, %7 : i1
    %9 = arith.extui %8 : i1 to i32
    %c0_i32_6 = arith.constant 0 : i32
    %10 = arith.cmpi ne, %9, %c0_i32_6 : i32
    scf.if %10 {
      %cst_10 = arith.constant 0xFF800000 : f32
      %17 = vector.broadcast %cst_10 : f32 to vector<64x1xf32>
      %c0_11 = arith.constant 0 : index
      %c0_12 = arith.constant 0 : index
      %18 = vector.load %arg7[%c0_11, %c0_12] : memref<64x1xf32, #tpu.memory_space<vmem>>, vector<64x1xf32>
      tpu.vector_store %arg7[%c0_11, %c0_12], %17 {strides = array<i32>} : memref<64x1xf32, #tpu.memory_space<vmem>>, vector<64x1xf32>,
      %cst_13 = arith.constant 0.000000e+00 : f32
      %19 = vector.broadcast %cst_13 : f32 to vector<64x1xf32>
      %c0_14 = arith.constant 0 : index
      %c0_15 = arith.constant 0 : index
      %20 = vector.load %arg8[%c0_14, %c0_15] : memref<64x1xf32, #tpu.memory_space<vmem>>, vector<64x1xf32>
      tpu.vector_store %arg8[%c0_14, %c0_15], %19 {strides = array<i32>} : memref<64x1xf32, #tpu.memory_space<vmem>>, vector<64x1xf32>,
    } else {
    }
    %c0_i32_7 = arith.constant 0 : i32
    %11 = arith.cmpi eq, %arg1, %c0_i32_7 : i32
    %12 = arith.extui %11 : i1 to i32
    %c0_i32_8 = arith.constant 0 : i32
    %13 = arith.cmpi ne, %12, %c0_i32_8 : i32
    scf.if %13 {
      %c0_10 = arith.constant 0 : index
      %c0_11 = arith.constant 0 : index
      %17 = vector.load %arg7[%c0_10, %c0_11] : memref<64x1xf32, #tpu.memory_space<vmem>>, vector<64x1xf32>
      %cst_12 = arith.constant dense<0xFF800000> : vector<64xf32>
      %18 = vector.multi_reduction <maximumf>, %5, %cst_12 [1] : vector<64x128xf32> to vector<64xf32>
      %19 = vector.shape_cast %18 : vector<64xf32> to vector<64x1xf32>
      %20 = arith.maximumf %17, %19 : vector<64x1xf32>
      %c0_13 = arith.constant 0 : index
      %c0_14 = arith.constant 0 : index
      %21 = vector.load %arg8[%c0_13, %c0_14] : memref<64x1xf32, #tpu.memory_space<vmem>>, vector<64x1xf32>
      %c0_15 = arith.constant 0 : index
      %c0_16 = arith.constant 0 : index
      %22 = vector.load %arg7[%c0_15, %c0_16] : memref<64x1xf32, #tpu.memory_space<vmem>>, vector<64x1xf32>
      %23 = arith.subf %22, %20 : vector<64x1xf32>
      %24 = math.exp %23 : vector<64x1xf32>
      %25 = arith.mulf %21, %24 : vector<64x1xf32>
      %26 = vector.broadcast %20 : vector<64x1xf32> to vector<64x128xf32>
      %27 = arith.subf %5, %26 : vector<64x128xf32>
      %28 = math.exp %27 : vector<64x128xf32>
      %cst_17 = arith.constant dense<0.000000e+00> : vector<64xf32>
      %29 = vector.multi_reduction <add>, %28, %cst_17 [1] : vector<64x128xf32> to vector<64xf32>
      %30 = vector.shape_cast %29 : vector<64xf32> to vector<64x1xf32>
      %31 = arith.addf %25, %30 : vector<64x1xf32>
      %c0_18 = arith.constant 0 : index
      %c0_19 = arith.constant 0 : index
      %32 = vector.load %arg8[%c0_18, %c0_19] : memref<64x1xf32, #tpu.memory_space<vmem>>, vector<64x1xf32>
      tpu.vector_store %arg8[%c0_18, %c0_19], %31 {strides = array<i32>} : memref<64x1xf32, #tpu.memory_space<vmem>>, vector<64x1xf32>,
      %c0_20 = arith.constant 0 : index
      %c0_21 = arith.constant 0 : index
      %33 = vector.load %arg7[%c0_20, %c0_21] : memref<64x1xf32, #tpu.memory_space<vmem>>, vector<64x1xf32>
      tpu.vector_store %arg7[%c0_20, %c0_21], %20 {strides = array<i32>} : memref<64x1xf32, #tpu.memory_space<vmem>>, vector<64x1xf32>,
    } else {
    }
    %c1_i32 = arith.constant 1 : i32
    %14 = arith.cmpi eq, %arg1, %c1_i32 : i32
    %15 = arith.extui %14 : i1 to i32
    %c0_i32_9 = arith.constant 0 : i32
    %16 = arith.cmpi ne, %15, %c0_i32_9 : i32
    scf.if %16 {
      %c0_10 = arith.constant 0 : index
      %c0_11 = arith.constant 0 : index
      %17 = vector.load %arg7[%c0_10, %c0_11] : memref<64x1xf32, #tpu.memory_space<vmem>>, vector<64x1xf32>
      %c0_12 = arith.constant 0 : index
      %c0_13 = arith.constant 0 : index
      %18 = vector.load %arg8[%c0_12, %c0_13] : memref<64x1xf32, #tpu.memory_space<vmem>>, vector<64x1xf32>
      %19 = math.log %18 : vector<64x1xf32>
      %20 = arith.addf %17, %19 : vector<64x1xf32>
      %21 = vector.broadcast %20 : vector<64x1xf32> to vector<64x128xf32>
      %22 = arith.subf %5, %21 : vector<64x128xf32>
      %c0_14 = arith.constant 0 : index
      %c0_15 = arith.constant 0 : index
      %23 = vector.load %arg6[%c0_14, %c0_15] : memref<64x128xf32, #tpu.memory_space<vmem>>, vector<64x128xf32>
      tpu.vector_store %arg6[%c0_14, %c0_15], %22 {strides = array<i32>} : memref<64x128xf32, #tpu.memory_space<vmem>>, vector<64x128xf32>,
    } else {
    }
    return
  }
  func.func @transform_0(%arg0: i32, %arg1: i32, %arg2: i32) -> (i32, i32) {
    %c0_i32 = arith.constant 0 : i32
    %c0_i32_0 = arith.constant 0 : i32
    return %arg0, %c0_i32 : i32, i32
  }
  func.func @transform_1(%arg0: i32, %arg1: i32, %arg2: i32) -> (i32, i32) {
    %c0_i32 = arith.constant 0 : i32
    %c0_i32_0 = arith.constant 0 : i32
    return %c0_i32, %arg2 : i32, i32
  }
  func.func @transform_2(%arg0: i32, %arg1: i32, %arg2: i32) -> (i32, i32) {
    %c0_i32 = arith.constant 0 : i32
    %c0_i32_0 = arith.constant 0 : i32
    return %c0_i32, %arg2 : i32, i32
  }
  func.func @transform_3(%arg0: i32, %arg1: i32, %arg2: i32) -> (i32, i32) {
    %0 = arith.muli %arg2, %arg1 : i32
    %c0_i32 = arith.constant 0 : i32
    return %arg0, %0 : i32, i32
  }
}

module attributes {stable_mosaic.version = 11 : i64} {
  func.func @_lstm2_kernel(%arg0: i32, %arg1: memref<64x32xbf16, #tpu.memory_space<vmem>>, %arg2: memref<32x512xbf16, #tpu.memory_space<vmem>>, %arg3: memref<1x512xf32, #tpu.memory_space<vmem>>, %arg4: memref<128x512xbf16, #tpu.memory_space<vmem>>, %arg5: memref<128x512xbf16, #tpu.memory_space<vmem>>, %arg6: memref<128x512xbf16, #tpu.memory_space<vmem>>, %arg7: memref<1x512xf32, #tpu.memory_space<vmem>>, %arg8: memref<64x128xbf16, #tpu.memory_space<vmem>>, %arg9: memref<64x512xf32, #tpu.memory_space<vmem>>, %arg10: memref<8x128xbf16, #tpu.memory_space<vmem>>, %arg11: memref<8x128xf32, #tpu.memory_space<vmem>>, %arg12: memref<8x128xbf16, #tpu.memory_space<vmem>>, %arg13: memref<8x128xf32, #tpu.memory_space<vmem>>) attributes {dimension_semantics = [#tpu.dimension_semantics<arbitrary>], iteration_bounds = array<i64: 1>, scalar_prefetch = 0 : i64, scratch_operands = 5 : i64, tpu.core_type = #tpu.core_type<tc>, window_params = [{transform_indices = @transform_0, window_bounds = array<i64: 64, 32>}, {pipeline_mode = #tpu.pipeline_mode<synchronous>, transform_indices = @transform_1, window_bounds = array<i64: 32, 512>}, {pipeline_mode = #tpu.pipeline_mode<synchronous>, transform_indices = @transform_2, window_bounds = array<i64: 1, 512>}, {pipeline_mode = #tpu.pipeline_mode<synchronous>, transform_indices = @transform_3, window_bounds = array<i64: 128, 512>}, {pipeline_mode = #tpu.pipeline_mode<synchronous>, transform_indices = @transform_4, window_bounds = array<i64: 128, 512>}, {pipeline_mode = #tpu.pipeline_mode<synchronous>, transform_indices = @transform_5, window_bounds = array<i64: 128, 512>}, {pipeline_mode = #tpu.pipeline_mode<synchronous>, transform_indices = @transform_6, window_bounds = array<i64: 1, 512>}, {transform_indices = @transform_7, window_bounds = array<i64: 64, 128>}]} {
    %c0 = arith.constant 0 : index
    %c0_0 = arith.constant 0 : index
    %0 = vector.load %arg1[%c0, %c0_0] : memref<64x32xbf16, #tpu.memory_space<vmem>>, vector<64x32xbf16>
    %c0_1 = arith.constant 0 : index
    %c0_2 = arith.constant 0 : index
    %1 = vector.load %arg2[%c0_1, %c0_2] : memref<32x512xbf16, #tpu.memory_space<vmem>>, vector<32x512xbf16>
    %cst = arith.constant dense<0.000000e+00> : vector<64x512xf32>
    %2 = tpu.matmul %0, %1, %cst {dimension_numbers = #tpu.dot_dimension_numbers<[1], [0], [0], [1], [0, 0, 1, 1], [], []>} : vector<64x32xbf16>, vector<32x512xbf16>, vector<64x512xf32> -> vector<64x512xf32>
    %c0_3 = arith.constant 0 : index
    %c0_4 = arith.constant 0 : index
    %3 = vector.load %arg3[%c0_3, %c0_4] : memref<1x512xf32, #tpu.memory_space<vmem>>, vector<1x512xf32>
    %4 = vector.broadcast %3 : vector<1x512xf32> to vector<64x512xf32>
    %5 = arith.addf %2, %4 : vector<64x512xf32>
    %c0_5 = arith.constant 0 : index
    %c0_6 = arith.constant 0 : index
    %6 = vector.load %arg9[%c0_5, %c0_6] : memref<64x512xf32, #tpu.memory_space<vmem>>, vector<64x512xf32>
    tpu.vector_store %arg9[%c0_5, %c0_6], %5 {strides = array<i32>} : memref<64x512xf32, #tpu.memory_space<vmem>>, vector<64x512xf32>,
    %c0_i32 = arith.constant 0 : i32
    %7 = arith.cmpi eq, %arg0, %c0_i32 : i32
    %8 = arith.extui %7 : i1 to i32
    %c0_i32_7 = arith.constant 0 : i32
    %9 = arith.cmpi ne, %8, %c0_i32_7 : i32
    scf.if %9 {
      %cst_171 = arith.constant 0.000000e+00 : bf16
      %563 = vector.broadcast %cst_171 : bf16 to vector<8x128xbf16>
      %c0_172 = arith.constant 0 : index
      %c0_173 = arith.constant 0 : index
      %564 = vector.load %arg10[%c0_172, %c0_173] : memref<8x128xbf16, #tpu.memory_space<vmem>>, vector<8x128xbf16>
      tpu.vector_store %arg10[%c0_172, %c0_173], %563 {strides = array<i32>} : memref<8x128xbf16, #tpu.memory_space<vmem>>, vector<8x128xbf16>,
      %cst_174 = arith.constant 0.000000e+00 : f32
      %565 = vector.broadcast %cst_174 : f32 to vector<8x128xf32>
      %c0_175 = arith.constant 0 : index
      %c0_176 = arith.constant 0 : index
      %566 = vector.load %arg11[%c0_175, %c0_176] : memref<8x128xf32, #tpu.memory_space<vmem>>, vector<8x128xf32>
      tpu.vector_store %arg11[%c0_175, %c0_176], %565 {strides = array<i32>} : memref<8x128xf32, #tpu.memory_space<vmem>>, vector<8x128xf32>,
      %cst_177 = arith.constant 0.000000e+00 : bf16
      %567 = vector.broadcast %cst_177 : bf16 to vector<8x128xbf16>
      %c0_178 = arith.constant 0 : index
      %c0_179 = arith.constant 0 : index
      %568 = vector.load %arg12[%c0_178, %c0_179] : memref<8x128xbf16, #tpu.memory_space<vmem>>, vector<8x128xbf16>
      tpu.vector_store %arg12[%c0_178, %c0_179], %567 {strides = array<i32>} : memref<8x128xbf16, #tpu.memory_space<vmem>>, vector<8x128xbf16>,
      %cst_180 = arith.constant 0.000000e+00 : f32
      %569 = vector.broadcast %cst_180 : f32 to vector<8x128xf32>
      %c0_181 = arith.constant 0 : index
      %c0_182 = arith.constant 0 : index
      %570 = vector.load %arg13[%c0_181, %c0_182] : memref<8x128xf32, #tpu.memory_space<vmem>>, vector<8x128xf32>
      tpu.vector_store %arg13[%c0_181, %c0_182], %569 {strides = array<i32>} : memref<8x128xf32, #tpu.memory_space<vmem>>, vector<8x128xf32>,
    } else {
    }
    %c0_8 = arith.constant 0 : index
    %c0_9 = arith.constant 0 : index
    %10 = vector.load %arg7[%c0_8, %c0_9] : memref<1x512xf32, #tpu.memory_space<vmem>>, vector<1x512xf32>
    %c0_10 = arith.constant 0 : index
    %c0_11 = arith.constant 0 : index
    %11 = vector.load %arg10[%c0_10, %c0_11] : memref<8x128xbf16, #tpu.memory_space<vmem>>, vector<8x128xbf16>
    %c0_12 = arith.constant 0 : index
    %c0_13 = arith.constant 0 : index
    %12 = vector.load %arg11[%c0_12, %c0_13] : memref<8x128xf32, #tpu.memory_space<vmem>>, vector<8x128xf32>
    %c0_14 = arith.constant 0 : index
    %c0_15 = arith.constant 0 : index
    %13 = vector.load %arg12[%c0_14, %c0_15] : memref<8x128xbf16, #tpu.memory_space<vmem>>, vector<8x128xbf16>
    %c0_16 = arith.constant 0 : index
    %c0_17 = arith.constant 0 : index
    %14 = vector.load %arg13[%c0_16, %c0_17] : memref<8x128xf32, #tpu.memory_space<vmem>>, vector<8x128xf32>
    %c0_i32_18 = arith.constant 0 : i32
    %c8_i32 = arith.constant 8 : i32
    %15 = arith.muli %c0_i32_18, %c8_i32 : i32
    %16 = tpu.assume_multiple %15, 8 : i32
    %c0_19 = arith.constant 0 : index
    %c0_20 = arith.constant 0 : index
    %17 = vector.load %arg4[%c0_19, %c0_20] : memref<128x512xbf16, #tpu.memory_space<vmem>>, vector<128x512xbf16>
    %cst_21 = arith.constant dense<0.000000e+00> : vector<8x512xf32>
    %18 = tpu.matmul %11, %17, %cst_21 {dimension_numbers = #tpu.dot_dimension_numbers<[1], [0], [0], [1], [0, 0, 1, 1], [], []>} : vector<8x128xbf16>, vector<128x512xbf16>, vector<8x512xf32> -> vector<8x512xf32>
    %c0_22 = arith.constant 0 : index
    %c0_23 = arith.constant 0 : index
    %19 = vector.load %arg6[%c0_22, %c0_23] : memref<128x512xbf16, #tpu.memory_space<vmem>>, vector<128x512xbf16>
    %cst_24 = arith.constant dense<0.000000e+00> : vector<8x512xf32>
    %20 = tpu.matmul %13, %19, %cst_24 {dimension_numbers = #tpu.dot_dimension_numbers<[1], [0], [0], [1], [0, 0, 1, 1], [], []>} : vector<8x128xbf16>, vector<128x512xbf16>, vector<8x512xf32> -> vector<8x512xf32>
    %21 = arith.index_cast %16 : i32 to index
    %c0_25 = arith.constant 0 : index
    %22 = vector.load %arg9[%21, %c0_25] : memref<64x512xf32, #tpu.memory_space<vmem>>, vector<8x512xf32>
    %23 = arith.addf %22, %18 : vector<8x512xf32>
    %24 = vector.extract_strided_slice %23 {offsets = [0, 0], sizes = [8, 128], strides = [1, 1]} : vector<8x512xf32> to vector<8x128xf32>
    %25 = arith.negf %24 : vector<8x128xf32>
    %26 = math.exp %25 : vector<8x128xf32>
    %cst_26 = arith.constant 1.000000e+00 : f32
    %27 = vector.broadcast %cst_26 : f32 to vector<8x128xf32>
    %28 = arith.addf %27, %26 : vector<8x128xf32>
    %29 = arith.divf %27, %28 : vector<8x128xf32>
    %30 = vector.extract_strided_slice %23 {offsets = [0, 128], sizes = [8, 128], strides = [1, 1]} : vector<8x512xf32> to vector<8x128xf32>
    %31 = arith.negf %30 : vector<8x128xf32>
    %32 = math.exp %31 : vector<8x128xf32>
    %cst_27 = arith.constant 1.000000e+00 : f32
    %33 = vector.broadcast %cst_27 : f32 to vector<8x128xf32>
    %34 = arith.addf %33, %32 : vector<8x128xf32>
    %35 = arith.divf %33, %34 : vector<8x128xf32>
    %36 = vector.extract_strided_slice %23 {offsets = [0, 256], sizes = [8, 128], strides = [1, 1]} : vector<8x512xf32> to vector<8x128xf32>
    %37 = math.tanh %36 : vector<8x128xf32>
    %38 = vector.extract_strided_slice %23 {offsets = [0, 384], sizes = [8, 128], strides = [1, 1]} : vector<8x512xf32> to vector<8x128xf32>
    %39 = arith.negf %38 : vector<8x128xf32>
    %40 = math.exp %39 : vector<8x128xf32>
    %cst_28 = arith.constant 1.000000e+00 : f32
    %41 = vector.broadcast %cst_28 : f32 to vector<8x128xf32>
    %42 = arith.addf %41, %40 : vector<8x128xf32>
    %43 = arith.divf %41, %42 : vector<8x128xf32>
    %44 = arith.mulf %35, %12 : vector<8x128xf32>
    %45 = arith.mulf %29, %37 : vector<8x128xf32>
    %46 = arith.addf %44, %45 : vector<8x128xf32>
    %47 = math.tanh %46 : vector<8x128xf32>
    %48 = arith.mulf %43, %47 : vector<8x128xf32>
    %49 = arith.truncf %48 : vector<8x128xf32> to vector<8x128xbf16>
    %c0_29 = arith.constant 0 : index
    %c0_30 = arith.constant 0 : index
    %50 = vector.load %arg5[%c0_29, %c0_30] : memref<128x512xbf16, #tpu.memory_space<vmem>>, vector<128x512xbf16>
    %cst_31 = arith.constant dense<0.000000e+00> : vector<8x512xf32>
    %51 = tpu.matmul %49, %50, %cst_31 {dimension_numbers = #tpu.dot_dimension_numbers<[1], [0], [0], [1], [0, 0, 1, 1], [], []>} : vector<8x128xbf16>, vector<128x512xbf16>, vector<8x512xf32> -> vector<8x512xf32>
    %52 = vector.broadcast %10 : vector<1x512xf32> to vector<8x512xf32>
    %53 = arith.addf %20, %52 : vector<8x512xf32>
    %54 = arith.addf %51, %53 : vector<8x512xf32>
    %55 = vector.extract_strided_slice %54 {offsets = [0, 0], sizes = [8, 128], strides = [1, 1]} : vector<8x512xf32> to vector<8x128xf32>
    %56 = arith.negf %55 : vector<8x128xf32>
    %57 = math.exp %56 : vector<8x128xf32>
    %cst_32 = arith.constant 1.000000e+00 : f32
    %58 = vector.broadcast %cst_32 : f32 to vector<8x128xf32>
    %59 = arith.addf %58, %57 : vector<8x128xf32>
    %60 = arith.divf %58, %59 : vector<8x128xf32>
    %61 = vector.extract_strided_slice %54 {offsets = [0, 128], sizes = [8, 128], strides = [1, 1]} : vector<8x512xf32> to vector<8x128xf32>
    %62 = arith.negf %61 : vector<8x128xf32>
    %63 = math.exp %62 : vector<8x128xf32>
    %cst_33 = arith.constant 1.000000e+00 : f32
    %64 = vector.broadcast %cst_33 : f32 to vector<8x128xf32>
    %65 = arith.addf %64, %63 : vector<8x128xf32>
    %66 = arith.divf %64, %65 : vector<8x128xf32>
    %67 = vector.extract_strided_slice %54 {offsets = [0, 256], sizes = [8, 128], strides = [1, 1]} : vector<8x512xf32> to vector<8x128xf32>
    %68 = math.tanh %67 : vector<8x128xf32>
    %69 = vector.extract_strided_slice %54 {offsets = [0, 384], sizes = [8, 128], strides = [1, 1]} : vector<8x512xf32> to vector<8x128xf32>
    %70 = arith.negf %69 : vector<8x128xf32>
    %71 = math.exp %70 : vector<8x128xf32>
    %cst_34 = arith.constant 1.000000e+00 : f32
    %72 = vector.broadcast %cst_34 : f32 to vector<8x128xf32>
    %73 = arith.addf %72, %71 : vector<8x128xf32>
    %74 = arith.divf %72, %73 : vector<8x128xf32>
    %75 = arith.mulf %66, %14 : vector<8x128xf32>
    %76 = arith.mulf %60, %68 : vector<8x128xf32>
    %77 = arith.addf %75, %76 : vector<8x128xf32>
    %78 = math.tanh %77 : vector<8x128xf32>
    %79 = arith.mulf %74, %78 : vector<8x128xf32>
    %80 = arith.truncf %79 : vector<8x128xf32> to vector<8x128xbf16>
    %81 = arith.index_cast %16 : i32 to index
    %c0_35 = arith.constant 0 : index
    %82 = vector.load %arg8[%81, %c0_35] : memref<64x128xbf16, #tpu.memory_space<vmem>>, vector<8x128xbf16>
    tpu.vector_store %arg8[%81, %c0_35], %80 {strides = array<i32>} : memref<64x128xbf16, #tpu.memory_space<vmem>>, vector<8x128xbf16>,
    %c1_i32 = arith.constant 1 : i32
    %c8_i32_36 = arith.constant 8 : i32
    %83 = arith.muli %c1_i32, %c8_i32_36 : i32
    %84 = tpu.assume_multiple %83, 8 : i32
    %c0_37 = arith.constant 0 : index
    %c0_38 = arith.constant 0 : index
    %85 = vector.load %arg4[%c0_37, %c0_38] : memref<128x512xbf16, #tpu.memory_space<vmem>>, vector<128x512xbf16>
    %cst_39 = arith.constant dense<0.000000e+00> : vector<8x512xf32>
    %86 = tpu.matmul %49, %85, %cst_39 {dimension_numbers = #tpu.dot_dimension_numbers<[1], [0], [0], [1], [0, 0, 1, 1], [], []>} : vector<8x128xbf16>, vector<128x512xbf16>, vector<8x512xf32> -> vector<8x512xf32>
    %c0_40 = arith.constant 0 : index
    %c0_41 = arith.constant 0 : index
    %87 = vector.load %arg6[%c0_40, %c0_41] : memref<128x512xbf16, #tpu.memory_space<vmem>>, vector<128x512xbf16>
    %cst_42 = arith.constant dense<0.000000e+00> : vector<8x512xf32>
    %88 = tpu.matmul %80, %87, %cst_42 {dimension_numbers = #tpu.dot_dimension_numbers<[1], [0], [0], [1], [0, 0, 1, 1], [], []>} : vector<8x128xbf16>, vector<128x512xbf16>, vector<8x512xf32> -> vector<8x512xf32>
    %89 = arith.index_cast %84 : i32 to index
    %c0_43 = arith.constant 0 : index
    %90 = vector.load %arg9[%89, %c0_43] : memref<64x512xf32, #tpu.memory_space<vmem>>, vector<8x512xf32>
    %91 = arith.addf %90, %86 : vector<8x512xf32>
    %92 = vector.extract_strided_slice %91 {offsets = [0, 0], sizes = [8, 128], strides = [1, 1]} : vector<8x512xf32> to vector<8x128xf32>
    %93 = arith.negf %92 : vector<8x128xf32>
    %94 = math.exp %93 : vector<8x128xf32>
    %cst_44 = arith.constant 1.000000e+00 : f32
    %95 = vector.broadcast %cst_44 : f32 to vector<8x128xf32>
    %96 = arith.addf %95, %94 : vector<8x128xf32>
    %97 = arith.divf %95, %96 : vector<8x128xf32>
    %98 = vector.extract_strided_slice %91 {offsets = [0, 128], sizes = [8, 128], strides = [1, 1]} : vector<8x512xf32> to vector<8x128xf32>
    %99 = arith.negf %98 : vector<8x128xf32>
    %100 = math.exp %99 : vector<8x128xf32>
    %cst_45 = arith.constant 1.000000e+00 : f32
    %101 = vector.broadcast %cst_45 : f32 to vector<8x128xf32>
    %102 = arith.addf %101, %100 : vector<8x128xf32>
    %103 = arith.divf %101, %102 : vector<8x128xf32>
    %104 = vector.extract_strided_slice %91 {offsets = [0, 256], sizes = [8, 128], strides = [1, 1]} : vector<8x512xf32> to vector<8x128xf32>
    %105 = math.tanh %104 : vector<8x128xf32>
    %106 = vector.extract_strided_slice %91 {offsets = [0, 384], sizes = [8, 128], strides = [1, 1]} : vector<8x512xf32> to vector<8x128xf32>
    %107 = arith.negf %106 : vector<8x128xf32>
    %108 = math.exp %107 : vector<8x128xf32>
    %cst_46 = arith.constant 1.000000e+00 : f32
    %109 = vector.broadcast %cst_46 : f32 to vector<8x128xf32>
    %110 = arith.addf %109, %108 : vector<8x128xf32>
    %111 = arith.divf %109, %110 : vector<8x128xf32>
    %112 = arith.mulf %103, %46 : vector<8x128xf32>
    %113 = arith.mulf %97, %105 : vector<8x128xf32>
    %114 = arith.addf %112, %113 : vector<8x128xf32>
    %115 = math.tanh %114 : vector<8x128xf32>
    %116 = arith.mulf %111, %115 : vector<8x128xf32>
    %117 = arith.truncf %116 : vector<8x128xf32> to vector<8x128xbf16>
    %c0_47 = arith.constant 0 : index
    %c0_48 = arith.constant 0 : index
    %118 = vector.load %arg5[%c0_47, %c0_48] : memref<128x512xbf16, #tpu.memory_space<vmem>>, vector<128x512xbf16>
    %cst_49 = arith.constant dense<0.000000e+00> : vector<8x512xf32>
    %119 = tpu.matmul %117, %118, %cst_49 {dimension_numbers = #tpu.dot_dimension_numbers<[1], [0], [0], [1], [0, 0, 1, 1], [], []>} : vector<8x128xbf16>, vector<128x512xbf16>, vector<8x512xf32> -> vector<8x512xf32>
    %120 = vector.broadcast %10 : vector<1x512xf32> to vector<8x512xf32>
    %121 = arith.addf %88, %120 : vector<8x512xf32>
    %122 = arith.addf %119, %121 : vector<8x512xf32>
    %123 = vector.extract_strided_slice %122 {offsets = [0, 0], sizes = [8, 128], strides = [1, 1]} : vector<8x512xf32> to vector<8x128xf32>
    %124 = arith.negf %123 : vector<8x128xf32>
    %125 = math.exp %124 : vector<8x128xf32>
    %cst_50 = arith.constant 1.000000e+00 : f32
    %126 = vector.broadcast %cst_50 : f32 to vector<8x128xf32>
    %127 = arith.addf %126, %125 : vector<8x128xf32>
    %128 = arith.divf %126, %127 : vector<8x128xf32>
    %129 = vector.extract_strided_slice %122 {offsets = [0, 128], sizes = [8, 128], strides = [1, 1]} : vector<8x512xf32> to vector<8x128xf32>
    %130 = arith.negf %129 : vector<8x128xf32>
    %131 = math.exp %130 : vector<8x128xf32>
    %cst_51 = arith.constant 1.000000e+00 : f32
    %132 = vector.broadcast %cst_51 : f32 to vector<8x128xf32>
    %133 = arith.addf %132, %131 : vector<8x128xf32>
    %134 = arith.divf %132, %133 : vector<8x128xf32>
    %135 = vector.extract_strided_slice %122 {offsets = [0, 256], sizes = [8, 128], strides = [1, 1]} : vector<8x512xf32> to vector<8x128xf32>
    %136 = math.tanh %135 : vector<8x128xf32>
    %137 = vector.extract_strided_slice %122 {offsets = [0, 384], sizes = [8, 128], strides = [1, 1]} : vector<8x512xf32> to vector<8x128xf32>
    %138 = arith.negf %137 : vector<8x128xf32>
    %139 = math.exp %138 : vector<8x128xf32>
    %cst_52 = arith.constant 1.000000e+00 : f32
    %140 = vector.broadcast %cst_52 : f32 to vector<8x128xf32>
    %141 = arith.addf %140, %139 : vector<8x128xf32>
    %142 = arith.divf %140, %141 : vector<8x128xf32>
    %143 = arith.mulf %134, %77 : vector<8x128xf32>
    %144 = arith.mulf %128, %136 : vector<8x128xf32>
    %145 = arith.addf %143, %144 : vector<8x128xf32>
    %146 = math.tanh %145 : vector<8x128xf32>
    %147 = arith.mulf %142, %146 : vector<8x128xf32>
    %148 = arith.truncf %147 : vector<8x128xf32> to vector<8x128xbf16>
    %149 = arith.index_cast %84 : i32 to index
    %c0_53 = arith.constant 0 : index
    %150 = vector.load %arg8[%149, %c0_53] : memref<64x128xbf16, #tpu.memory_space<vmem>>, vector<8x128xbf16>
    tpu.vector_store %arg8[%149, %c0_53], %148 {strides = array<i32>} : memref<64x128xbf16, #tpu.memory_space<vmem>>, vector<8x128xbf16>,
    %c2_i32 = arith.constant 2 : i32
    %c8_i32_54 = arith.constant 8 : i32
    %151 = arith.muli %c2_i32, %c8_i32_54 : i32
    %152 = tpu.assume_multiple %151, 8 : i32
    %c0_55 = arith.constant 0 : index
    %c0_56 = arith.constant 0 : index
    %153 = vector.load %arg4[%c0_55, %c0_56] : memref<128x512xbf16, #tpu.memory_space<vmem>>, vector<128x512xbf16>
    %cst_57 = arith.constant dense<0.000000e+00> : vector<8x512xf32>
    %154 = tpu.matmul %117, %153, %cst_57 {dimension_numbers = #tpu.dot_dimension_numbers<[1], [0], [0], [1], [0, 0, 1, 1], [], []>} : vector<8x128xbf16>, vector<128x512xbf16>, vector<8x512xf32> -> vector<8x512xf32>
    %c0_58 = arith.constant 0 : index
    %c0_59 = arith.constant 0 : index
    %155 = vector.load %arg6[%c0_58, %c0_59] : memref<128x512xbf16, #tpu.memory_space<vmem>>, vector<128x512xbf16>
    %cst_60 = arith.constant dense<0.000000e+00> : vector<8x512xf32>
    %156 = tpu.matmul %148, %155, %cst_60 {dimension_numbers = #tpu.dot_dimension_numbers<[1], [0], [0], [1], [0, 0, 1, 1], [], []>} : vector<8x128xbf16>, vector<128x512xbf16>, vector<8x512xf32> -> vector<8x512xf32>
    %157 = arith.index_cast %152 : i32 to index
    %c0_61 = arith.constant 0 : index
    %158 = vector.load %arg9[%157, %c0_61] : memref<64x512xf32, #tpu.memory_space<vmem>>, vector<8x512xf32>
    %159 = arith.addf %158, %154 : vector<8x512xf32>
    %160 = vector.extract_strided_slice %159 {offsets = [0, 0], sizes = [8, 128], strides = [1, 1]} : vector<8x512xf32> to vector<8x128xf32>
    %161 = arith.negf %160 : vector<8x128xf32>
    %162 = math.exp %161 : vector<8x128xf32>
    %cst_62 = arith.constant 1.000000e+00 : f32
    %163 = vector.broadcast %cst_62 : f32 to vector<8x128xf32>
    %164 = arith.addf %163, %162 : vector<8x128xf32>
    %165 = arith.divf %163, %164 : vector<8x128xf32>
    %166 = vector.extract_strided_slice %159 {offsets = [0, 128], sizes = [8, 128], strides = [1, 1]} : vector<8x512xf32> to vector<8x128xf32>
    %167 = arith.negf %166 : vector<8x128xf32>
    %168 = math.exp %167 : vector<8x128xf32>
    %cst_63 = arith.constant 1.000000e+00 : f32
    %169 = vector.broadcast %cst_63 : f32 to vector<8x128xf32>
    %170 = arith.addf %169, %168 : vector<8x128xf32>
    %171 = arith.divf %169, %170 : vector<8x128xf32>
    %172 = vector.extract_strided_slice %159 {offsets = [0, 256], sizes = [8, 128], strides = [1, 1]} : vector<8x512xf32> to vector<8x128xf32>
    %173 = math.tanh %172 : vector<8x128xf32>
    %174 = vector.extract_strided_slice %159 {offsets = [0, 384], sizes = [8, 128], strides = [1, 1]} : vector<8x512xf32> to vector<8x128xf32>
    %175 = arith.negf %174 : vector<8x128xf32>
    %176 = math.exp %175 : vector<8x128xf32>
    %cst_64 = arith.constant 1.000000e+00 : f32
    %177 = vector.broadcast %cst_64 : f32 to vector<8x128xf32>
    %178 = arith.addf %177, %176 : vector<8x128xf32>
    %179 = arith.divf %177, %178 : vector<8x128xf32>
    %180 = arith.mulf %171, %114 : vector<8x128xf32>
    %181 = arith.mulf %165, %173 : vector<8x128xf32>
    %182 = arith.addf %180, %181 : vector<8x128xf32>
    %183 = math.tanh %182 : vector<8x128xf32>
    %184 = arith.mulf %179, %183 : vector<8x128xf32>
    %185 = arith.truncf %184 : vector<8x128xf32> to vector<8x128xbf16>
    %c0_65 = arith.constant 0 : index
    %c0_66 = arith.constant 0 : index
    %186 = vector.load %arg5[%c0_65, %c0_66] : memref<128x512xbf16, #tpu.memory_space<vmem>>, vector<128x512xbf16>
    %cst_67 = arith.constant dense<0.000000e+00> : vector<8x512xf32>
    %187 = tpu.matmul %185, %186, %cst_67 {dimension_numbers = #tpu.dot_dimension_numbers<[1], [0], [0], [1], [0, 0, 1, 1], [], []>} : vector<8x128xbf16>, vector<128x512xbf16>, vector<8x512xf32> -> vector<8x512xf32>
    %188 = vector.broadcast %10 : vector<1x512xf32> to vector<8x512xf32>
    %189 = arith.addf %156, %188 : vector<8x512xf32>
    %190 = arith.addf %187, %189 : vector<8x512xf32>
    %191 = vector.extract_strided_slice %190 {offsets = [0, 0], sizes = [8, 128], strides = [1, 1]} : vector<8x512xf32> to vector<8x128xf32>
    %192 = arith.negf %191 : vector<8x128xf32>
    %193 = math.exp %192 : vector<8x128xf32>
    %cst_68 = arith.constant 1.000000e+00 : f32
    %194 = vector.broadcast %cst_68 : f32 to vector<8x128xf32>
    %195 = arith.addf %194, %193 : vector<8x128xf32>
    %196 = arith.divf %194, %195 : vector<8x128xf32>
    %197 = vector.extract_strided_slice %190 {offsets = [0, 128], sizes = [8, 128], strides = [1, 1]} : vector<8x512xf32> to vector<8x128xf32>
    %198 = arith.negf %197 : vector<8x128xf32>
    %199 = math.exp %198 : vector<8x128xf32>
    %cst_69 = arith.constant 1.000000e+00 : f32
    %200 = vector.broadcast %cst_69 : f32 to vector<8x128xf32>
    %201 = arith.addf %200, %199 : vector<8x128xf32>
    %202 = arith.divf %200, %201 : vector<8x128xf32>
    %203 = vector.extract_strided_slice %190 {offsets = [0, 256], sizes = [8, 128], strides = [1, 1]} : vector<8x512xf32> to vector<8x128xf32>
    %204 = math.tanh %203 : vector<8x128xf32>
    %205 = vector.extract_strided_slice %190 {offsets = [0, 384], sizes = [8, 128], strides = [1, 1]} : vector<8x512xf32> to vector<8x128xf32>
    %206 = arith.negf %205 : vector<8x128xf32>
    %207 = math.exp %206 : vector<8x128xf32>
    %cst_70 = arith.constant 1.000000e+00 : f32
    %208 = vector.broadcast %cst_70 : f32 to vector<8x128xf32>
    %209 = arith.addf %208, %207 : vector<8x128xf32>
    %210 = arith.divf %208, %209 : vector<8x128xf32>
    %211 = arith.mulf %202, %145 : vector<8x128xf32>
    %212 = arith.mulf %196, %204 : vector<8x128xf32>
    %213 = arith.addf %211, %212 : vector<8x128xf32>
    %214 = math.tanh %213 : vector<8x128xf32>
    %215 = arith.mulf %210, %214 : vector<8x128xf32>
    %216 = arith.truncf %215 : vector<8x128xf32> to vector<8x128xbf16>
    %217 = arith.index_cast %152 : i32 to index
    %c0_71 = arith.constant 0 : index
    %218 = vector.load %arg8[%217, %c0_71] : memref<64x128xbf16, #tpu.memory_space<vmem>>, vector<8x128xbf16>
    tpu.vector_store %arg8[%217, %c0_71], %216 {strides = array<i32>} : memref<64x128xbf16, #tpu.memory_space<vmem>>, vector<8x128xbf16>,
    %c3_i32 = arith.constant 3 : i32
    %c8_i32_72 = arith.constant 8 : i32
    %219 = arith.muli %c3_i32, %c8_i32_72 : i32
    %220 = tpu.assume_multiple %219, 8 : i32
    %c0_73 = arith.constant 0 : index
    %c0_74 = arith.constant 0 : index
    %221 = vector.load %arg4[%c0_73, %c0_74] : memref<128x512xbf16, #tpu.memory_space<vmem>>, vector<128x512xbf16>
    %cst_75 = arith.constant dense<0.000000e+00> : vector<8x512xf32>
    %222 = tpu.matmul %185, %221, %cst_75 {dimension_numbers = #tpu.dot_dimension_numbers<[1], [0], [0], [1], [0, 0, 1, 1], [], []>} : vector<8x128xbf16>, vector<128x512xbf16>, vector<8x512xf32> -> vector<8x512xf32>
    %c0_76 = arith.constant 0 : index
    %c0_77 = arith.constant 0 : index
    %223 = vector.load %arg6[%c0_76, %c0_77] : memref<128x512xbf16, #tpu.memory_space<vmem>>, vector<128x512xbf16>
    %cst_78 = arith.constant dense<0.000000e+00> : vector<8x512xf32>
    %224 = tpu.matmul %216, %223, %cst_78 {dimension_numbers = #tpu.dot_dimension_numbers<[1], [0], [0], [1], [0, 0, 1, 1], [], []>} : vector<8x128xbf16>, vector<128x512xbf16>, vector<8x512xf32> -> vector<8x512xf32>
    %225 = arith.index_cast %220 : i32 to index
    %c0_79 = arith.constant 0 : index
    %226 = vector.load %arg9[%225, %c0_79] : memref<64x512xf32, #tpu.memory_space<vmem>>, vector<8x512xf32>
    %227 = arith.addf %226, %222 : vector<8x512xf32>
    %228 = vector.extract_strided_slice %227 {offsets = [0, 0], sizes = [8, 128], strides = [1, 1]} : vector<8x512xf32> to vector<8x128xf32>
    %229 = arith.negf %228 : vector<8x128xf32>
    %230 = math.exp %229 : vector<8x128xf32>
    %cst_80 = arith.constant 1.000000e+00 : f32
    %231 = vector.broadcast %cst_80 : f32 to vector<8x128xf32>
    %232 = arith.addf %231, %230 : vector<8x128xf32>
    %233 = arith.divf %231, %232 : vector<8x128xf32>
    %234 = vector.extract_strided_slice %227 {offsets = [0, 128], sizes = [8, 128], strides = [1, 1]} : vector<8x512xf32> to vector<8x128xf32>
    %235 = arith.negf %234 : vector<8x128xf32>
    %236 = math.exp %235 : vector<8x128xf32>
    %cst_81 = arith.constant 1.000000e+00 : f32
    %237 = vector.broadcast %cst_81 : f32 to vector<8x128xf32>
    %238 = arith.addf %237, %236 : vector<8x128xf32>
    %239 = arith.divf %237, %238 : vector<8x128xf32>
    %240 = vector.extract_strided_slice %227 {offsets = [0, 256], sizes = [8, 128], strides = [1, 1]} : vector<8x512xf32> to vector<8x128xf32>
    %241 = math.tanh %240 : vector<8x128xf32>
    %242 = vector.extract_strided_slice %227 {offsets = [0, 384], sizes = [8, 128], strides = [1, 1]} : vector<8x512xf32> to vector<8x128xf32>
    %243 = arith.negf %242 : vector<8x128xf32>
    %244 = math.exp %243 : vector<8x128xf32>
    %cst_82 = arith.constant 1.000000e+00 : f32
    %245 = vector.broadcast %cst_82 : f32 to vector<8x128xf32>
    %246 = arith.addf %245, %244 : vector<8x128xf32>
    %247 = arith.divf %245, %246 : vector<8x128xf32>
    %248 = arith.mulf %239, %182 : vector<8x128xf32>
    %249 = arith.mulf %233, %241 : vector<8x128xf32>
    %250 = arith.addf %248, %249 : vector<8x128xf32>
    %251 = math.tanh %250 : vector<8x128xf32>
    %252 = arith.mulf %247, %251 : vector<8x128xf32>
    %253 = arith.truncf %252 : vector<8x128xf32> to vector<8x128xbf16>
    %c0_83 = arith.constant 0 : index
    %c0_84 = arith.constant 0 : index
    %254 = vector.load %arg5[%c0_83, %c0_84] : memref<128x512xbf16, #tpu.memory_space<vmem>>, vector<128x512xbf16>
    %cst_85 = arith.constant dense<0.000000e+00> : vector<8x512xf32>
    %255 = tpu.matmul %253, %254, %cst_85 {dimension_numbers = #tpu.dot_dimension_numbers<[1], [0], [0], [1], [0, 0, 1, 1], [], []>} : vector<8x128xbf16>, vector<128x512xbf16>, vector<8x512xf32> -> vector<8x512xf32>
    %256 = vector.broadcast %10 : vector<1x512xf32> to vector<8x512xf32>
    %257 = arith.addf %224, %256 : vector<8x512xf32>
    %258 = arith.addf %255, %257 : vector<8x512xf32>
    %259 = vector.extract_strided_slice %258 {offsets = [0, 0], sizes = [8, 128], strides = [1, 1]} : vector<8x512xf32> to vector<8x128xf32>
    %260 = arith.negf %259 : vector<8x128xf32>
    %261 = math.exp %260 : vector<8x128xf32>
    %cst_86 = arith.constant 1.000000e+00 : f32
    %262 = vector.broadcast %cst_86 : f32 to vector<8x128xf32>
    %263 = arith.addf %262, %261 : vector<8x128xf32>
    %264 = arith.divf %262, %263 : vector<8x128xf32>
    %265 = vector.extract_strided_slice %258 {offsets = [0, 128], sizes = [8, 128], strides = [1, 1]} : vector<8x512xf32> to vector<8x128xf32>
    %266 = arith.negf %265 : vector<8x128xf32>
    %267 = math.exp %266 : vector<8x128xf32>
    %cst_87 = arith.constant 1.000000e+00 : f32
    %268 = vector.broadcast %cst_87 : f32 to vector<8x128xf32>
    %269 = arith.addf %268, %267 : vector<8x128xf32>
    %270 = arith.divf %268, %269 : vector<8x128xf32>
    %271 = vector.extract_strided_slice %258 {offsets = [0, 256], sizes = [8, 128], strides = [1, 1]} : vector<8x512xf32> to vector<8x128xf32>
    %272 = math.tanh %271 : vector<8x128xf32>
    %273 = vector.extract_strided_slice %258 {offsets = [0, 384], sizes = [8, 128], strides = [1, 1]} : vector<8x512xf32> to vector<8x128xf32>
    %274 = arith.negf %273 : vector<8x128xf32>
    %275 = math.exp %274 : vector<8x128xf32>
    %cst_88 = arith.constant 1.000000e+00 : f32
    %276 = vector.broadcast %cst_88 : f32 to vector<8x128xf32>
    %277 = arith.addf %276, %275 : vector<8x128xf32>
    %278 = arith.divf %276, %277 : vector<8x128xf32>
    %279 = arith.mulf %270, %213 : vector<8x128xf32>
    %280 = arith.mulf %264, %272 : vector<8x128xf32>
    %281 = arith.addf %279, %280 : vector<8x128xf32>
    %282 = math.tanh %281 : vector<8x128xf32>
    %283 = arith.mulf %278, %282 : vector<8x128xf32>
    %284 = arith.truncf %283 : vector<8x128xf32> to vector<8x128xbf16>
    %285 = arith.index_cast %220 : i32 to index
    %c0_89 = arith.constant 0 : index
    %286 = vector.load %arg8[%285, %c0_89] : memref<64x128xbf16, #tpu.memory_space<vmem>>, vector<8x128xbf16>
    tpu.vector_store %arg8[%285, %c0_89], %284 {strides = array<i32>} : memref<64x128xbf16, #tpu.memory_space<vmem>>, vector<8x128xbf16>,
    %c4_i32 = arith.constant 4 : i32
    %c8_i32_90 = arith.constant 8 : i32
    %287 = arith.muli %c4_i32, %c8_i32_90 : i32
    %288 = tpu.assume_multiple %287, 8 : i32
    %c0_91 = arith.constant 0 : index
    %c0_92 = arith.constant 0 : index
    %289 = vector.load %arg4[%c0_91, %c0_92] : memref<128x512xbf16, #tpu.memory_space<vmem>>, vector<128x512xbf16>
    %cst_93 = arith.constant dense<0.000000e+00> : vector<8x512xf32>
    %290 = tpu.matmul %253, %289, %cst_93 {dimension_numbers = #tpu.dot_dimension_numbers<[1], [0], [0], [1], [0, 0, 1, 1], [], []>} : vector<8x128xbf16>, vector<128x512xbf16>, vector<8x512xf32> -> vector<8x512xf32>
    %c0_94 = arith.constant 0 : index
    %c0_95 = arith.constant 0 : index
    %291 = vector.load %arg6[%c0_94, %c0_95] : memref<128x512xbf16, #tpu.memory_space<vmem>>, vector<128x512xbf16>
    %cst_96 = arith.constant dense<0.000000e+00> : vector<8x512xf32>
    %292 = tpu.matmul %284, %291, %cst_96 {dimension_numbers = #tpu.dot_dimension_numbers<[1], [0], [0], [1], [0, 0, 1, 1], [], []>} : vector<8x128xbf16>, vector<128x512xbf16>, vector<8x512xf32> -> vector<8x512xf32>
    %293 = arith.index_cast %288 : i32 to index
    %c0_97 = arith.constant 0 : index
    %294 = vector.load %arg9[%293, %c0_97] : memref<64x512xf32, #tpu.memory_space<vmem>>, vector<8x512xf32>
    %295 = arith.addf %294, %290 : vector<8x512xf32>
    %296 = vector.extract_strided_slice %295 {offsets = [0, 0], sizes = [8, 128], strides = [1, 1]} : vector<8x512xf32> to vector<8x128xf32>
    %297 = arith.negf %296 : vector<8x128xf32>
    %298 = math.exp %297 : vector<8x128xf32>
    %cst_98 = arith.constant 1.000000e+00 : f32
    %299 = vector.broadcast %cst_98 : f32 to vector<8x128xf32>
    %300 = arith.addf %299, %298 : vector<8x128xf32>
    %301 = arith.divf %299, %300 : vector<8x128xf32>
    %302 = vector.extract_strided_slice %295 {offsets = [0, 128], sizes = [8, 128], strides = [1, 1]} : vector<8x512xf32> to vector<8x128xf32>
    %303 = arith.negf %302 : vector<8x128xf32>
    %304 = math.exp %303 : vector<8x128xf32>
    %cst_99 = arith.constant 1.000000e+00 : f32
    %305 = vector.broadcast %cst_99 : f32 to vector<8x128xf32>
    %306 = arith.addf %305, %304 : vector<8x128xf32>
    %307 = arith.divf %305, %306 : vector<8x128xf32>
    %308 = vector.extract_strided_slice %295 {offsets = [0, 256], sizes = [8, 128], strides = [1, 1]} : vector<8x512xf32> to vector<8x128xf32>
    %309 = math.tanh %308 : vector<8x128xf32>
    %310 = vector.extract_strided_slice %295 {offsets = [0, 384], sizes = [8, 128], strides = [1, 1]} : vector<8x512xf32> to vector<8x128xf32>
    %311 = arith.negf %310 : vector<8x128xf32>
    %312 = math.exp %311 : vector<8x128xf32>
    %cst_100 = arith.constant 1.000000e+00 : f32
    %313 = vector.broadcast %cst_100 : f32 to vector<8x128xf32>
    %314 = arith.addf %313, %312 : vector<8x128xf32>
    %315 = arith.divf %313, %314 : vector<8x128xf32>
    %316 = arith.mulf %307, %250 : vector<8x128xf32>
    %317 = arith.mulf %301, %309 : vector<8x128xf32>
    %318 = arith.addf %316, %317 : vector<8x128xf32>
    %319 = math.tanh %318 : vector<8x128xf32>
    %320 = arith.mulf %315, %319 : vector<8x128xf32>
    %321 = arith.truncf %320 : vector<8x128xf32> to vector<8x128xbf16>
    %c0_101 = arith.constant 0 : index
    %c0_102 = arith.constant 0 : index
    %322 = vector.load %arg5[%c0_101, %c0_102] : memref<128x512xbf16, #tpu.memory_space<vmem>>, vector<128x512xbf16>
    %cst_103 = arith.constant dense<0.000000e+00> : vector<8x512xf32>
    %323 = tpu.matmul %321, %322, %cst_103 {dimension_numbers = #tpu.dot_dimension_numbers<[1], [0], [0], [1], [0, 0, 1, 1], [], []>} : vector<8x128xbf16>, vector<128x512xbf16>, vector<8x512xf32> -> vector<8x512xf32>
    %324 = vector.broadcast %10 : vector<1x512xf32> to vector<8x512xf32>
    %325 = arith.addf %292, %324 : vector<8x512xf32>
    %326 = arith.addf %323, %325 : vector<8x512xf32>
    %327 = vector.extract_strided_slice %326 {offsets = [0, 0], sizes = [8, 128], strides = [1, 1]} : vector<8x512xf32> to vector<8x128xf32>
    %328 = arith.negf %327 : vector<8x128xf32>
    %329 = math.exp %328 : vector<8x128xf32>
    %cst_104 = arith.constant 1.000000e+00 : f32
    %330 = vector.broadcast %cst_104 : f32 to vector<8x128xf32>
    %331 = arith.addf %330, %329 : vector<8x128xf32>
    %332 = arith.divf %330, %331 : vector<8x128xf32>
    %333 = vector.extract_strided_slice %326 {offsets = [0, 128], sizes = [8, 128], strides = [1, 1]} : vector<8x512xf32> to vector<8x128xf32>
    %334 = arith.negf %333 : vector<8x128xf32>
    %335 = math.exp %334 : vector<8x128xf32>
    %cst_105 = arith.constant 1.000000e+00 : f32
    %336 = vector.broadcast %cst_105 : f32 to vector<8x128xf32>
    %337 = arith.addf %336, %335 : vector<8x128xf32>
    %338 = arith.divf %336, %337 : vector<8x128xf32>
    %339 = vector.extract_strided_slice %326 {offsets = [0, 256], sizes = [8, 128], strides = [1, 1]} : vector<8x512xf32> to vector<8x128xf32>
    %340 = math.tanh %339 : vector<8x128xf32>
    %341 = vector.extract_strided_slice %326 {offsets = [0, 384], sizes = [8, 128], strides = [1, 1]} : vector<8x512xf32> to vector<8x128xf32>
    %342 = arith.negf %341 : vector<8x128xf32>
    %343 = math.exp %342 : vector<8x128xf32>
    %cst_106 = arith.constant 1.000000e+00 : f32
    %344 = vector.broadcast %cst_106 : f32 to vector<8x128xf32>
    %345 = arith.addf %344, %343 : vector<8x128xf32>
    %346 = arith.divf %344, %345 : vector<8x128xf32>
    %347 = arith.mulf %338, %281 : vector<8x128xf32>
    %348 = arith.mulf %332, %340 : vector<8x128xf32>
    %349 = arith.addf %347, %348 : vector<8x128xf32>
    %350 = math.tanh %349 : vector<8x128xf32>
    %351 = arith.mulf %346, %350 : vector<8x128xf32>
    %352 = arith.truncf %351 : vector<8x128xf32> to vector<8x128xbf16>
    %353 = arith.index_cast %288 : i32 to index
    %c0_107 = arith.constant 0 : index
    %354 = vector.load %arg8[%353, %c0_107] : memref<64x128xbf16, #tpu.memory_space<vmem>>, vector<8x128xbf16>
    tpu.vector_store %arg8[%353, %c0_107], %352 {strides = array<i32>} : memref<64x128xbf16, #tpu.memory_space<vmem>>, vector<8x128xbf16>,
    %c5_i32 = arith.constant 5 : i32
    %c8_i32_108 = arith.constant 8 : i32
    %355 = arith.muli %c5_i32, %c8_i32_108 : i32
    %356 = tpu.assume_multiple %355, 8 : i32
    %c0_109 = arith.constant 0 : index
    %c0_110 = arith.constant 0 : index
    %357 = vector.load %arg4[%c0_109, %c0_110] : memref<128x512xbf16, #tpu.memory_space<vmem>>, vector<128x512xbf16>
    %cst_111 = arith.constant dense<0.000000e+00> : vector<8x512xf32>
    %358 = tpu.matmul %321, %357, %cst_111 {dimension_numbers = #tpu.dot_dimension_numbers<[1], [0], [0], [1], [0, 0, 1, 1], [], []>} : vector<8x128xbf16>, vector<128x512xbf16>, vector<8x512xf32> -> vector<8x512xf32>
    %c0_112 = arith.constant 0 : index
    %c0_113 = arith.constant 0 : index
    %359 = vector.load %arg6[%c0_112, %c0_113] : memref<128x512xbf16, #tpu.memory_space<vmem>>, vector<128x512xbf16>
    %cst_114 = arith.constant dense<0.000000e+00> : vector<8x512xf32>
    %360 = tpu.matmul %352, %359, %cst_114 {dimension_numbers = #tpu.dot_dimension_numbers<[1], [0], [0], [1], [0, 0, 1, 1], [], []>} : vector<8x128xbf16>, vector<128x512xbf16>, vector<8x512xf32> -> vector<8x512xf32>
    %361 = arith.index_cast %356 : i32 to index
    %c0_115 = arith.constant 0 : index
    %362 = vector.load %arg9[%361, %c0_115] : memref<64x512xf32, #tpu.memory_space<vmem>>, vector<8x512xf32>
    %363 = arith.addf %362, %358 : vector<8x512xf32>
    %364 = vector.extract_strided_slice %363 {offsets = [0, 0], sizes = [8, 128], strides = [1, 1]} : vector<8x512xf32> to vector<8x128xf32>
    %365 = arith.negf %364 : vector<8x128xf32>
    %366 = math.exp %365 : vector<8x128xf32>
    %cst_116 = arith.constant 1.000000e+00 : f32
    %367 = vector.broadcast %cst_116 : f32 to vector<8x128xf32>
    %368 = arith.addf %367, %366 : vector<8x128xf32>
    %369 = arith.divf %367, %368 : vector<8x128xf32>
    %370 = vector.extract_strided_slice %363 {offsets = [0, 128], sizes = [8, 128], strides = [1, 1]} : vector<8x512xf32> to vector<8x128xf32>
    %371 = arith.negf %370 : vector<8x128xf32>
    %372 = math.exp %371 : vector<8x128xf32>
    %cst_117 = arith.constant 1.000000e+00 : f32
    %373 = vector.broadcast %cst_117 : f32 to vector<8x128xf32>
    %374 = arith.addf %373, %372 : vector<8x128xf32>
    %375 = arith.divf %373, %374 : vector<8x128xf32>
    %376 = vector.extract_strided_slice %363 {offsets = [0, 256], sizes = [8, 128], strides = [1, 1]} : vector<8x512xf32> to vector<8x128xf32>
    %377 = math.tanh %376 : vector<8x128xf32>
    %378 = vector.extract_strided_slice %363 {offsets = [0, 384], sizes = [8, 128], strides = [1, 1]} : vector<8x512xf32> to vector<8x128xf32>
    %379 = arith.negf %378 : vector<8x128xf32>
    %380 = math.exp %379 : vector<8x128xf32>
    %cst_118 = arith.constant 1.000000e+00 : f32
    %381 = vector.broadcast %cst_118 : f32 to vector<8x128xf32>
    %382 = arith.addf %381, %380 : vector<8x128xf32>
    %383 = arith.divf %381, %382 : vector<8x128xf32>
    %384 = arith.mulf %375, %318 : vector<8x128xf32>
    %385 = arith.mulf %369, %377 : vector<8x128xf32>
    %386 = arith.addf %384, %385 : vector<8x128xf32>
    %387 = math.tanh %386 : vector<8x128xf32>
    %388 = arith.mulf %383, %387 : vector<8x128xf32>
    %389 = arith.truncf %388 : vector<8x128xf32> to vector<8x128xbf16>
    %c0_119 = arith.constant 0 : index
    %c0_120 = arith.constant 0 : index
    %390 = vector.load %arg5[%c0_119, %c0_120] : memref<128x512xbf16, #tpu.memory_space<vmem>>, vector<128x512xbf16>
    %cst_121 = arith.constant dense<0.000000e+00> : vector<8x512xf32>
    %391 = tpu.matmul %389, %390, %cst_121 {dimension_numbers = #tpu.dot_dimension_numbers<[1], [0], [0], [1], [0, 0, 1, 1], [], []>} : vector<8x128xbf16>, vector<128x512xbf16>, vector<8x512xf32> -> vector<8x512xf32>
    %392 = vector.broadcast %10 : vector<1x512xf32> to vector<8x512xf32>
    %393 = arith.addf %360, %392 : vector<8x512xf32>
    %394 = arith.addf %391, %393 : vector<8x512xf32>
    %395 = vector.extract_strided_slice %394 {offsets = [0, 0], sizes = [8, 128], strides = [1, 1]} : vector<8x512xf32> to vector<8x128xf32>
    %396 = arith.negf %395 : vector<8x128xf32>
    %397 = math.exp %396 : vector<8x128xf32>
    %cst_122 = arith.constant 1.000000e+00 : f32
    %398 = vector.broadcast %cst_122 : f32 to vector<8x128xf32>
    %399 = arith.addf %398, %397 : vector<8x128xf32>
    %400 = arith.divf %398, %399 : vector<8x128xf32>
    %401 = vector.extract_strided_slice %394 {offsets = [0, 128], sizes = [8, 128], strides = [1, 1]} : vector<8x512xf32> to vector<8x128xf32>
    %402 = arith.negf %401 : vector<8x128xf32>
    %403 = math.exp %402 : vector<8x128xf32>
    %cst_123 = arith.constant 1.000000e+00 : f32
    %404 = vector.broadcast %cst_123 : f32 to vector<8x128xf32>
    %405 = arith.addf %404, %403 : vector<8x128xf32>
    %406 = arith.divf %404, %405 : vector<8x128xf32>
    %407 = vector.extract_strided_slice %394 {offsets = [0, 256], sizes = [8, 128], strides = [1, 1]} : vector<8x512xf32> to vector<8x128xf32>
    %408 = math.tanh %407 : vector<8x128xf32>
    %409 = vector.extract_strided_slice %394 {offsets = [0, 384], sizes = [8, 128], strides = [1, 1]} : vector<8x512xf32> to vector<8x128xf32>
    %410 = arith.negf %409 : vector<8x128xf32>
    %411 = math.exp %410 : vector<8x128xf32>
    %cst_124 = arith.constant 1.000000e+00 : f32
    %412 = vector.broadcast %cst_124 : f32 to vector<8x128xf32>
    %413 = arith.addf %412, %411 : vector<8x128xf32>
    %414 = arith.divf %412, %413 : vector<8x128xf32>
    %415 = arith.mulf %406, %349 : vector<8x128xf32>
    %416 = arith.mulf %400, %408 : vector<8x128xf32>
    %417 = arith.addf %415, %416 : vector<8x128xf32>
    %418 = math.tanh %417 : vector<8x128xf32>
    %419 = arith.mulf %414, %418 : vector<8x128xf32>
    %420 = arith.truncf %419 : vector<8x128xf32> to vector<8x128xbf16>
    %421 = arith.index_cast %356 : i32 to index
    %c0_125 = arith.constant 0 : index
    %422 = vector.load %arg8[%421, %c0_125] : memref<64x128xbf16, #tpu.memory_space<vmem>>, vector<8x128xbf16>
    tpu.vector_store %arg8[%421, %c0_125], %420 {strides = array<i32>} : memref<64x128xbf16, #tpu.memory_space<vmem>>, vector<8x128xbf16>,
    %c6_i32 = arith.constant 6 : i32
    %c8_i32_126 = arith.constant 8 : i32
    %423 = arith.muli %c6_i32, %c8_i32_126 : i32
    %424 = tpu.assume_multiple %423, 8 : i32
    %c0_127 = arith.constant 0 : index
    %c0_128 = arith.constant 0 : index
    %425 = vector.load %arg4[%c0_127, %c0_128] : memref<128x512xbf16, #tpu.memory_space<vmem>>, vector<128x512xbf16>
    %cst_129 = arith.constant dense<0.000000e+00> : vector<8x512xf32>
    %426 = tpu.matmul %389, %425, %cst_129 {dimension_numbers = #tpu.dot_dimension_numbers<[1], [0], [0], [1], [0, 0, 1, 1], [], []>} : vector<8x128xbf16>, vector<128x512xbf16>, vector<8x512xf32> -> vector<8x512xf32>
    %c0_130 = arith.constant 0 : index
    %c0_131 = arith.constant 0 : index
    %427 = vector.load %arg6[%c0_130, %c0_131] : memref<128x512xbf16, #tpu.memory_space<vmem>>, vector<128x512xbf16>
    %cst_132 = arith.constant dense<0.000000e+00> : vector<8x512xf32>
    %428 = tpu.matmul %420, %427, %cst_132 {dimension_numbers = #tpu.dot_dimension_numbers<[1], [0], [0], [1], [0, 0, 1, 1], [], []>} : vector<8x128xbf16>, vector<128x512xbf16>, vector<8x512xf32> -> vector<8x512xf32>
    %429 = arith.index_cast %424 : i32 to index
    %c0_133 = arith.constant 0 : index
    %430 = vector.load %arg9[%429, %c0_133] : memref<64x512xf32, #tpu.memory_space<vmem>>, vector<8x512xf32>
    %431 = arith.addf %430, %426 : vector<8x512xf32>
    %432 = vector.extract_strided_slice %431 {offsets = [0, 0], sizes = [8, 128], strides = [1, 1]} : vector<8x512xf32> to vector<8x128xf32>
    %433 = arith.negf %432 : vector<8x128xf32>
    %434 = math.exp %433 : vector<8x128xf32>
    %cst_134 = arith.constant 1.000000e+00 : f32
    %435 = vector.broadcast %cst_134 : f32 to vector<8x128xf32>
    %436 = arith.addf %435, %434 : vector<8x128xf32>
    %437 = arith.divf %435, %436 : vector<8x128xf32>
    %438 = vector.extract_strided_slice %431 {offsets = [0, 128], sizes = [8, 128], strides = [1, 1]} : vector<8x512xf32> to vector<8x128xf32>
    %439 = arith.negf %438 : vector<8x128xf32>
    %440 = math.exp %439 : vector<8x128xf32>
    %cst_135 = arith.constant 1.000000e+00 : f32
    %441 = vector.broadcast %cst_135 : f32 to vector<8x128xf32>
    %442 = arith.addf %441, %440 : vector<8x128xf32>
    %443 = arith.divf %441, %442 : vector<8x128xf32>
    %444 = vector.extract_strided_slice %431 {offsets = [0, 256], sizes = [8, 128], strides = [1, 1]} : vector<8x512xf32> to vector<8x128xf32>
    %445 = math.tanh %444 : vector<8x128xf32>
    %446 = vector.extract_strided_slice %431 {offsets = [0, 384], sizes = [8, 128], strides = [1, 1]} : vector<8x512xf32> to vector<8x128xf32>
    %447 = arith.negf %446 : vector<8x128xf32>
    %448 = math.exp %447 : vector<8x128xf32>
    %cst_136 = arith.constant 1.000000e+00 : f32
    %449 = vector.broadcast %cst_136 : f32 to vector<8x128xf32>
    %450 = arith.addf %449, %448 : vector<8x128xf32>
    %451 = arith.divf %449, %450 : vector<8x128xf32>
    %452 = arith.mulf %443, %386 : vector<8x128xf32>
    %453 = arith.mulf %437, %445 : vector<8x128xf32>
    %454 = arith.addf %452, %453 : vector<8x128xf32>
    %455 = math.tanh %454 : vector<8x128xf32>
    %456 = arith.mulf %451, %455 : vector<8x128xf32>
    %457 = arith.truncf %456 : vector<8x128xf32> to vector<8x128xbf16>
    %c0_137 = arith.constant 0 : index
    %c0_138 = arith.constant 0 : index
    %458 = vector.load %arg5[%c0_137, %c0_138] : memref<128x512xbf16, #tpu.memory_space<vmem>>, vector<128x512xbf16>
    %cst_139 = arith.constant dense<0.000000e+00> : vector<8x512xf32>
    %459 = tpu.matmul %457, %458, %cst_139 {dimension_numbers = #tpu.dot_dimension_numbers<[1], [0], [0], [1], [0, 0, 1, 1], [], []>} : vector<8x128xbf16>, vector<128x512xbf16>, vector<8x512xf32> -> vector<8x512xf32>
    %460 = vector.broadcast %10 : vector<1x512xf32> to vector<8x512xf32>
    %461 = arith.addf %428, %460 : vector<8x512xf32>
    %462 = arith.addf %459, %461 : vector<8x512xf32>
    %463 = vector.extract_strided_slice %462 {offsets = [0, 0], sizes = [8, 128], strides = [1, 1]} : vector<8x512xf32> to vector<8x128xf32>
    %464 = arith.negf %463 : vector<8x128xf32>
    %465 = math.exp %464 : vector<8x128xf32>
    %cst_140 = arith.constant 1.000000e+00 : f32
    %466 = vector.broadcast %cst_140 : f32 to vector<8x128xf32>
    %467 = arith.addf %466, %465 : vector<8x128xf32>
    %468 = arith.divf %466, %467 : vector<8x128xf32>
    %469 = vector.extract_strided_slice %462 {offsets = [0, 128], sizes = [8, 128], strides = [1, 1]} : vector<8x512xf32> to vector<8x128xf32>
    %470 = arith.negf %469 : vector<8x128xf32>
    %471 = math.exp %470 : vector<8x128xf32>
    %cst_141 = arith.constant 1.000000e+00 : f32
    %472 = vector.broadcast %cst_141 : f32 to vector<8x128xf32>
    %473 = arith.addf %472, %471 : vector<8x128xf32>
    %474 = arith.divf %472, %473 : vector<8x128xf32>
    %475 = vector.extract_strided_slice %462 {offsets = [0, 256], sizes = [8, 128], strides = [1, 1]} : vector<8x512xf32> to vector<8x128xf32>
    %476 = math.tanh %475 : vector<8x128xf32>
    %477 = vector.extract_strided_slice %462 {offsets = [0, 384], sizes = [8, 128], strides = [1, 1]} : vector<8x512xf32> to vector<8x128xf32>
    %478 = arith.negf %477 : vector<8x128xf32>
    %479 = math.exp %478 : vector<8x128xf32>
    %cst_142 = arith.constant 1.000000e+00 : f32
    %480 = vector.broadcast %cst_142 : f32 to vector<8x128xf32>
    %481 = arith.addf %480, %479 : vector<8x128xf32>
    %482 = arith.divf %480, %481 : vector<8x128xf32>
    %483 = arith.mulf %474, %417 : vector<8x128xf32>
    %484 = arith.mulf %468, %476 : vector<8x128xf32>
    %485 = arith.addf %483, %484 : vector<8x128xf32>
    %486 = math.tanh %485 : vector<8x128xf32>
    %487 = arith.mulf %482, %486 : vector<8x128xf32>
    %488 = arith.truncf %487 : vector<8x128xf32> to vector<8x128xbf16>
    %489 = arith.index_cast %424 : i32 to index
    %c0_143 = arith.constant 0 : index
    %490 = vector.load %arg8[%489, %c0_143] : memref<64x128xbf16, #tpu.memory_space<vmem>>, vector<8x128xbf16>
    tpu.vector_store %arg8[%489, %c0_143], %488 {strides = array<i32>} : memref<64x128xbf16, #tpu.memory_space<vmem>>, vector<8x128xbf16>,
    %c7_i32 = arith.constant 7 : i32
    %c8_i32_144 = arith.constant 8 : i32
    %491 = arith.muli %c7_i32, %c8_i32_144 : i32
    %492 = tpu.assume_multiple %491, 8 : i32
    %c0_145 = arith.constant 0 : index
    %c0_146 = arith.constant 0 : index
    %493 = vector.load %arg4[%c0_145, %c0_146] : memref<128x512xbf16, #tpu.memory_space<vmem>>, vector<128x512xbf16>
    %cst_147 = arith.constant dense<0.000000e+00> : vector<8x512xf32>
    %494 = tpu.matmul %457, %493, %cst_147 {dimension_numbers = #tpu.dot_dimension_numbers<[1], [0], [0], [1], [0, 0, 1, 1], [], []>} : vector<8x128xbf16>, vector<128x512xbf16>, vector<8x512xf32> -> vector<8x512xf32>
    %c0_148 = arith.constant 0 : index
    %c0_149 = arith.constant 0 : index
    %495 = vector.load %arg6[%c0_148, %c0_149] : memref<128x512xbf16, #tpu.memory_space<vmem>>, vector<128x512xbf16>
    %cst_150 = arith.constant dense<0.000000e+00> : vector<8x512xf32>
    %496 = tpu.matmul %488, %495, %cst_150 {dimension_numbers = #tpu.dot_dimension_numbers<[1], [0], [0], [1], [0, 0, 1, 1], [], []>} : vector<8x128xbf16>, vector<128x512xbf16>, vector<8x512xf32> -> vector<8x512xf32>
    %497 = arith.index_cast %492 : i32 to index
    %c0_151 = arith.constant 0 : index
    %498 = vector.load %arg9[%497, %c0_151] : memref<64x512xf32, #tpu.memory_space<vmem>>, vector<8x512xf32>
    %499 = arith.addf %498, %494 : vector<8x512xf32>
    %500 = vector.extract_strided_slice %499 {offsets = [0, 0], sizes = [8, 128], strides = [1, 1]} : vector<8x512xf32> to vector<8x128xf32>
    %501 = arith.negf %500 : vector<8x128xf32>
    %502 = math.exp %501 : vector<8x128xf32>
    %cst_152 = arith.constant 1.000000e+00 : f32
    %503 = vector.broadcast %cst_152 : f32 to vector<8x128xf32>
    %504 = arith.addf %503, %502 : vector<8x128xf32>
    %505 = arith.divf %503, %504 : vector<8x128xf32>
    %506 = vector.extract_strided_slice %499 {offsets = [0, 128], sizes = [8, 128], strides = [1, 1]} : vector<8x512xf32> to vector<8x128xf32>
    %507 = arith.negf %506 : vector<8x128xf32>
    %508 = math.exp %507 : vector<8x128xf32>
    %cst_153 = arith.constant 1.000000e+00 : f32
    %509 = vector.broadcast %cst_153 : f32 to vector<8x128xf32>
    %510 = arith.addf %509, %508 : vector<8x128xf32>
    %511 = arith.divf %509, %510 : vector<8x128xf32>
    %512 = vector.extract_strided_slice %499 {offsets = [0, 256], sizes = [8, 128], strides = [1, 1]} : vector<8x512xf32> to vector<8x128xf32>
    %513 = math.tanh %512 : vector<8x128xf32>
    %514 = vector.extract_strided_slice %499 {offsets = [0, 384], sizes = [8, 128], strides = [1, 1]} : vector<8x512xf32> to vector<8x128xf32>
    %515 = arith.negf %514 : vector<8x128xf32>
    %516 = math.exp %515 : vector<8x128xf32>
    %cst_154 = arith.constant 1.000000e+00 : f32
    %517 = vector.broadcast %cst_154 : f32 to vector<8x128xf32>
    %518 = arith.addf %517, %516 : vector<8x128xf32>
    %519 = arith.divf %517, %518 : vector<8x128xf32>
    %520 = arith.mulf %511, %454 : vector<8x128xf32>
    %521 = arith.mulf %505, %513 : vector<8x128xf32>
    %522 = arith.addf %520, %521 : vector<8x128xf32>
    %523 = math.tanh %522 : vector<8x128xf32>
    %524 = arith.mulf %519, %523 : vector<8x128xf32>
    %525 = arith.truncf %524 : vector<8x128xf32> to vector<8x128xbf16>
    %c0_155 = arith.constant 0 : index
    %c0_156 = arith.constant 0 : index
    %526 = vector.load %arg5[%c0_155, %c0_156] : memref<128x512xbf16, #tpu.memory_space<vmem>>, vector<128x512xbf16>
    %cst_157 = arith.constant dense<0.000000e+00> : vector<8x512xf32>
    %527 = tpu.matmul %525, %526, %cst_157 {dimension_numbers = #tpu.dot_dimension_numbers<[1], [0], [0], [1], [0, 0, 1, 1], [], []>} : vector<8x128xbf16>, vector<128x512xbf16>, vector<8x512xf32> -> vector<8x512xf32>
    %528 = vector.broadcast %10 : vector<1x512xf32> to vector<8x512xf32>
    %529 = arith.addf %496, %528 : vector<8x512xf32>
    %530 = arith.addf %527, %529 : vector<8x512xf32>
    %531 = vector.extract_strided_slice %530 {offsets = [0, 0], sizes = [8, 128], strides = [1, 1]} : vector<8x512xf32> to vector<8x128xf32>
    %532 = arith.negf %531 : vector<8x128xf32>
    %533 = math.exp %532 : vector<8x128xf32>
    %cst_158 = arith.constant 1.000000e+00 : f32
    %534 = vector.broadcast %cst_158 : f32 to vector<8x128xf32>
    %535 = arith.addf %534, %533 : vector<8x128xf32>
    %536 = arith.divf %534, %535 : vector<8x128xf32>
    %537 = vector.extract_strided_slice %530 {offsets = [0, 128], sizes = [8, 128], strides = [1, 1]} : vector<8x512xf32> to vector<8x128xf32>
    %538 = arith.negf %537 : vector<8x128xf32>
    %539 = math.exp %538 : vector<8x128xf32>
    %cst_159 = arith.constant 1.000000e+00 : f32
    %540 = vector.broadcast %cst_159 : f32 to vector<8x128xf32>
    %541 = arith.addf %540, %539 : vector<8x128xf32>
    %542 = arith.divf %540, %541 : vector<8x128xf32>
    %543 = vector.extract_strided_slice %530 {offsets = [0, 256], sizes = [8, 128], strides = [1, 1]} : vector<8x512xf32> to vector<8x128xf32>
    %544 = math.tanh %543 : vector<8x128xf32>
    %545 = vector.extract_strided_slice %530 {offsets = [0, 384], sizes = [8, 128], strides = [1, 1]} : vector<8x512xf32> to vector<8x128xf32>
    %546 = arith.negf %545 : vector<8x128xf32>
    %547 = math.exp %546 : vector<8x128xf32>
    %cst_160 = arith.constant 1.000000e+00 : f32
    %548 = vector.broadcast %cst_160 : f32 to vector<8x128xf32>
    %549 = arith.addf %548, %547 : vector<8x128xf32>
    %550 = arith.divf %548, %549 : vector<8x128xf32>
    %551 = arith.mulf %542, %485 : vector<8x128xf32>
    %552 = arith.mulf %536, %544 : vector<8x128xf32>
    %553 = arith.addf %551, %552 : vector<8x128xf32>
    %554 = math.tanh %553 : vector<8x128xf32>
    %555 = arith.mulf %550, %554 : vector<8x128xf32>
    %556 = arith.truncf %555 : vector<8x128xf32> to vector<8x128xbf16>
    %557 = arith.index_cast %492 : i32 to index
    %c0_161 = arith.constant 0 : index
    %558 = vector.load %arg8[%557, %c0_161] : memref<64x128xbf16, #tpu.memory_space<vmem>>, vector<8x128xbf16>
    tpu.vector_store %arg8[%557, %c0_161], %556 {strides = array<i32>} : memref<64x128xbf16, #tpu.memory_space<vmem>>, vector<8x128xbf16>,
    %c8_i32_162 = arith.constant 8 : i32
    %c0_163 = arith.constant 0 : index
    %c0_164 = arith.constant 0 : index
    %559 = vector.load %arg10[%c0_163, %c0_164] : memref<8x128xbf16, #tpu.memory_space<vmem>>, vector<8x128xbf16>
    tpu.vector_store %arg10[%c0_163, %c0_164], %525 {strides = array<i32>} : memref<8x128xbf16, #tpu.memory_space<vmem>>, vector<8x128xbf16>,
    %c0_165 = arith.constant 0 : index
    %c0_166 = arith.constant 0 : index
    %560 = vector.load %arg11[%c0_165, %c0_166] : memref<8x128xf32, #tpu.memory_space<vmem>>, vector<8x128xf32>
    tpu.vector_store %arg11[%c0_165, %c0_166], %522 {strides = array<i32>} : memref<8x128xf32, #tpu.memory_space<vmem>>, vector<8x128xf32>,
    %c0_167 = arith.constant 0 : index
    %c0_168 = arith.constant 0 : index
    %561 = vector.load %arg12[%c0_167, %c0_168] : memref<8x128xbf16, #tpu.memory_space<vmem>>, vector<8x128xbf16>
    tpu.vector_store %arg12[%c0_167, %c0_168], %556 {strides = array<i32>} : memref<8x128xbf16, #tpu.memory_space<vmem>>, vector<8x128xbf16>,
    %c0_169 = arith.constant 0 : index
    %c0_170 = arith.constant 0 : index
    %562 = vector.load %arg13[%c0_169, %c0_170] : memref<8x128xf32, #tpu.memory_space<vmem>>, vector<8x128xf32>
    tpu.vector_store %arg13[%c0_169, %c0_170], %553 {strides = array<i32>} : memref<8x128xf32, #tpu.memory_space<vmem>>, vector<8x128xf32>,
    return
  }
  func.func @transform_0(%arg0: i32) -> (i32, i32) {
    %c0_i32 = arith.constant 0 : i32
    %c0_i32_0 = arith.constant 0 : i32
    return %arg0, %c0_i32 : i32, i32
  }
  func.func @transform_1(%arg0: i32) -> (i32, i32) {
    %c0_i32 = arith.constant 0 : i32
    %c0_i32_0 = arith.constant 0 : i32
    %c0_i32_1 = arith.constant 0 : i32
    return %c0_i32, %c0_i32_0 : i32, i32
  }
  func.func @transform_2(%arg0: i32) -> (i32, i32) {
    %c0_i32 = arith.constant 0 : i32
    %c0_i32_0 = arith.constant 0 : i32
    %c0_i32_1 = arith.constant 0 : i32
    return %c0_i32, %c0_i32_0 : i32, i32
  }
  func.func @transform_3(%arg0: i32) -> (i32, i32) {
    %c0_i32 = arith.constant 0 : i32
    %c0_i32_0 = arith.constant 0 : i32
    %c0_i32_1 = arith.constant 0 : i32
    return %c0_i32, %c0_i32_0 : i32, i32
  }
  func.func @transform_4(%arg0: i32) -> (i32, i32) {
    %c0_i32 = arith.constant 0 : i32
    %c0_i32_0 = arith.constant 0 : i32
    %c0_i32_1 = arith.constant 0 : i32
    return %c0_i32, %c0_i32_0 : i32, i32
  }
  func.func @transform_5(%arg0: i32) -> (i32, i32) {
    %c0_i32 = arith.constant 0 : i32
    %c0_i32_0 = arith.constant 0 : i32
    %c0_i32_1 = arith.constant 0 : i32
    return %c0_i32, %c0_i32_0 : i32, i32
  }
  func.func @transform_6(%arg0: i32) -> (i32, i32) {
    %c0_i32 = arith.constant 0 : i32
    %c0_i32_0 = arith.constant 0 : i32
    %c0_i32_1 = arith.constant 0 : i32
    return %c0_i32, %c0_i32_0 : i32, i32
  }
  func.func @transform_7(%arg0: i32) -> (i32, i32) {
    %c0_i32 = arith.constant 0 : i32
    %c0_i32_0 = arith.constant 0 : i32
    return %arg0, %c0_i32 : i32, i32
  }
}

</mosaic_0001>

<bundles_post_ra>
// kernel: decoder_forward.3
= control target key start
LH: loop header
LB: loop body
LE: loop exit
PB: predicated region body
PF: predicated region fallthrough
CT: control target
= control target key end

     0   :  { %s1040_s12 = smov 0   ;;  %s1042_s13 = smov 0   ;;  %s1305_s0 = inlined_call_operand.vmem [shape: bf16[64,128], index: 0, kind: input, shape index: {}]   ;;  %s1306_s1 = inlined_call_operand.vmem [shape: bf16[128,128], index: 1, kind: input, shape index: {}]   ;;  %s1307_s2 = inlined_call_operand.vmem [shape: f32[1,128], index: 2, kind: input, shape index: {}]   ;;  %s1308_s3 = inlined_call_operand.vmem [shape: f32[64,128], index: 3, kind: output, shape index: {}]  }
   0x1   :  { %s1044_s14 = smov 0  }
   0x2 LB: > { %s28_s15 = sadd.s32 1, %s1010_s13  ;;  %p826_p0 = scmp.ge.s32.totalorder %s1014_s14, 1  ;;  %s1014_s14 = sphi %s1044_s14, %s13_s14   ;;  %s1010_s13 = sphi %s1042_s13, %s1310_s13   ;;  %s1006_s12 = sphi %s1040_s12, %s1309_s12  }
   0x3   : > { %p30_p1 = scmp.ge.s32.totalorder %s28_s15, 2  ;;  %p178_p2 = scmp.lt.s32.totalorder %s1014_s14, 3 }
   0x5   : > { %s1312_s15 = smov (%p30_p1, %s28_s15), 0  ;;  %p179_p3 = pnand %p826_p0, %p178_p2 }
   0x6   : > { %v928_v0 = vld [vmem:[%s1306_s1] sm:$0xff] (!%p179_p3)   ;;  %v929_v1 = vld [vmem:[%s1306_s1 + $0x8] sm:$0xff] (!%p179_p3)   ;;  %v930_v2 = vld [vmem:[%s1306_s1 + $0x10] sm:$0xff] (!%p179_p3)   ;;  %p406_p4 = scmp.eq.s32.totalorder (!%p179_p3), %s1006_s12, 0 }
   0x7   : > { %182 = sbr.rel (%p179_p3) target bundleno = 877 (0x36d), region = 32  ;;  %860 = vmatprep.subr.bf16.mxu0 (!%p179_p3), %v928_v0  ;;  %884 = vmatprep.subr.bf16.mxu1 (!%p179_p3), %v928_v0  ;;  %v931_v3 = vld [vmem:[%s1306_s1 + $0x18] sm:$0xff] (!%p179_p3)   ;;  %v936_v4 = vld [vmem:[%s1305_s0] sm:$0xff] (!%p179_p3)   ;;  %v937_v5 = vld [vmem:[%s1305_s0 + $0x10] sm:$0xff] (!%p179_p3)  }
   0x8   : > { %861 = vmatpush3.bf16.msra.mxu0 (!%p179_p3), %v928_v0  ;;  %892 = vmatpush3.bf16.msra.mxu1 (!%p179_p3), %v928_v0  ;;  %v932_v6 = vld [vmem:[%s1306_s1 + $0x20] sm:$0xff] (!%p179_p3)   ;;  %v933_v7 = vld [vmem:[%s1306_s1 + $0x28] sm:$0xff] (!%p179_p3)   ;;  %v934_v8 = vld [vmem:[%s1306_s1 + $0x30] sm:$0xff] (!%p179_p3)  }
   0x9   : > { %862 = vmatprep.subr.bf16.mxu0 (!%p179_p3), %v929_v1  ;;  %885 = vmatprep.subr.bf16.mxu1 (!%p179_p3), %v929_v1  ;;  %v935_v9 = vld [vmem:[%s1306_s1 + $0x38] sm:$0xff] (!%p179_p3)   ;;  %v938_v10 = vld [vmem:[%s1305_s0 + $0x8] sm:$0xff] (!%p179_p3)   ;;  %v827_v12 = vld [vmem:[%s1307_s2] ss:$0 sm:$0xff] (!%p179_p3) }
   0xa   : > { %876 = vmatprep.mubr.bf16.mxu0 (!%p179_p3), %v936_v4  ;;  %880 = vmatprep.mubr.bf16.mxu1 (!%p179_p3), %v937_v5  ;;  %v939_v11 = vld [vmem:[%s1305_s0 + $0x18] sm:$0xff] (!%p179_p3)  }
   0xc   : > { %863 = vmatpush3.bf16.msra.mxu0 (!%p179_p3), %v929_v1  ;;  %893 = vmatpush3.bf16.msra.mxu1 (!%p179_p3), %v929_v1 }
   0xd   : > { %864 = vmatprep.subr.bf16.mxu0 (!%p179_p3), %v930_v2  ;;  %886 = vmatprep.subr.bf16.mxu1 (!%p179_p3), %v930_v2 }
   0xe   : > { %vm412_vm0 = vcmask (%p406_p4), 7168   ;;  %v1016_v29 = vmov (%p406_p4), -inf   ;;  %v1017_v30 = vmov (%p406_p4), 0.0  }
   0xf   : > { %413 = vst.msk [vmem:[#allocation2] sm:$0xff] (%p406_p4), %vm412_vm0, %v1016_v29  ;;  %414 = vst.msk [vmem:[#allocation2 + $0x8] sm:$0xff] (%p406_p4), %vm412_vm0, %v1016_v29 }
  0x10   : > { %865 = vmatpush3.bf16.msra.mxu0 %v930_v2  ;;  %894 = vmatpush3.bf16.msra.mxu1 %v930_v2  ;;  %415 = vst.msk [vmem:[#allocation2 + $0x10] sm:$0xff] (%p406_p4), %vm412_vm0, %v1016_v29  ;;  %416 = vst.msk [vmem:[#allocation2 + $0x18] sm:$0xff] (%p406_p4), %vm412_vm0, %v1016_v29 }
  0x11   : > { %866 = vmatprep.subr.bf16.mxu0 %v931_v3  ;;  %887 = vmatprep.subr.bf16.mxu1 %v931_v3  ;;  %417 = vst.msk [vmem:[#allocation2 + $0x20] sm:$0xff] (%p406_p4), %vm412_vm0, %v1016_v29  ;;  %418 = vst.msk [vmem:[#allocation2 + $0x28] sm:$0xff] (%p406_p4), %vm412_vm0, %v1016_v29 }
  0x12   : > { %419 = vst.msk [vmem:[#allocation2 + $0x30] sm:$0xff] (%p406_p4), %vm412_vm0, %v1016_v29  ;;  %420 = vst.msk [vmem:[#allocation2 + $0x38] sm:$0xff] (%p406_p4), %vm412_vm0, %v1016_v29 }
  0x13   : > { %421 = vst.msk [vmem:[#allocation3] sm:$0xff] (%p406_p4), %vm412_vm0, %v1017_v30  ;;  %422 = vst.msk [vmem:[#allocation3 + $0x8] sm:$0xff] (%p406_p4), %vm412_vm0, %v1017_v30 }
  0x14   : > { %867 = vmatpush3.bf16.msra.mxu0 %v931_v3  ;;  %895 = vmatpush3.bf16.msra.mxu1 %v931_v3  ;;  %423 = vst.msk [vmem:[#allocation3 + $0x10] sm:$0xff] (%p406_p4), %vm412_vm0, %v1017_v30  ;;  %424 = vst.msk [vmem:[#allocation3 + $0x18] sm:$0xff] (%p406_p4), %vm412_vm0, %v1017_v30 }
  0x15   : > { %868 = vmatprep.subr.bf16.mxu0 %v932_v6  ;;  %888 = vmatprep.subr.bf16.mxu1 %v932_v6  ;;  %425 = vst.msk [vmem:[#allocation3 + $0x20] sm:$0xff] (%p406_p4), %vm412_vm0, %v1017_v30  ;;  %426 = vst.msk [vmem:[#allocation3 + $0x28] sm:$0xff] (%p406_p4), %vm412_vm0, %v1017_v30 }
  0x16   : > { %427 = vst.msk [vmem:[#allocation3 + $0x30] sm:$0xff] (%p406_p4), %vm412_vm0, %v1017_v30  ;;  %428 = vst.msk [vmem:[#allocation3 + $0x38] sm:$0xff] (%p406_p4), %vm412_vm0, %v1017_v30 }
  0x18   : > { %869 = vmatpush3.bf16.msra.mxu0 %v932_v6  ;;  %896 = vmatpush3.bf16.msra.mxu1 %v932_v6 }
  0x19   : > { %870 = vmatprep.subr.bf16.mxu0 %v933_v7  ;;  %889 = vmatprep.subr.bf16.mxu1 %v933_v7 }
  0x1c   : > { %871 = vmatpush3.bf16.msra.mxu0 %v933_v7  ;;  %897 = vmatpush3.bf16.msra.mxu1 %v933_v7 }
  0x1d   : > { %872 = vmatprep.subr.bf16.mxu0 %v934_v8  ;;  %890 = vmatprep.subr.bf16.mxu1 %v934_v8 }
  0x20   : > { %873 = vmatpush3.bf16.msra.mxu0 %v934_v8  ;;  %898 = vmatpush3.bf16.msra.mxu1 %v934_v8 }
  0x21   : > { %874 = vmatprep.subr.bf16.mxu0 %v935_v9  ;;  %891 = vmatprep.subr.bf16.mxu1 %v935_v9 }
  0x24   : > { %875 = vmatpush3.bf16.msra.mxu0 %v935_v9  ;;  %899 = vmatpush3.bf16.msra.mxu1 %v935_v9 }
  0x27   : > { %877 = vmatmul.mubr.bf16.vlgmr.msra.gmra.mrb[0].mxu0 %v938_v10  ;;  %881 = vmatmul.mubr.bf16.vlgmr.msra.gmra.mrb[0].mxu1 %v939_v11 }
  0xf8   : > { %411 = sbr.rel (!%p406_p4) target bundleno = 255 (0xff), region = 36 }
  0xfa   : > { %v878_v13 = vpop.f32.mrb[0].mxu0  ;;  %v882_v14 = vpop.f32.mrb[0].mxu1 }
  0xfb   : > { %v1100_v15 = vadd.f32 %v878_v13, %v827_v12  ;;  %v1102_v16 = vadd.f32 %v882_v14, %v827_v12  ;;  %v375_v17 = vpop.f32.mrb[1].mxu0  ;;  %v391_v18 = vpop.f32.mrb[1].mxu1 }
  0xfc   : > { %v1104_v19 = vadd.f32 %v827_v12, %v375_v17  ;;  %v1106_v20 = vadd.f32 %v827_v12, %v391_v18  ;;  %v879_v21 = vpop.f32.mrb[2].mxu0  ;;  %v883_v22 = vpop.f32.mrb[2].mxu1 }
  0xfd   : > { %v1108_v23 = vadd.f32 %v879_v21, %v827_v12  ;;  %v1110_v24 = vadd.f32 %v883_v22, %v827_v12  ;;  %v378_v25 = vpop.f32.mrb[3].mxu0  ;;  %v394_v26 = vpop.f32.mrb[3].mxu1 }
  0xfe   : > { %v1112_v27 = vadd.f32 %v827_v12, %v378_v25  ;;  %v1114_v28 = vadd.f32 %v827_v12, %v394_v26 }
  0xff PF: > { %p841_p5 = scmp.ne.s32.totalorder %s1006_s12, 0 }
 0x100   : > { %440 = vmax.xlane.f32.xlu0 (!%p841_p5), %v1104_v19  ;;  %444 = vmax.xlane.f32.xlu1 (!%p841_p5), %v1100_v15  ;;  %v1018_v31 = vmov (!%p841_p5), 0   ;;  %v1143_v32 = vld [vmem:[#allocation2] sm:$0xff] (!%p841_p5)  ;;  %v1145_v33 = vld [vmem:[#allocation2 + $0x10] sm:$0xff] (!%p841_p5)  ;;  %vm592_vm1 = vcmask (!%p841_p5), 7168   ;;  %v1153_v38 = vld [vmem:[#allocation2 + $0x8] sm:$0xff] (!%p841_p5) }
 0x101   : > { %431 = sbr.rel (%p841_p5) target bundleno = 716 (0x2cc), region = 40  ;;  %940 = vset.pattern.permute.xlu0 (!%p841_p5), %v1018_v31  ;;  %941 = vset.pattern.permute.xlu1 (!%p841_p5), %v1018_v31  ;;  %v1155_v39 = vld [vmem:[#allocation2 + $0x18] sm:$0xff] (!%p841_p5)  ;;  %v1172_v46 = vld [vmem:[#allocation2 + $0x20] sm:$0xff] (!%p841_p5)  ;;  %v1174_v47 = vld [vmem:[#allocation2 + $0x28] sm:$0xff] (!%p841_p5) }
 0x102   : > { %v1191_v54 = vld [vmem:[#allocation2 + $0x30] sm:$0xff] (!%p841_p5)  ;;  %v1193_v55 = vld [vmem:[#allocation2 + $0x38] sm:$0xff] (!%p841_p5) }
 0x104   : > { %442 = vmax.xlane.f32.xlu0 (!%p841_p5), %v1112_v27  ;;  %446 = vmax.xlane.f32.xlu1 (!%p841_p5), %v1108_v23 }
 0x108   : > { %448 = vmax.xlane.f32.xlu0 %v1106_v20  ;;  %450 = vmax.xlane.f32.xlu1 %v1114_v28 }
 0x10c   : > { %452 = vmax.xlane.f32.xlu0 %v1102_v16  ;;  %454 = vmax.xlane.f32.xlu1 %v1110_v24 }
 0x18d   : > { %v441_v34 = vpop.xlane.xlu0 %440  ;;  %v445_v35 = vpop.xlane.xlu1 %444 }
 0x18e   : > { %v1148_v36 = vmax.f32 %v1143_v32, %v441_v34  ;;  %v1151_v37 = vmax.f32 %v1145_v33, %v445_v35 }
 0x190   : > { %v472_v40 = vsub.f32 %v1143_v32, %v1148_v36  ;;  %601 = vst.msk [vmem:[#allocation2] sm:$0xff] %vm592_vm1, %v1148_v36  ;;  %506 = vperm.xlu0 %940, %v1148_v36   ;;  %v474_v41 = vsub.f32 %v1145_v33, %v1151_v37  ;;  %603 = vst.msk [vmem:[#allocation2 + $0x10] sm:$0xff] %vm592_vm1, %v1151_v37 }
 0x191   : > { %v443_v42 = vpop.xlane.xlu0 %442  ;;  %v447_v43 = vpop.xlane.xlu1 %446 }
 0x192   : > { %v1167_v44 = vmax.f32 %v1153_v38, %v443_v42  ;;  %v1170_v45 = vmax.f32 %v1155_v39, %v447_v43 }
 0x194   : > { %v473_v48 = vsub.f32 %v1153_v38, %v1167_v44  ;;  %602 = vst.msk [vmem:[#allocation2 + $0x8] sm:$0xff] %vm592_vm1, %v1167_v44  ;;  %511 = vperm.xlu1 %941, %v1167_v44   ;;  %v475_v49 = vsub.f32 %v1155_v39, %v1170_v45  ;;  %604 = vst.msk [vmem:[#allocation2 + $0x18] sm:$0xff] %vm592_vm1, %v1170_v45  ;;  %v465_v44 = vld [vmem:[#allocation3 + $0x8] sm:$0xff] }
 0x195   : > { %v449_v50 = vpop.xlane.xlu0 %448  ;;  %v451_v51 = vpop.xlane.xlu1 %450 }
 0x196   : > { %v1186_v52 = vmax.f32 %v1172_v46, %v449_v50  ;;  %v1189_v53 = vmax.f32 %v1174_v47, %v451_v51 }
 0x198   : > { %516 = vperm.xlu1 %941, %v1151_v37   ;;  %v476_v56 = vsub.f32 %v1172_v46, %v1186_v52  ;;  %605 = vst.msk [vmem:[#allocation2 + $0x20] sm:$0xff] %vm592_vm1, %v1186_v52  ;;  %v477_v57 = vsub.f32 %v1174_v47, %v1189_v53  ;;  %606 = vst.msk [vmem:[#allocation2 + $0x28] sm:$0xff] %vm592_vm1, %v1189_v53 }
 0x199   : > { %v453_v58 = vpop.xlane.xlu0 %452  ;;  %v455_v59 = vpop.xlane.xlu1 %454 }
 0x19a   : > { %v1205_v60 = vmax.f32 %v1191_v54, %v453_v58  ;;  %v1208_v61 = vmax.f32 %v1193_v55, %v455_v59  ;;  %v488_v32 = vmul.f32 1.442695, %v476_v56  ;;  %v490_v33 = vmul.f32 1.442695, %v477_v57 }
 0x19c   : > { %521 = vperm.xlu1 %941, %v1170_v45   ;;  %v478_v62 = vsub.f32 %v1191_v54, %v1205_v60  ;;  %607 = vst.msk [vmem:[#allocation2 + $0x30] sm:$0xff] %vm592_vm1, %v1205_v60  ;;  %v479_v63 = vsub.f32 %v1193_v55, %v1208_v61  ;;  %608 = vst.msk [vmem:[#allocation2 + $0x38] sm:$0xff] %vm592_vm1, %v1208_v61  ;;  %v466_v45 = vld [vmem:[#allocation3 + $0x10] sm:$0xff] }
 0x19e   : > { %v492_v46 = vmul.f32 1.442695, %v478_v62 }
 0x1a0   : > { %526 = vperm.xlu1 %941, %v1186_v52  }
 0x1a4   : > { %531 = vperm.xlu1 %941, %v1189_v53   ;;  %v494_v53 = vmul.f32 1.442695, %v479_v63  ;;  %v470_v63 = vld [vmem:[#allocation3 + $0x30] sm:$0xff] }
 0x1a8   : > { %536 = vperm.xlu1 %941, %v1205_v60  }
 0x1ac   : > { %541 = vperm.xlu1 %941, %v1208_v61  }
 0x20f   : > { %v507_v0 = vpop.permute.xlu0 %506 }
 0x210   : > { %v544_v1 = vsub.f32 %v1104_v19, %v507_v0  ;;  %v480_v0 = vmul.f32 1.442695, %v472_v40 }
 0x212   : > { %v552_v2 = vmul.f32 1.442695, %v544_v1  ;;  %v482_v1 = vmul.f32 1.442695, %v473_v48 }
 0x213   : > { %v512_v3 = vpop.permute.xlu1 %511 }
 0x214   : > { %942 = vpow2.f32 %v552_v2  ;;  %v545_v4 = vsub.f32 %v1112_v27, %v512_v3  ;;  %v484_v2 = vmul.f32 1.442695, %v474_v41  ;;  %v486_v3 = vmul.f32 1.442695, %v475_v49 }
 0x216   : > { %v554_v5 = vmul.f32 1.442695, %v545_v4 }
 0x217   : > { %v517_v6 = vpop.permute.xlu1 %516 }
 0x218   : > { %944 = vpow2.f32 %v554_v5  ;;  %v546_v7 = vsub.f32 %v1100_v15, %v517_v6  ;;  %v464_v5 = vld [vmem:[#allocation3] sm:$0xff] }
 0x21a   : > { %v556_v8 = vmul.f32 1.442695, %v546_v7  ;;  %v467_v7 = vld [vmem:[#allocation3 + $0x18] sm:$0xff] }
 0x21b   : > { %v522_v9 = vpop.permute.xlu1 %521 }
 0x21c   : > { %946 = vpow2.f32 %v556_v8  ;;  %v547_v10 = vsub.f32 %v1108_v23, %v522_v9 }
 0x21e   : > { %v943_v11 = vpop.eup %942  ;;  %v558_v12 = vmul.f32 1.442695, %v547_v10  ;;  %v468_v10 = vld [vmem:[#allocation3 + $0x20] sm:$0xff] }
 0x21f   : > { %v527_v13 = vpop.permute.xlu1 %526  ;;  %568 = vadd.xlane.f32.xlu1 %v943_v11 }
 0x220   : > { %948 = vpow2.f32 %v558_v12  ;;  %v548_v14 = vsub.f32 %v1106_v20, %v527_v13  ;;  %v469_v12 = vld [vmem:[#allocation3 + $0x28] sm:$0xff] }
 0x222   : > { %v945_v17 = vpop.eup %944  ;;  %v560_v18 = vmul.f32 1.442695, %v548_v14 }
 0x223   : > { %v532_v21 = vpop.permute.xlu1 %531  ;;  %570 = vadd.xlane.f32.xlu0 %v945_v17 }
 0x224   : > { %950 = vpow2.f32 %v560_v18  ;;  %v549_v22 = vsub.f32 %v1114_v28, %v532_v21 }
 0x226   : > { %v947_v25 = vpop.eup %946  ;;  %v562_v26 = vmul.f32 1.442695, %v549_v22 }
 0x227   : > { %v537_v29 = vpop.permute.xlu1 %536  ;;  %572 = vadd.xlane.f32.xlu0 %v947_v25  ;;  %v471_v25 = vld [vmem:[#allocation3 + $0x38] sm:$0xff] }
 0x228   : > { %952 = vpow2.f32 %v562_v26  ;;  %v550_v30 = vsub.f32 %v1102_v16, %v537_v29 }
 0x22a   : > { %v949_v31 = vpop.eup %948  ;;  %v564_v34 = vmul.f32 1.442695, %v550_v30 }
 0x22b   : > { %v542_v35 = vpop.permute.xlu1 %541  ;;  %574 = vadd.xlane.f32.xlu1 %v949_v31 }
 0x22c   : > { %954 = vpow2.f32 %v564_v34  ;;  %v551_v42 = vsub.f32 %v1110_v24, %v542_v35 }
 0x22e   : > { %v951_v43 = vpop.eup %950  ;;  %v566_v50 = vmul.f32 1.442695, %v551_v42 }
 0x22f   : > { %576 = vadd.xlane.f32.xlu0 %v951_v43 }
 0x230   : > { %956 = vpow2.f32 %v566_v50 }
 0x231   : > { %958 = vpow2.f32 %v480_v0 }
 0x232   : > { %v953_v51 = vpop.eup %952  ;;  %960 = vpow2.f32 %v482_v1 }
 0x233   : > { %578 = vadd.xlane.f32.xlu1 %v953_v51  ;;  %962 = vpow2.f32 %v484_v2 }
 0x234   : > { %964 = vpow2.f32 %v486_v3 }
 0x235   : > { %966 = vpow2.f32 %v488_v32 }
 0x236   : > { %v955_v58 = vpop.eup %954  ;;  %968 = vpow2.f32 %v490_v33 }
 0x237   : > { %580 = vadd.xlane.f32.xlu0 %v955_v58  ;;  %970 = vpow2.f32 %v492_v46 }
 0x238   : > { %972 = vpow2.f32 %v494_v53 }
 0x23a   : > { %v957_v59 = vpop.eup %956 }
 0x23b   : > { %582 = vadd.xlane.f32.xlu1 %v957_v59  ;;  %v959_v4 = vpop.eup %958 }
 0x23c   : > { %v496_v36 = vmul.f32 %v959_v4, %v464_v5  ;;  %v961_v38 = vpop.eup %960 }
 0x23d   : > { %v497_v37 = vmul.f32 %v961_v38, %v465_v44  ;;  %v963_v39 = vpop.eup %962 }
 0x23e   : > { %v498_v52 = vmul.f32 %v963_v39, %v466_v45  ;;  %v965_v56 = vpop.eup %964 }
 0x23f   : > { %v499_v57 = vmul.f32 %v965_v56, %v467_v7  ;;  %v967_v8 = vpop.eup %966 }
 0x240   : > { %v500_v60 = vmul.f32 %v967_v8, %v468_v10  ;;  %v969_v62 = vpop.eup %968 }
 0x241   : > { %v501_v14 = vmul.f32 %v969_v62, %v469_v12  ;;  %v971_v55 = vpop.eup %970 }
 0x242   : > { %v502_v18 = vmul.f32 %v971_v55, %v470_v63  ;;  %v973_v21 = vpop.eup %972 }
 0x243   : > { %v503_v29 = vmul.f32 %v973_v21, %v471_v25 }
 0x2ac   : > { %v569_v40 = vpop.xlane.xlu1 %568 }
 0x2ad   : > { %v584_v48 = vadd.f32 %v569_v40, %v496_v36 }
 0x2af   : > { %593 = vst.msk [vmem:[#allocation3] sm:$0xff] %vm592_vm1, %v584_v48 }
 0x2b0   : > { %v571_v41 = vpop.xlane.xlu0 %570 }
 0x2b1   : > { %v585_v49 = vadd.f32 %v571_v41, %v497_v37 }
 0x2b3   : > { %594 = vst.msk [vmem:[#allocation3 + $0x8] sm:$0xff] %vm592_vm1, %v585_v49 }
 0x2b4   : > { %v573_v6 = vpop.xlane.xlu0 %572 }
 0x2b5   : > { %v586_v47 = vadd.f32 %v573_v6, %v498_v52 }
 0x2b7   : > { %595 = vst.msk [vmem:[#allocation3 + $0x10] sm:$0xff] %vm592_vm1, %v586_v47 }
 0x2b8   : > { %v575_v9 = vpop.xlane.xlu1 %574 }
 0x2b9   : > { %v587_v54 = vadd.f32 %v575_v9, %v499_v57 }
 0x2bb   : > { %596 = vst.msk [vmem:[#allocation3 + $0x18] sm:$0xff] %vm592_vm1, %v587_v54 }
 0x2bc   : > { %v577_v11 = vpop.xlane.xlu0 %576 }
 0x2bd   : > { %v588_v13 = vadd.f32 %v577_v11, %v500_v60 }
 0x2bf   : > { %597 = vst.msk [vmem:[#allocation3 + $0x20] sm:$0xff] %vm592_vm1, %v588_v13 }
 0x2c0   : > { %v579_v61 = vpop.xlane.xlu1 %578 }
 0x2c1   : > { %v589_v17 = vadd.f32 %v579_v61, %v501_v14 }
 0x2c3   : > { %598 = vst.msk [vmem:[#allocation3 + $0x28] sm:$0xff] %vm592_vm1, %v589_v17 }
 0x2c4   : > { %v581_v22 = vpop.xlane.xlu0 %580 }
 0x2c5   : > { %v590_v26 = vadd.f32 %v581_v22, %v502_v18 }
 0x2c7   : > { %599 = vst.msk [vmem:[#allocation3 + $0x30] sm:$0xff] %vm592_vm1, %v590_v26 }
 0x2c8   : > { %v583_v30 = vpop.xlane.xlu1 %582 }
 0x2c9   : > { %v591_v31 = vadd.f32 %v583_v30, %v503_v29 }
 0x2cb   : > { %600 = vst.msk [vmem:[#allocation3 + $0x38] sm:$0xff] %vm592_vm1, %v591_v31 }
 0x2cc PF: > { %p842_p6 = scmp.ne.s32.totalorder %s1006_s12, 1 }
 0x2cd   : > { %v623_v34 = vld [vmem:[#allocation3 + $0x10] sm:$0xff] (!%p842_p6)  ;;  %v1019_v35 = vmov (!%p842_p6), 0   ;;  %v621_v42 = vld [vmem:[#allocation3] sm:$0xff] (!%p842_p6)  ;;  %v624_v43 = vld [vmem:[#allocation3 + $0x18] sm:$0xff] (!%p842_p6) }
 0x2ce   : > { %612 = sbr.rel (%p842_p6) target bundleno = 877 (0x36d), region = 44  ;;  %975 = vset.pattern.permute.xlu1 (!%p842_p6), %v1019_v35  ;;  %974 = vset.pattern.permute.xlu0 (!%p842_p6), %v1019_v35  ;;  %976 = vlog2.f32 (!%p842_p6), %v623_v34  ;;  %v622_v50 = vld [vmem:[#allocation3 + $0x8] sm:$0xff] (!%p842_p6)  ;;  %v625_v58 = vld [vmem:[#allocation3 + $0x20] sm:$0xff] (!%p842_p6)  ;;  %v627_v0 = vld [vmem:[#allocation3 + $0x30] sm:$0xff] (!%p842_p6) }
 0x2cf   : > { %978 = vlog2.f32 (!%p842_p6), %v621_v42  ;;  %v626_v51 = vld [vmem:[#allocation3 + $0x28] sm:$0xff] (!%p842_p6)  ;;  %v615_v2 = vld [vmem:[#allocation2 + $0x10] sm:$0xff] (!%p842_p6)  ;;  %v613_v5 = vld [vmem:[#allocation2] sm:$0xff] (!%p842_p6) }
 0x2d0   : > { %980 = vlog2.f32 (!%p842_p6), %v624_v43  ;;  %v616_v38 = vld [vmem:[#allocation2 + $0x18] sm:$0xff] (!%p842_p6)  ;;  %v614_v33 = vld [vmem:[#allocation2 + $0x8] sm:$0xff] (!%p842_p6)  ;;  %v617_v53 = vld [vmem:[#allocation2 + $0x20] sm:$0xff] (!%p842_p6) }
 0x2d1   : > { %982 = vlog2.f32 (!%p842_p6), %v622_v50  ;;  %v618_v6 = vld [vmem:[#allocation2 + $0x28] sm:$0xff] (!%p842_p6)  ;;  %v620_v10 = vld [vmem:[#allocation2 + $0x38] sm:$0xff] (!%p842_p6)  ;;  %v619_v60 = vld [vmem:[#allocation2 + $0x30] sm:$0xff] (!%p842_p6) }
 0x2d2   : > { %v628_v59 = vld [vmem:[#allocation3 + $0x38] sm:$0xff] (!%p842_p6)  ;;  %984 = vlog2.f32 (!%p842_p6), %v626_v51 }
 0x2d3   : > { %986 = vlog2.f32 (!%p842_p6), %v625_v58 }
 0x2d4   : > { %988 = vlog2.f32 (!%p842_p6), %v628_v59 }
 0x2d5   : > { %990 = vlog2.f32 %v627_v0 }
 0x2d8   : > { %v977_v1 = vpop.eup %976 }
 0x2d9   : > { %v979_v3 = vpop.eup %978  ;;  %v634_v4 = vmul.f32 0.6931472, %v977_v1 }
 0x2da   : > { %v981_v32 = vpop.eup %980  ;;  %v630_v36 = vmul.f32 0.6931472, %v979_v3 }
 0x2db   : > { %v983_v40 = vpop.eup %982  ;;  %v647_v44 = vadd.f32 %v634_v4, %v615_v2  ;;  %v636_v48 = vmul.f32 0.6931472, %v981_v32 }
 0x2dc   : > { %v985_v37 = vpop.eup %984  ;;  %v645_v39 = vadd.f32 %v630_v36, %v613_v5  ;;  %v632_v41 = vmul.f32 0.6931472, %v983_v40 }
 0x2dd   : > { %v987_v45 = vpop.eup %986  ;;  %665 = vperm.xlu1 %975, %v647_v44   ;;  %v648_v49 = vadd.f32 %v636_v48, %v616_v38  ;;  %v640_v46 = vmul.f32 0.6931472, %v985_v37 }
 0x2de   : > { %v989_v52 = vpop.eup %988  ;;  %655 = vperm.xlu0 %974, %v645_v39   ;;  %v646_v56 = vadd.f32 %v632_v41, %v614_v33  ;;  %v638_v7 = vmul.f32 0.6931472, %v987_v45 }
 0x2df   : > { %v991_v47 = vpop.eup %990  ;;  %v650_v57 = vadd.f32 %v640_v46, %v618_v6  ;;  %v644_v8 = vmul.f32 0.6931472, %v989_v52 }
 0x2e0   : > { %v649_v9 = vadd.f32 %v638_v7, %v617_v53  ;;  %v642_v54 = vmul.f32 0.6931472, %v991_v47 }
 0x2e1   : > { %670 = vperm.xlu1 %975, %v648_v49   ;;  %v652_v62 = vadd.f32 %v644_v8, %v620_v10 }
 0x2e2   : > { %660 = vperm.xlu0 %974, %v646_v56   ;;  %v651_v11 = vadd.f32 %v642_v54, %v619_v60 }
 0x2e5   : > { %680 = vperm.xlu1 %975, %v650_v57  }
 0x2e6   : > { %675 = vperm.xlu0 %974, %v649_v9  }
 0x2e9   : > { %690 = vperm.xlu1 %975, %v652_v62  }
 0x2ea   : > { %685 = vperm.xlu0 %974, %v651_v11  }
 0x35c   : > { %v666_v12 = vpop.permute.xlu1 %665 }
 0x35d   : > { %v695_v13 = vsub.f32 %v1100_v15, %v666_v12  ;;  %v656_v14 = vpop.permute.xlu0 %655 }
 0x35e   : > { %v693_v55 = vsub.f32 %v1104_v19, %v656_v14 }
 0x35f   : > { %703 = vst [vmem:[%s1308_s3 + $0x10] sm:$0xff] %v695_v13 }
 0x360   : > { %701 = vst [vmem:[%s1308_s3] sm:$0xff] %v693_v55  ;;  %v671_v61 = vpop.permute.xlu1 %670 }
 0x361   : > { %v696_v63 = vsub.f32 %v1108_v23, %v671_v61  ;;  %v661_v17 = vpop.permute.xlu0 %660 }
 0x362   : > { %v694_v18 = vsub.f32 %v1112_v27, %v661_v17 }
 0x363   : > { %704 = vst [vmem:[%s1308_s3 + $0x18] sm:$0xff] %v696_v63 }
 0x364   : > { %702 = vst [vmem:[%s1308_s3 + $0x8] sm:$0xff] %v694_v18  ;;  %v681_v15 = vpop.permute.xlu1 %680 }
 0x365   : > { %v698_v19 = vsub.f32 %v1114_v28, %v681_v15  ;;  %v676_v21 = vpop.permute.xlu0 %675 }
 0x366   : > { %v697_v22 = vsub.f32 %v1106_v20, %v676_v21 }
 0x367   : > { %706 = vst [vmem:[%s1308_s3 + $0x28] sm:$0xff] %v698_v19 }
 0x368   : > { %705 = vst [vmem:[%s1308_s3 + $0x20] sm:$0xff] %v697_v22  ;;  %v691_v23 = vpop.permute.xlu1 %690 }
 0x369   : > { %v700_v27 = vsub.f32 %v1110_v24, %v691_v23  ;;  %v686_v25 = vpop.permute.xlu0 %685 }
 0x36a   : > { %v699_v26 = vsub.f32 %v1102_v16, %v686_v25 }
 0x36b   : > { %708 = vst [vmem:[%s1308_s3 + $0x38] sm:$0xff] %v700_v27 }
 0x36c   : > { %707 = vst [vmem:[%s1308_s3 + $0x30] sm:$0xff] %v699_v26 }
 0x36d PF: > { %s13_s14 = sadd.s32 1, %s1014_s14   ;;  %s1309_s12 = smov %s1010_s13 }
 0x36e   : > { %p10_p7 = scmp.ge.s32.totalorder %s13_s14, 4   ;;  %s1310_s13 = smov %s1312_s15 }
 0x370   :  { %12 = sbr.rel (!%p10_p7) target bundleno = 2 (0x2), region = 80 }

// kernel: decoder_forward.2
= control target key start
LH: loop header
LB: loop body
LE: loop exit
PB: predicated region body
PF: predicated region fallthrough
CT: control target
= control target key end

     0   :  { %v12353_v1 = vmov 0   ;;  %vm125_vm0 = vcmask 261120   ;;  %s12345_s1 = inlined_call_operand.vmem [shape: bf16[32,512], index: 1, kind: input, shape index: {}]   ;;  %s12346_s0 = inlined_call_operand.vmem [shape: bf16[64,32], index: 0, kind: input, shape index: {}]   ;;  %s12347_s3 = inlined_call_operand.vmem [shape: bf16[128,512], index: 3, kind: input, shape index: {}]   ;;  %s12348_s5 = inlined_call_operand.vmem [shape: bf16[128,512], index: 5, kind: input, shape index: {}]   ;;  %s12349_s4 = inlined_call_operand.vmem [shape: bf16[128,512], index: 4, kind: input, shape index: {}]   ;;  %s12350_s2 = inlined_call_operand.vmem [shape: f32[1,512], index: 2, kind: input, shape index: {}]   ;;  %s12351_s6 = inlined_call_operand.vmem [shape: f32[1,512], index: 6, kind: input, shape index: {}]   ;;  %s12352_s7 = inlined_call_operand.vmem [shape: bf16[64,128], index: 7, kind: output, shape index: {}]  }
   0x1   :  { %v8384_v0 = vld [vmem:[%s12345_s1 + $0x4] ss:$16 sps:$4 sm:$0xff]   ;;  %170 = vmatprep.mubr.bf16.mxu0 %v12353_v1  ;;  %320 = vst [vmem:[#allocation3] sm:$0xf] %v12353_v1  ;;  %322 = vst [vmem:[#allocation5] sm:$0xf] %v12353_v1  ;;  %243 = vmatprep.mubr.bf16.mxu1 %v12353_v1 }
   0x2   :  { %v8386_v2 = vld [vmem:[%s12345_s1 + $0xc] ss:$16 sps:$4 sm:$0xff]   ;;  %138 = vmatprep.subr.bf16.mxu0 %v8384_v0  ;;  %v8388_v3 = vld [vmem:[%s12345_s1] ss:$16 sps:$4 sm:$0xff]   ;;  %v8389_v4 = vld [vmem:[%s12345_s1 + $0x8] ss:$16 sps:$4 sm:$0xff]  }
   0x3   :  { %211 = vmatprep.subr.bf16.mxu1 %v8386_v2  ;;  %v8390_v5 = vld [vmem:[%s12345_s1 + $0x24] ss:$16 sps:$4 sm:$0xff]   ;;  %139 = vmatpush1.bf16.msra.mxu0 %v8388_v3  ;;  %v8392_v6 = vld [vmem:[%s12345_s1 + $0x2c] ss:$16 sps:$4 sm:$0xff]   ;;  %v8394_v7 = vld [vmem:[%s12345_s1 + $0x20] ss:$16 sps:$4 sm:$0xff]  }
   0x4   :  { %212 = vmatpush1.bf16.msra.mxu1 %v8389_v4  ;;  %140 = vmatprep.subr.bf16.mxu0 %v8390_v5  ;;  %v8395_v8 = vld [vmem:[%s12345_s1 + $0x28] ss:$16 sps:$4 sm:$0xff]   ;;  %v8396_v9 = vld [vmem:[%s12346_s0] sm:$0xff]   ;;  %v9362_v13 = vld [vmem:[%s12347_s3 + $0xc] ss:$16 sps:$4 sm:$0xff]  }
   0x5   :  { %213 = vmatprep.subr.bf16.mxu1 %v8392_v6  ;;  %v8397_v10 = vld [vmem:[%s12347_s3] ss:$16 sps:$4 sm:$0xff]   ;;  %v9354_v11 = vld [vmem:[%s12347_s3 + $0x4] ss:$16 sps:$4 sm:$0xff]   ;;  %v8400_v12 = vld [vmem:[%s12347_s3 + $0x8] ss:$16 sps:$4 sm:$0xff]  }
   0x6   :  { %v8405_v14 = vld [vmem:[%s12347_s3 + $0x24] ss:$16 sps:$4 sm:$0xff]   ;;  %v8403_v15 = vld [vmem:[%s12347_s3 + $0x20] ss:$16 sps:$4 sm:$0xff]   ;;  %v8408_v16 = vld [vmem:[%s12347_s3 + $0x2c] ss:$16 sps:$4 sm:$0xff]  }
   0x7   :  { %141 = vmatpush1.bf16.msra.mxu0 %v8394_v7  ;;  %v8406_v17 = vld [vmem:[%s12347_s3 + $0x28] ss:$16 sps:$4 sm:$0xff]   ;;  %v8412_v18 = vld [vmem:[%s12347_s3 + $0x44] ss:$16 sps:$4 sm:$0xff]   ;;  %v8415_v20 = vld [vmem:[%s12347_s3 + $0x4c] ss:$16 sps:$4 sm:$0xff]  }
   0x8   :  { %214 = vmatpush1.bf16.msra.mxu1 %v8395_v8  ;;  %521 = vmatprep.subr.bf16.mxu0 %v9354_v11  ;;  %v8409_v19 = vld [vmem:[%s12346_s0 + $0x8] sm:$0xff]   ;;  %v8410_v21 = vld [vmem:[%s12347_s3 + $0x40] ss:$16 sps:$4 sm:$0xff]   ;;  %v8418_v23 = vld [vmem:[%s12347_s3 + $0x64] ss:$16 sps:$4 sm:$0xff]  }
   0x9   :  { %562 = vmatprep.subr.bf16.mxu1 %v9362_v13  ;;  %v8413_v22 = vld [vmem:[%s12347_s3 + $0x48] ss:$16 sps:$4 sm:$0xff]   ;;  %v8421_v24 = vld [vmem:[%s12347_s3 + $0x6c] ss:$16 sps:$4 sm:$0xff]   ;;  %v8416_v25 = vld [vmem:[%s12347_s3 + $0x60] ss:$16 sps:$4 sm:$0xff]  }
   0xa   :  { %7456 = vmatmul.mubr.msk.bf16.vlgmr.msra.gmra.mrb[0].mxu0 %vm125_vm0, %v8396_v9  ;;  %v8419_v26 = vld [vmem:[%s12347_s3 + $0x68] ss:$16 sps:$4 sm:$0xff]   ;;  %v8425_v27 = vld [vmem:[%s12347_s3 + $0x84] ss:$16 sps:$4 sm:$0xff]   ;;  %v8428_v28 = vld [vmem:[%s12347_s3 + $0x8c] ss:$16 sps:$4 sm:$0xff]  }
   0xb   :  { %7460 = vmatmul.mubr.msk.bf16.vlgmr.msra.gmra.mrb[0].mxu1 %vm125_vm0, %v8396_v9  ;;  %522 = vmatpush1.bf16.msra.mxu0 %v8397_v10  ;;  %v8422_v29 = vld [vmem:[%s12346_s0 + $0x10] sm:$0xff]   ;;  %v8426_v31 = vld [vmem:[%s12347_s3 + $0x88] ss:$16 sps:$4 sm:$0xff]   ;;  %v8434_v33 = vld [vmem:[%s12347_s3 + $0xac] ss:$16 sps:$4 sm:$0xff]  }
   0xc   :  { %563 = vmatpush1.bf16.msra.mxu1 %v8400_v12  ;;  %523 = vmatprep.subr.bf16.mxu0 %v8405_v14  ;;  %v8423_v30 = vld [vmem:[%s12347_s3 + $0x80] ss:$16 sps:$4 sm:$0xff]   ;;  %v8431_v32 = vld [vmem:[%s12347_s3 + $0xa4] ss:$16 sps:$4 sm:$0xff]   ;;  %v8432_v35 = vld [vmem:[%s12347_s3 + $0xa8] ss:$16 sps:$4 sm:$0xff]  }
   0xd   :  { %564 = vmatprep.subr.bf16.mxu1 %v8408_v16  ;;  %180 = vmatprep.mubr.bf16.mxu0 %v12353_v1  ;;  %v8429_v34 = vld [vmem:[%s12347_s3 + $0xa0] ss:$16 sps:$4 sm:$0xff]   ;;  %v8438_v36 = vld [vmem:[%s12347_s3 + $0xc4] ss:$16 sps:$4 sm:$0xff]   ;;  %v8441_v37 = vld [vmem:[%s12347_s3 + $0xcc] ss:$16 sps:$4 sm:$0xff]  }
   0xe   :  { %253 = vmatprep.mubr.bf16.mxu1 %v12353_v1  ;;  %v8435_v38 = vld [vmem:[%s12346_s0 + $0x18] sm:$0xff]   ;;  %v8436_v39 = vld [vmem:[%s12347_s3 + $0xc0] ss:$16 sps:$4 sm:$0xff]   ;;  %v8444_v41 = vld [vmem:[%s12347_s3 + $0xe4] ss:$16 sps:$4 sm:$0xff]  }
   0xf   :  { %524 = vmatpush1.bf16.msra.mxu0 %v8403_v15  ;;  %v8439_v40 = vld [vmem:[%s12347_s3 + $0xc8] ss:$16 sps:$4 sm:$0xff]   ;;  %v8447_v42 = vld [vmem:[%s12347_s3 + $0xec] ss:$16 sps:$4 sm:$0xff]   ;;  %v8442_v43 = vld [vmem:[%s12347_s3 + $0xe0] ss:$16 sps:$4 sm:$0xff]  }
  0x10   :  { %565 = vmatpush1.bf16.msra.mxu1 %v8406_v17  ;;  %525 = vmatprep.subr.bf16.mxu0 %v8412_v18  ;;  %v8445_v44 = vld [vmem:[%s12347_s3 + $0xe8] ss:$16 sps:$4 sm:$0xff]   ;;  %v325_v45 = vld [vmem:[#allocation3] sm:$0xf]  ;;  %v8450_v46 = vld [vmem:[%s12348_s5 + $0x4] ss:$16 sps:$4 sm:$0xff]  }
  0x11   :  { %566 = vmatprep.subr.bf16.mxu1 %v8415_v20  ;;  %v8448_v47 = vld [vmem:[%s12348_s5] ss:$16 sps:$4 sm:$0xff]   ;;  %v8451_v48 = vld [vmem:[%s12348_s5 + $0x8] ss:$16 sps:$4 sm:$0xff]   ;;  %v8453_v49 = vld [vmem:[%s12348_s5 + $0xc] ss:$16 sps:$4 sm:$0xff]  }
  0x12   :  { %7457 = vmatmul.mubr.msk.bf16.gmra.mrb[4].mxu0 %vm125_vm0, %v8409_v19  ;;  %v8456_v50 = vld [vmem:[%s12348_s5 + $0x24] ss:$16 sps:$4 sm:$0xff]   ;;  %v8459_v51 = vld [vmem:[%s12348_s5 + $0x2c] ss:$16 sps:$4 sm:$0xff]   ;;  %v8454_v52 = vld [vmem:[%s12348_s5 + $0x20] ss:$16 sps:$4 sm:$0xff]  }
  0x13   :  { %7461 = vmatmul.mubr.msk.bf16.gmra.mrb[4].mxu1 %vm125_vm0, %v8409_v19  ;;  %526 = vmatpush1.bf16.msra.mxu0 %v8410_v21  ;;  %v8457_v53 = vld [vmem:[%s12348_s5 + $0x28] ss:$16 sps:$4 sm:$0xff]   ;;  %v8462_v54 = vld [vmem:[%s12348_s5 + $0x44] ss:$16 sps:$4 sm:$0xff]   ;;  %v8465_v55 = vld [vmem:[%s12348_s5 + $0x4c] ss:$16 sps:$4 sm:$0xff]  }
  0x14   :  { %567 = vmatpush1.bf16.msra.mxu1 %v8413_v22  ;;  %527 = vmatprep.subr.bf16.mxu0 %v8418_v23  ;;  %v8460_v56 = vld [vmem:[%s12348_s5 + $0x40] ss:$16 sps:$4 sm:$0xff]   ;;  %v8463_v57 = vld [vmem:[%s12348_s5 + $0x48] ss:$16 sps:$4 sm:$0xff]   ;;  %v9516_v58 = vld [vmem:[%s12348_s5 + $0x64] ss:$16 sps:$4 sm:$0xff]  }
  0x15   :  { %568 = vmatprep.subr.bf16.mxu1 %v8421_v24  ;;  %190 = vmatprep.mubr.bf16.mxu0 %v12353_v1  ;;  %v9521_v59 = vld [vmem:[%s12348_s5 + $0x6c] ss:$16 sps:$4 sm:$0xff]   ;;  %v9526_v60 = vld [vmem:[%s12348_s5 + $0x60] ss:$16 sps:$4 sm:$0xff]   ;;  %v9531_v61 = vld [vmem:[%s12348_s5 + $0x68] ss:$16 sps:$4 sm:$0xff]  }
  0x16   :  { %263 = vmatprep.mubr.bf16.mxu1 %v12353_v1  ;;  %v9539_v62 = vld [vmem:[%s12348_s5 + $0x84] ss:$16 sps:$4 sm:$0xff]   ;;  %v9544_v63 = vld [vmem:[%s12348_s5 + $0x8c] ss:$16 sps:$4 sm:$0xff]   ;;  %v9550_v0 = vld [vmem:[%s12348_s5 + $0x80] ss:$16 sps:$4 sm:$0xff]  }
  0x17   :  { %528 = vmatpush1.bf16.msra.mxu0 %v8416_v25  ;;  %v9555_v2 = vld [vmem:[%s12348_s5 + $0x88] ss:$16 sps:$4 sm:$0xff]   ;;  %v9564_v3 = vld [vmem:[%s12348_s5 + $0xa4] ss:$16 sps:$4 sm:$0xff]   ;;  %v9569_v4 = vld [vmem:[%s12348_s5 + $0xac] ss:$16 sps:$4 sm:$0xff]  }
  0x18   :  { %569 = vmatpush1.bf16.msra.mxu1 %v8419_v26  ;;  %529 = vmatprep.subr.bf16.mxu0 %v8425_v27  ;;  %v9574_v5 = vld [vmem:[%s12348_s5 + $0xa0] ss:$16 sps:$4 sm:$0xff]   ;;  %v9579_v6 = vld [vmem:[%s12348_s5 + $0xa8] ss:$16 sps:$4 sm:$0xff]   ;;  %v9588_v7 = vld [vmem:[%s12348_s5 + $0xc4] ss:$16 sps:$4 sm:$0xff]  }
  0x19   :  { %570 = vmatprep.subr.bf16.mxu1 %v8428_v28  ;;  %v9593_v8 = vld [vmem:[%s12348_s5 + $0xcc] ss:$16 sps:$4 sm:$0xff]   ;;  %v9598_v9 = vld [vmem:[%s12348_s5 + $0xc0] ss:$16 sps:$4 sm:$0xff]   ;;  %v9603_v10 = vld [vmem:[%s12348_s5 + $0xc8] ss:$16 sps:$4 sm:$0xff]  }
  0x1a   :  { %7458 = vmatmul.mubr.msk.bf16.gmra.mrb[8].mxu0 %vm125_vm0, %v8422_v29  ;;  %v9612_v12 = vld [vmem:[%s12348_s5 + $0xe4] ss:$16 sps:$4 sm:$0xff]   ;;  %v9617_v14 = vld [vmem:[%s12348_s5 + $0xec] ss:$16 sps:$4 sm:$0xff]   ;;  %v9622_v15 = vld [vmem:[%s12348_s5 + $0xe0] ss:$16 sps:$4 sm:$0xff]  }
  0x1b   :  { %7462 = vmatmul.mubr.msk.bf16.gmra.mrb[8].mxu1 %vm125_vm0, %v8422_v29  ;;  %530 = vmatpush1.bf16.msra.mxu0 %v8423_v30  ;;  %v9627_v16 = vld [vmem:[%s12348_s5 + $0xe8] ss:$16 sps:$4 sm:$0xff]   ;;  %v9636_v17 = vld [vmem:[%s12349_s4 + $0x4] ss:$16 sps:$4 sm:$0xff]   ;;  %v8496_v18 = vld [vmem:[%s12349_s4] ss:$16 sps:$4 sm:$0xff]  }
  0x1c   :  { %571 = vmatpush1.bf16.msra.mxu1 %v8426_v31  ;;  %531 = vmatprep.subr.bf16.mxu0 %v8431_v32  ;;  %v8499_v19 = vld [vmem:[%s12349_s4 + $0x8] ss:$16 sps:$4 sm:$0xff]   ;;  %v9648_v20 = vld [vmem:[%s12349_s4 + $0xc] ss:$16 sps:$4 sm:$0xff]   ;;  %v327_v21 = vld [vmem:[#allocation5] sm:$0xf] }
  0x1d   :  { %572 = vmatprep.subr.bf16.mxu1 %v8434_v33  ;;  %200 = vmatprep.mubr.bf16.mxu0 %v12353_v1  ;;  %v9654_v22 = vld [vmem:[%s12349_s4 + $0x24] ss:$16 sps:$4 sm:$0xff]   ;;  %v9659_v23 = vld [vmem:[%s12349_s4 + $0x2c] ss:$16 sps:$4 sm:$0xff]   ;;  %v9664_v24 = vld [vmem:[%s12349_s4 + $0x20] ss:$16 sps:$4 sm:$0xff]  }
  0x1e   :  { %273 = vmatprep.mubr.bf16.mxu1 %v12353_v1  ;;  %v9669_v25 = vld [vmem:[%s12349_s4 + $0x28] ss:$16 sps:$4 sm:$0xff]   ;;  %v9679_v26 = vld [vmem:[%s12349_s4 + $0x44] ss:$16 sps:$4 sm:$0xff]   ;;  %v9684_v27 = vld [vmem:[%s12349_s4 + $0x4c] ss:$16 sps:$4 sm:$0xff]  }
  0x1f   :  { %532 = vmatpush1.bf16.msra.mxu0 %v8429_v34  ;;  %v9690_v28 = vld [vmem:[%s12349_s4 + $0x40] ss:$16 sps:$4 sm:$0xff]   ;;  %v9695_v29 = vld [vmem:[%s12349_s4 + $0x48] ss:$16 sps:$4 sm:$0xff]   ;;  %v9703_v30 = vld [vmem:[%s12349_s4 + $0x64] ss:$16 sps:$4 sm:$0xff]  }
  0x20   :  { %573 = vmatpush1.bf16.msra.mxu1 %v8432_v35  ;;  %533 = vmatprep.subr.bf16.mxu0 %v8438_v36  ;;  %v9708_v31 = vld [vmem:[%s12349_s4 + $0x6c] ss:$16 sps:$4 sm:$0xff]   ;;  %v9714_v32 = vld [vmem:[%s12349_s4 + $0x60] ss:$16 sps:$4 sm:$0xff]   ;;  %v9719_v33 = vld [vmem:[%s12349_s4 + $0x68] ss:$16 sps:$4 sm:$0xff]  }
  0x21   :  { %574 = vmatprep.subr.bf16.mxu1 %v8441_v37  ;;  %v9727_v34 = vld [vmem:[%s12349_s4 + $0x84] ss:$16 sps:$4 sm:$0xff]   ;;  %v9732_v35 = vld [vmem:[%s12349_s4 + $0x8c] ss:$16 sps:$4 sm:$0xff]   ;;  %v9738_v36 = vld [vmem:[%s12349_s4 + $0x80] ss:$16 sps:$4 sm:$0xff]  }
  0x22   :  { %7459 = vmatmul.mubr.msk.bf16.gmra.mrb[12].mxu0 %vm125_vm0, %v8435_v38  ;;  %12508 = vst [vmem:[#allocation7_spill] sm:$0xff] %v9727_v34  ;;  %12509 = vst [vmem:[#allocation8_spill] sm:$0xff] %v9732_v35  ;;  %v9743_v37 = vld [vmem:[%s12349_s4 + $0x88] ss:$16 sps:$4 sm:$0xff]  }
  0x23   :  { %7463 = vmatmul.mubr.msk.bf16.gmra.mrb[12].mxu1 %vm125_vm0, %v8435_v38  ;;  %534 = vmatpush1.bf16.msra.mxu0 %v8436_v39  ;;  %12510 = vst [vmem:[#allocation9_spill] sm:$0xff] %v9738_v36  ;;  %12511 = vst [vmem:[#allocation10_spill] sm:$0xff] %v9743_v37  ;;  %v9750_v38 = vld [vmem:[%s12349_s4 + $0xa4] ss:$16 sps:$4 sm:$0xff]   ;;  %v9756_v39 = vld [vmem:[%s12349_s4 + $0xa0] ss:$16 sps:$4 sm:$0xff]  }
  0x24   :  { %575 = vmatpush1.bf16.msra.mxu1 %v8439_v40  ;;  %535 = vmatprep.subr.bf16.mxu0 %v8444_v41  ;;  %12512 = vst [vmem:[#allocation11_spill] sm:$0xff] %v9750_v38  ;;  %12513 = vst [vmem:[#allocation12_spill] sm:$0xff] %v9756_v39  ;;  %v9761_v40 = vld [vmem:[%s12349_s4 + $0xac] ss:$16 sps:$4 sm:$0xff]   ;;  %v9768_v41 = vld [vmem:[%s12349_s4 + $0xa8] ss:$16 sps:$4 sm:$0xff]  }
  0x25   :  { %576 = vmatprep.subr.bf16.mxu1 %v8447_v42  ;;  %553 = vmatprep.mubr.bf16.mxu0 %v12353_v1  ;;  %12514 = vst [vmem:[#allocation13_spill] sm:$0xff] %v9761_v40  ;;  %12515 = vst [vmem:[#allocation14_spill] sm:$0xff] %v9768_v41  ;;  %v9773_v42 = vld [vmem:[%s12349_s4 + $0xc4] ss:$16 sps:$4 sm:$0xff]  }
  0x26   :  { %594 = vmatprep.mubr.bf16.mxu1 %v12353_v1  ;;  %12516 = vst [vmem:[#allocation15_spill] sm:$0xff] %v9773_v42 }
  0x27   :  { %536 = vmatpush1.bf16.msra.mxu0 %v8442_v43  ;;  %v9779_v43 = vld [vmem:[%s12349_s4 + $0xc0] ss:$16 sps:$4 sm:$0xff]  }
  0x28   :  { %577 = vmatpush1.bf16.msra.mxu1 %v8445_v44  ;;  %884 = vmatprep.subr.bf16.mxu0 %v8450_v46  ;;  %12517 = vst [vmem:[#allocation16_spill] sm:$0xff] %v9779_v43  ;;  %v9784_v44 = vld [vmem:[%s12349_s4 + $0xcc] ss:$16 sps:$4 sm:$0xff]   ;;  %v9794_v46 = vld [vmem:[%s12349_s4 + $0xe4] ss:$16 sps:$4 sm:$0xff]  }
  0x29   :  { %925 = vmatprep.subr.bf16.mxu1 %v8453_v49  ;;  %12518 = vst [vmem:[#allocation17_spill] sm:$0xff] %v9784_v44  ;;  %12520 = vst [vmem:[#allocation19_spill] sm:$0xff] %v9794_v46  ;;  %v9813_v49 = vld [vmem:[%s12349_s4 + $0xe8] ss:$16 sps:$4 sm:$0xff]  }
  0x2a   :  { %554 = vmatmul.mubr.bf16.vlgmr.msra.gmra.mrb[16].mxu0 %v325_v45  ;;  %12523 = vst [vmem:[#allocation22_spill] sm:$0xff] %v9813_v49 }
  0x2b   :  { %595 = vmatmul.mubr.bf16.vlgmr.msra.gmra.mrb[16].mxu1 %v325_v45  ;;  %916 = vmatprep.mubr.bf16.mxu0 %v12353_v1  ;;  %v9789_v45 = vld [vmem:[%s12349_s4 + $0xc8] ss:$16 sps:$4 sm:$0xff]  }
  0x2c   :  { %957 = vmatprep.mubr.bf16.mxu1 %v12353_v1  ;;  %885 = vmatpush1.bf16.msra.mxu0 %v8448_v47  ;;  %12519 = vst [vmem:[#allocation18_spill] sm:$0xff] %v9789_v45  ;;  %v9800_v47 = vld [vmem:[%s12349_s4 + $0xec] ss:$16 sps:$4 sm:$0xff]  }
  0x2d   :  { %926 = vmatpush1.bf16.msra.mxu1 %v8451_v48  ;;  %886 = vmatprep.subr.bf16.mxu0 %v8456_v50  ;;  %12521 = vst [vmem:[#allocation20_spill] sm:$0xff] %v9800_v47  ;;  %v9808_v48 = vld [vmem:[%s12349_s4 + $0xe0] ss:$16 sps:$4 sm:$0xff]   ;;  %v45_v50 = vlaneseq }
  0x2e   :  { %927 = vmatprep.subr.bf16.mxu1 %v8459_v51  ;;  %12522 = vst [vmem:[#allocation21_spill] sm:$0xff] %v9808_v48 }
  0x2f   :  { %v9823_v51 = vshrl.u32 %v45_v50, 7 }
  0x30   :  { %887 = vmatpush1.bf16.msra.mxu0 %v8454_v52 }
  0x31   :  { %928 = vmatpush1.bf16.msra.mxu1 %v8457_v53  ;;  %888 = vmatprep.subr.bf16.mxu0 %v8462_v54  ;;  %v12357_v52 = vsub.s32 2, %v9823_v51  ;;  %v12362_v53 = vsub.s32 3, %v9823_v51  ;;  %v12363_v54 = vsub.s32 0, %v9823_v51 }
  0x32   :  { %929 = vmatprep.subr.bf16.mxu1 %v8465_v55  ;;  %v43_v55 = vld [vmem:[%s12350_s2] sm:$0xf] }
  0x34   :  { %889 = vmatpush1.bf16.msra.mxu0 %v8460_v56  ;;  %v12367_v56 = vsub.s32 1, %v9823_v51 }
  0x35   :  { %930 = vmatpush1.bf16.msra.mxu1 %v8463_v57  ;;  %890 = vmatprep.subr.bf16.mxu0 %v9516_v58 }
  0x36   :  { %931 = vmatprep.subr.bf16.mxu1 %v9521_v59 }
  0x38   :  { %891 = vmatpush1.bf16.msra.mxu0 %v9526_v60 }
  0x39   :  { %932 = vmatpush1.bf16.msra.mxu1 %v9531_v61  ;;  %892 = vmatprep.subr.bf16.mxu0 %v9539_v62 }
  0x3a   :  { %933 = vmatprep.subr.bf16.mxu1 %v9544_v63 }
  0x3c   :  { %893 = vmatpush1.bf16.msra.mxu0 %v9550_v0 }
  0x3d   :  { %934 = vmatpush1.bf16.msra.mxu1 %v9555_v2  ;;  %894 = vmatprep.subr.bf16.mxu0 %v9564_v3 }
  0x3e   :  { %935 = vmatprep.subr.bf16.mxu1 %v9569_v4 }
  0x40   :  { %895 = vmatpush1.bf16.msra.mxu0 %v9574_v5 }
  0x41   :  { %936 = vmatpush1.bf16.msra.mxu1 %v9579_v6  ;;  %896 = vmatprep.subr.bf16.mxu0 %v9588_v7 }
  0x42   :  { %937 = vmatprep.subr.bf16.mxu1 %v9593_v8 }
  0x44   :  { %897 = vmatpush1.bf16.msra.mxu0 %v9598_v9 }
  0x45   :  { %938 = vmatpush1.bf16.msra.mxu1 %v9603_v10  ;;  %898 = vmatprep.subr.bf16.mxu0 %v9612_v12 }
  0x46   :  { %939 = vmatprep.subr.bf16.mxu1 %v9617_v14 }
  0x48   :  { %899 = vmatpush1.bf16.msra.mxu0 %v9622_v15 }
  0x49   :  { %940 = vmatpush1.bf16.msra.mxu1 %v9627_v16  ;;  %1126 = vmatprep.subr.bf16.mxu0 %v9636_v17 }
  0x4a   :  { %1167 = vmatprep.subr.bf16.mxu1 %v9648_v20 }
  0x4b   :  { %917 = vmatmul.mubr.bf16.vlgmr.msra.gmra.mrb[20].mxu0 %v327_v21 }
  0x4c   :  { %958 = vmatmul.mubr.bf16.vlgmr.msra.gmra.mrb[20].mxu1 %v327_v21  ;;  %1127 = vmatpush1.bf16.msra.mxu0 %v8496_v18  ;;  %v9842_v18 = vrot.slane %v43_v55, %v12362_v53 }
  0x4d   :  { %1168 = vmatpush1.bf16.msra.mxu1 %v8499_v19  ;;  %1158 = vmatprep.mubr.bf16.mxu0 %v12353_v1  ;;  %v48_v19 = vrot.slane %v43_v55, %v12363_v54 }
  0x4e   :  { %1128 = vmatprep.subr.bf16.mxu0 %v9654_v22  ;;  %1169 = vmatprep.subr.bf16.mxu1 %v9659_v23 }
  0x4f   :  { %1199 = vmatprep.mubr.bf16.mxu1 %v12353_v1  ;;  %v52_v1 = vrot.slane %v43_v55, %v12367_v56 }
  0x50   :  { %1129 = vmatpush1.bf16.msra.mxu0 %v9664_v24 }
  0x51   :  { %1170 = vmatpush1.bf16.msra.mxu1 %v9669_v25  ;;  %1130 = vmatprep.subr.bf16.mxu0 %v9679_v26 }
  0x52   :  { %1171 = vmatprep.subr.bf16.mxu1 %v9684_v27 }
  0x54   :  { %1131 = vmatpush1.bf16.msra.mxu0 %v9690_v28 }
  0x55   :  { %1172 = vmatpush1.bf16.msra.mxu1 %v9695_v29  ;;  %1132 = vmatprep.subr.bf16.mxu0 %v9703_v30 }
  0x56   :  { %1173 = vmatprep.subr.bf16.mxu1 %v9708_v31 }
  0x58   :  { %1133 = vmatpush1.bf16.msra.mxu0 %v9714_v32 }
  0x59   :  { %1174 = vmatpush1.bf16.msra.mxu1 %v9719_v33  ;;  %1134 = vmatprep.subr.bf16.mxu0 %v9727_v34 }
  0x5a   :  { %1175 = vmatprep.subr.bf16.mxu1 %v9732_v35 }
  0x5c   :  { %1135 = vmatpush1.bf16.msra.mxu0 %v9738_v36 }
  0x5d   :  { %1176 = vmatpush1.bf16.msra.mxu1 %v9743_v37  ;;  %1136 = vmatprep.subr.bf16.mxu0 %v9750_v38 }
  0x5e   :  { %1177 = vmatprep.subr.bf16.mxu1 %v9761_v40 }
  0x60   :  { %1137 = vmatpush1.bf16.msra.mxu0 %v9756_v39 }
  0x61   :  { %1178 = vmatpush1.bf16.msra.mxu1 %v9768_v41  ;;  %1138 = vmatprep.subr.bf16.mxu0 %v9773_v42 }
  0x62   :  { %1179 = vmatprep.subr.bf16.mxu1 %v9784_v44 }
  0x64   :  { %1139 = vmatpush1.bf16.msra.mxu0 %v9779_v43 }
  0x65   :  { %1180 = vmatpush1.bf16.msra.mxu1 %v9789_v45  ;;  %1140 = vmatprep.subr.bf16.mxu0 %v9794_v46 }
  0x66   :  { %1181 = vmatprep.subr.bf16.mxu1 %v9800_v47 }
  0x68   :  { %1141 = vmatpush1.bf16.msra.mxu0 %v9808_v48 }
  0x69   :  { %1182 = vmatpush1.bf16.msra.mxu1 %v9813_v49  ;;  %1426 = vmatprep.subr.bf16.mxu0 %v9354_v11  ;;  %v9834_v11 = vrot.slane %v43_v55, %v12357_v52 }
  0x6a   :  { %1467 = vmatprep.subr.bf16.mxu1 %v9362_v13 }
  0xdd   :  { %v9836_v13 = vpop.f32.mrb[0].mxu0 }
  0xde   :  { %v9838_v57 = vpop.f32.mrb[0].mxu1  ;;  %v174_v21 = vpop.f32.mrb[1].mxu0 }
  0xdf   :  { %v247_v50 = vpop.f32.mrb[1].mxu1  ;;  %v176_v49 = vpop.f32.mrb[2].mxu0 }
  0xe0   :  { %v249_v48 = vpop.f32.mrb[2].mxu1  ;;  %v9848_v52 = vadd.f32 %v176_v49, %v48_v19  ;;  %v178_v47 = vpop.f32.mrb[3].mxu0 }
  0xe1   :  { %v9851_v46 = vadd.f32 %v249_v48, %v9834_v11  ;;  %v251_v45 = vpop.f32.mrb[3].mxu1  ;;  %v9853_v43 = vadd.f32 %v178_v47, %v52_v1 }
  0xe2   :  { %v9856_v53 = vadd.f32 %v251_v45, %v9842_v18 }
  0xe5   :  { %v182_v54 = vpop.f32.mrb[4].mxu0 }
  0xe6   :  { %v255_v44 = vpop.f32.mrb[4].mxu1  ;;  %v9858_v42 = vadd.f32 %v182_v54, %v48_v19  ;;  %v184_v41 = vpop.f32.mrb[5].mxu0 }
  0xe7   :  { %v9861_v55 = vadd.f32 %v255_v44, %v9834_v11  ;;  %v257_v49 = vpop.f32.mrb[5].mxu1  ;;  %v9863_v56 = vadd.f32 %v184_v41, %v52_v1  ;;  %v186_v39 = vpop.f32.mrb[6].mxu0 }
  0xe8   :  { %12524 = vst [vmem:[#allocation23_spill] sm:$0xff] %v9858_v42  ;;  %v9866_v48 = vadd.f32 %v257_v49, %v9842_v18  ;;  %v259_v47 = vpop.f32.mrb[6].mxu1  ;;  %v9868_v40 = vadd.f32 %v186_v39, %v48_v19  ;;  %v188_v45 = vpop.f32.mrb[7].mxu0 }
  0xe9   :  { %12525 = vst [vmem:[#allocation24_spill] sm:$0xff] %v9861_v55  ;;  %12526 = vst [vmem:[#allocation25_spill] sm:$0xff] %v9863_v56  ;;  %v9871_v38 = vadd.f32 %v259_v47, %v9834_v11  ;;  %v261_v54 = vpop.f32.mrb[7].mxu1  ;;  %v9873_v42 = vadd.f32 %v188_v45, %v52_v1 }
  0xea   :  { %12527 = vst [vmem:[#allocation26_spill] sm:$0xff] %v9866_v48  ;;  %12528 = vst [vmem:[#allocation27_spill] sm:$0xff] %v9868_v40  ;;  %v9876_v44 = vadd.f32 %v261_v54, %v9842_v18 }
  0xeb   :  { %12529 = vst [vmem:[#allocation28_spill] sm:$0xff] %v9871_v38  ;;  %12530 = vst [vmem:[#allocation29_spill] sm:$0xff] %v9873_v42 }
  0xec   :  { %12531 = vst [vmem:[#allocation30_spill] sm:$0xff] %v9876_v44 }
  0xed   :  { %v192_v55 = vpop.f32.mrb[8].mxu0 }
  0xee   :  { %v265_v41 = vpop.f32.mrb[8].mxu1  ;;  %v9878_v56 = vadd.f32 %v192_v55, %v48_v19  ;;  %v194_v37 = vpop.f32.mrb[9].mxu0 }
  0xef   :  { %v9881_v49 = vadd.f32 %v265_v41, %v9834_v11  ;;  %v267_v39 = vpop.f32.mrb[9].mxu1  ;;  %v9883_v40 = vadd.f32 %v194_v37, %v52_v1  ;;  %v196_v48 = vpop.f32.mrb[10].mxu0 }
  0xf0   :  { %12532 = vst [vmem:[#allocation31_spill] sm:$0xff] %v9878_v56  ;;  %v9886_v47 = vadd.f32 %v267_v39, %v9842_v18  ;;  %v269_v45 = vpop.f32.mrb[10].mxu1  ;;  %v9888_v42 = vadd.f32 %v196_v48, %v48_v19  ;;  %v198_v54 = vpop.f32.mrb[11].mxu0 }
  0xf1   :  { %12533 = vst [vmem:[#allocation32_spill] sm:$0xff] %v9881_v49  ;;  %12534 = vst [vmem:[#allocation33_spill] sm:$0xff] %v9883_v40  ;;  %v9891_v44 = vadd.f32 %v269_v45, %v9834_v11  ;;  %v271_v55 = vpop.f32.mrb[11].mxu1  ;;  %v9893_v56 = vadd.f32 %v198_v54, %v52_v1 }
  0xf2   :  { %12535 = vst [vmem:[#allocation34_spill] sm:$0xff] %v9886_v47  ;;  %12536 = vst [vmem:[#allocation35_spill] sm:$0xff] %v9888_v42  ;;  %v9896_v41 = vadd.f32 %v271_v55, %v9842_v18 }
  0xf3   :  { %12537 = vst [vmem:[#allocation36_spill] sm:$0xff] %v9891_v44  ;;  %12538 = vst [vmem:[#allocation37_spill] sm:$0xff] %v9893_v56 }
  0xf4   :  { %12539 = vst [vmem:[#allocation38_spill] sm:$0xff] %v9896_v41 }
  0xf5   :  { %v202_v49 = vpop.f32.mrb[12].mxu0 }
  0xf6   :  { %v275_v37 = vpop.f32.mrb[12].mxu1  ;;  %v9898_v40 = vadd.f32 %v202_v49, %v48_v19  ;;  %v204_v38 = vpop.f32.mrb[13].mxu0 }
  0xf7   :  { %v9901_v39 = vadd.f32 %v275_v37, %v9834_v11  ;;  %v277_v48 = vpop.f32.mrb[13].mxu1  ;;  %v9903_v42 = vadd.f32 %v204_v38, %v52_v1  ;;  %v206_v47 = vpop.f32.mrb[14].mxu0  ;;  %v173_v38 = vadd.f32 %v9836_v13, %v48_v19 }
  0xf8   :  { %12540 = vst [vmem:[#allocation39_spill] sm:$0xff] %v9898_v40  ;;  %v9906_v45 = vadd.f32 %v277_v48, %v9842_v18  ;;  %v279_v54 = vpop.f32.mrb[14].mxu1  ;;  %v9908_v56 = vadd.f32 %v206_v47, %v48_v19  ;;  %v208_v55 = vpop.f32.mrb[15].mxu0  ;;  %v175_v48 = vadd.f32 %v174_v21, %v52_v1 }
  0xf9   :  { %12541 = vst [vmem:[#allocation40_spill] sm:$0xff] %v9901_v39  ;;  %12542 = vst [vmem:[#allocation41_spill] sm:$0xff] %v9903_v42  ;;  %v9911_v41 = vadd.f32 %v279_v54, %v9834_v11  ;;  %v281_v49 = vpop.f32.mrb[15].mxu1  ;;  %v9913_v40 = vadd.f32 %v208_v55, %v52_v1  ;;  %v246_v42 = vadd.f32 %v9838_v57, %v9834_v11 }
  0xfa   :  { %12543 = vst [vmem:[#allocation42_spill] sm:$0xff] %v9906_v45  ;;  %12544 = vst [vmem:[#allocation43_spill] sm:$0xff] %v9908_v56  ;;  %v9916_v37 = vadd.f32 %v281_v49, %v9842_v18  ;;  %v248_v45 = vadd.f32 %v247_v50, %v9842_v18 }
  0xfb   :  { %12545 = vst [vmem:[#allocation44_spill] sm:$0xff] %v9911_v41  ;;  %12546 = vst [vmem:[#allocation45_spill] sm:$0xff] %v9913_v40 }
  0xfc   :  { %12547 = vst [vmem:[#allocation46_spill] sm:$0xff] %v9916_v37 }
  0xfd   :  { %v555_v47 = vpop.f32.mrb[16].mxu0 }
  0xfe   :  { %v596_v56 = vpop.f32.mrb[16].mxu1  ;;  %v642_v39 = vadd.f32 %v555_v47, %v173_v38  ;;  %v557_v54 = vpop.f32.mrb[17].mxu0  ;;  %v9233_v38 = vld [vmem:[%s12347_s3 + $0x8] ss:$16 sps:$4 sm:$0xff]   ;;  %v9235_v47 = vld [vmem:[%s12347_s3 + $0x2c] ss:$16 sps:$4 sm:$0xff]  }
  0xff   :  { %v644_v44 = vadd.f32 %v596_v56, %v246_v42  ;;  %v598_v41 = vpop.f32.mrb[17].mxu1  ;;  %v643_v36 = vadd.f32 %v557_v54, %v175_v48  ;;  %v559_v40 = vpop.f32.mrb[18].mxu0  ;;  %v9234_v48 = vld [vmem:[%s12347_s3 + $0x24] ss:$16 sps:$4 sm:$0xff]   ;;  %v12548_v54 = vmov 0  }
 0x100   :  { %v645_v55 = vadd.f32 %v598_v41, %v248_v45  ;;  %v600_v35 = vpop.f32.mrb[18].mxu1  ;;  %v7496_v49 = vmul.f32 -1.442695, %v642_v39  ;;  %v560_v37 = vpop.f32.mrb[19].mxu0 }
 0x101   :  { %v601_v34 = vpop.f32.mrb[19].mxu1  ;;  %v7497_v13 = vmul.f32 -1.442695, %v643_v36 }
 0x102   :  { %8976 = vpow2.f32 %v7496_v49  ;;  %v7498_v11 = vmul.f32 -1.442695, %v645_v55  ;;  %v9236_v55 = vld [vmem:[%s12347_s3 + $0x20] ss:$16 sps:$4 sm:$0xff]   ;;  %v9237_v49 = vld [vmem:[%s12347_s3 + $0x28] ss:$16 sps:$4 sm:$0xff]  }
 0x103   :  { %8978 = vpow2.f32 %v7497_v13  ;;  %v9238_v13 = vld [vmem:[%s12347_s3 + $0x44] ss:$16 sps:$4 sm:$0xff]  }
 0x104   :  { %8980 = vpow2.f32 %v7498_v11  ;;  %v9239_v11 = vld [vmem:[%s12347_s3 + $0x4c] ss:$16 sps:$4 sm:$0xff]  }
 0x105   :  { %8982 = vtanh.f32 %v644_v44  ;;  %v9232_v44 = vld [vmem:[%s12347_s3] ss:$16 sps:$4 sm:$0xff]  }
 0x10c   :  { %v8977_v1 = vpop.eup %8976 }
 0x10d   :  { %v8979_v57 = vpop.eup %8978  ;;  %v649_v18 = vadd.f32 1.0, %v8977_v1  ;;  %v9240_v1 = vld [vmem:[%s12347_s3 + $0x40] ss:$16 sps:$4 sm:$0xff]  }
 0x10e   :  { %v655_v19 = vadd.f32 1.0, %v8979_v57  ;;  %v8981_v42 = vpop.eup %8980  ;;  %v9241_v57 = vld [vmem:[%s12347_s3 + $0x48] ss:$16 sps:$4 sm:$0xff]  }
 0x10f   :  { %8984 = vrcp.f32 %v649_v18  ;;  %v8983_v56 = vpop.eup %8982  ;;  %v662_v50 = vadd.f32 1.0, %v8981_v42  ;;  %v9242_v18 = vld [vmem:[%s12347_s3 + $0x64] ss:$16 sps:$4 sm:$0xff]   ;;  %v9244_v42 = vld [vmem:[%s12347_s3 + $0x60] ss:$16 sps:$4 sm:$0xff]  }
 0x110   :  { %8986 = vrcp.f32 %v655_v19  ;;  %v9243_v19 = vld [vmem:[%s12347_s3 + $0x6c] ss:$16 sps:$4 sm:$0xff]  }
 0x111   :  { %8988 = vrcp.f32 %v662_v50  ;;  %v9249_v50 = vld [vmem:[%s12347_s3 + $0x88] ss:$16 sps:$4 sm:$0xff]  }
 0x119   :  { %v8985_v21 = vpop.eup %8984 }
 0x11a   :  { %v8987_v40 = vpop.eup %8986  ;;  %v666_v35 = vmul.f32 %v8985_v21, %v8983_v56  ;;  %v9245_v56 = vld [vmem:[%s12347_s3 + $0x68] ss:$16 sps:$4 sm:$0xff]   ;;  %v9246_v21 = vld [vmem:[%s12347_s3 + $0x84] ss:$16 sps:$4 sm:$0xff]  }
 0x11b   :  { %v665_v41 = vmul.f32 0.0, %v8987_v40  ;;  %v8989_v36 = vpop.eup %8988  ;;  %v9247_v40 = vld [vmem:[%s12347_s3 + $0x8c] ss:$16 sps:$4 sm:$0xff]  }
 0x11d   :  { %v9922_v34 = vadd.f32 %v666_v35, %v665_v41  ;;  %v9248_v35 = vld [vmem:[%s12347_s3 + $0x80] ss:$16 sps:$4 sm:$0xff]   ;;  %v9250_v41 = vld [vmem:[%s12347_s3 + $0xa4] ss:$16 sps:$4 sm:$0xff]  }
 0x11f   :  { %8990 = vtanh.f32 %v9922_v34 }
 0x129   :  { %v8991_v39 = vpop.eup %8990 }
 0x12a   :  { %v669_v45 = vmul.f32 %v8991_v39, %v8989_v36  ;;  %v9251_v36 = vld [vmem:[%s12347_s3 + $0xac] ss:$16 sps:$4 sm:$0xff]   ;;  %v9252_v39 = vld [vmem:[%s12347_s3 + $0xa0] ss:$16 sps:$4 sm:$0xff]  }
 0x12c   :  { %v9925_v37 = vpack.c.bf16 %v669_v45, %v669_v45  ;;  %v9253_v45 = vld [vmem:[%s12347_s3 + $0xa8] ss:$16 sps:$4 sm:$0xff]  }
 0x12e   :  { %1159 = vmatmul.mubr.bf16.vlgmr.msra.gmra.mrb[20].mxu0 %v9925_v37  ;;  %1200 = vmatmul.mubr.bf16.vlgmr.msra.gmra.mrb[20].mxu1 %v9925_v37 }
 0x12f   :  { %1427 = vmatpush1.bf16.msra.mxu0 %v9232_v44  ;;  %1468 = vmatpush1.bf16.msra.mxu1 %v9233_v38  ;;  %v9254_v44 = vld [vmem:[%s12347_s3 + $0xc4] ss:$16 sps:$4 sm:$0xff]   ;;  %v9255_v38 = vld [vmem:[%s12347_s3 + $0xcc] ss:$16 sps:$4 sm:$0xff]  }
 0x130   :  { %1428 = vmatprep.subr.bf16.mxu0 %v9234_v48  ;;  %1469 = vmatprep.subr.bf16.mxu1 %v9235_v47  ;;  %v9256_v48 = vld [vmem:[%s12347_s3 + $0xc0] ss:$16 sps:$4 sm:$0xff]   ;;  %v9257_v47 = vld [vmem:[%s12347_s3 + $0xc8] ss:$16 sps:$4 sm:$0xff]  }
 0x131   :  { %1458 = vmatprep.mubr.bf16.mxu0 %v12548_v54  ;;  %1499 = vmatprep.mubr.bf16.mxu1 %v12548_v54 }
 0x133   :  { %1429 = vmatpush1.bf16.msra.mxu0 %v9236_v55  ;;  %1470 = vmatpush1.bf16.msra.mxu1 %v9237_v49  ;;  %v9258_v55 = vld [vmem:[%s12347_s3 + $0xe4] ss:$16 sps:$4 sm:$0xff]   ;;  %v9259_v49 = vld [vmem:[%s12347_s3 + $0xec] ss:$16 sps:$4 sm:$0xff]  }
 0x134   :  { %1430 = vmatprep.subr.bf16.mxu0 %v9238_v13  ;;  %1471 = vmatprep.subr.bf16.mxu1 %v9239_v11  ;;  %v9260_v13 = vld [vmem:[%s12347_s3 + $0xe0] ss:$16 sps:$4 sm:$0xff]   ;;  %v9261_v11 = vld [vmem:[%s12347_s3 + $0xe8] ss:$16 sps:$4 sm:$0xff]  }
 0x137   :  { %1431 = vmatpush1.bf16.msra.mxu0 %v9240_v1  ;;  %1472 = vmatpush1.bf16.msra.mxu1 %v9241_v57  ;;  %v9262_v1 = vld [vmem:[%s12348_s5 + $0x4] ss:$16 sps:$4 sm:$0xff]   ;;  %v9263_v57 = vld [vmem:[%s12348_s5 + $0xc] ss:$16 sps:$4 sm:$0xff]  }
 0x138   :  { %1432 = vmatprep.subr.bf16.mxu0 %v9242_v18  ;;  %1473 = vmatprep.subr.bf16.mxu1 %v9243_v19  ;;  %v9264_v18 = vld [vmem:[%s12348_s5] ss:$16 sps:$4 sm:$0xff]   ;;  %v9265_v19 = vld [vmem:[%s12348_s5 + $0x8] ss:$16 sps:$4 sm:$0xff]  }
 0x13b   :  { %1433 = vmatpush1.bf16.msra.mxu0 %v9244_v42  ;;  %1474 = vmatpush1.bf16.msra.mxu1 %v9245_v56  ;;  %v9266_v42 = vld [vmem:[%s12348_s5 + $0x24] ss:$16 sps:$4 sm:$0xff]   ;;  %v9267_v56 = vld [vmem:[%s12348_s5 + $0x2c] ss:$16 sps:$4 sm:$0xff]  }
 0x13c   :  { %1434 = vmatprep.subr.bf16.mxu0 %v9246_v21  ;;  %1475 = vmatprep.subr.bf16.mxu1 %v9247_v40  ;;  %v9269_v21 = vld [vmem:[%s12348_s5 + $0x28] ss:$16 sps:$4 sm:$0xff]   ;;  %v9270_v40 = vld [vmem:[%s12348_s5 + $0x44] ss:$16 sps:$4 sm:$0xff]  }
 0x13f   :  { %1435 = vmatpush1.bf16.msra.mxu0 %v9248_v35  ;;  %1476 = vmatpush1.bf16.msra.mxu1 %v9249_v50  ;;  %v9271_v35 = vld [vmem:[%s12348_s5 + $0x4c] ss:$16 sps:$4 sm:$0xff]   ;;  %v9272_v50 = vld [vmem:[%s12348_s5 + $0x40] ss:$16 sps:$4 sm:$0xff]  }
 0x140   :  { %1436 = vmatprep.subr.bf16.mxu0 %v9250_v41  ;;  %1477 = vmatprep.subr.bf16.mxu1 %v9251_v36  ;;  %v9273_v41 = vld [vmem:[%s12348_s5 + $0x48] ss:$16 sps:$4 sm:$0xff]  }
 0x143   :  { %1437 = vmatpush1.bf16.msra.mxu0 %v9252_v39  ;;  %1478 = vmatpush1.bf16.msra.mxu1 %v9253_v45 }
 0x144   :  { %1438 = vmatprep.subr.bf16.mxu0 %v9254_v44  ;;  %1479 = vmatprep.subr.bf16.mxu1 %v9255_v38 }
 0x147   :  { %1439 = vmatpush1.bf16.msra.mxu0 %v9256_v48  ;;  %1480 = vmatpush1.bf16.msra.mxu1 %v9257_v47 }
 0x148   :  { %1440 = vmatprep.subr.bf16.mxu0 %v9258_v55  ;;  %1481 = vmatprep.subr.bf16.mxu1 %v9259_v49 }
 0x14b   :  { %1441 = vmatpush1.bf16.msra.mxu0 %v9260_v13  ;;  %1482 = vmatpush1.bf16.msra.mxu1 %v9261_v11 }
 0x14c   :  { %1768 = vmatprep.subr.bf16.mxu0 %v9262_v1  ;;  %1809 = vmatprep.subr.bf16.mxu1 %v9263_v57 }
 0x14e   :  { %1459 = vmatmul.mubr.bf16.vlgmr.msra.gmra.mrb[24].mxu0 %v9925_v37  ;;  %1500 = vmatmul.mubr.bf16.vlgmr.msra.gmra.mrb[24].mxu1 %v9925_v37  ;;  %v9268_v37 = vld [vmem:[%s12348_s5 + $0x20] ss:$16 sps:$4 sm:$0xff]  }
 0x14f   :  { %1769 = vmatpush1.bf16.msra.mxu0 %v9264_v18  ;;  %1810 = vmatpush1.bf16.msra.mxu1 %v9265_v19 }
 0x150   :  { %1770 = vmatprep.subr.bf16.mxu0 %v9266_v42  ;;  %1811 = vmatprep.subr.bf16.mxu1 %v9267_v56 }
 0x151   :  { %1800 = vmatprep.mubr.bf16.mxu0 %v12548_v54  ;;  %1841 = vmatprep.mubr.bf16.mxu1 %v12548_v54 }
 0x153   :  { %1771 = vmatpush1.bf16.msra.mxu0 %v9268_v37  ;;  %1812 = vmatpush1.bf16.msra.mxu1 %v9269_v21 }
 0x154   :  { %1772 = vmatprep.subr.bf16.mxu0 %v9270_v40  ;;  %1813 = vmatprep.subr.bf16.mxu1 %v9271_v35 }
 0x157   :  { %1773 = vmatpush1.bf16.msra.mxu0 %v9272_v50  ;;  %1814 = vmatpush1.bf16.msra.mxu1 %v9273_v41 }
 0x158   :  { %1774 = vmatprep.subr.bf16.mxu0 %v9516_v58  ;;  %1815 = vmatprep.subr.bf16.mxu1 %v9521_v59  ;;  %v324_v58 = vld [vmem:[%s12351_s6] sm:$0xf]  ;;  %v12549_v59 = vsub.s32 0, %v9823_v51 }
 0x15b   :  { %1775 = vmatpush1.bf16.msra.mxu0 %v9526_v60  ;;  %1816 = vmatpush1.bf16.msra.mxu1 %v9531_v61  ;;  %v10088_v60 = vrot.slane %v324_v58, %v12549_v59  ;;  %v12551_v61 = vsub.s32 1, %v9823_v51 }
 0x15c   :  { %1776 = vmatprep.subr.bf16.mxu0 %v9539_v62  ;;  %1817 = vmatprep.subr.bf16.mxu1 %v9544_v63 }
 0x15d   :  { %12550 = vst [vmem:[#allocation47_spill] sm:$0xff] %v10088_v60  ;;  %v10092_v62 = vrot.slane %v324_v58, %v12551_v61 }
 0x15f   :  { %1777 = vmatpush1.bf16.msra.mxu0 %v9550_v0  ;;  %1818 = vmatpush1.bf16.msra.mxu1 %v9555_v2  ;;  %12552 = vst [vmem:[#allocation48_spill] sm:$0xff] %v10092_v62 }
 0x160   :  { %1778 = vmatprep.subr.bf16.mxu0 %v9564_v3  ;;  %1819 = vmatprep.subr.bf16.mxu1 %v9569_v4 }
 0x163   :  { %1779 = vmatpush1.bf16.msra.mxu0 %v9574_v5  ;;  %1820 = vmatpush1.bf16.msra.mxu1 %v9579_v6 }
 0x164   :  { %1780 = vmatprep.subr.bf16.mxu0 %v9588_v7  ;;  %1821 = vmatprep.subr.bf16.mxu1 %v9593_v8 }
 0x167   :  { %1781 = vmatpush1.bf16.msra.mxu0 %v9598_v9  ;;  %1822 = vmatpush1.bf16.msra.mxu1 %v9603_v10 }
 0x168   :  { %1782 = vmatprep.subr.bf16.mxu0 %v9612_v12  ;;  %1823 = vmatprep.subr.bf16.mxu1 %v9617_v14  ;;  %v12553_v14 = vsub.s32 3, %v9823_v51 }
 0x16b   :  { %1783 = vmatpush1.bf16.msra.mxu0 %v9622_v15  ;;  %1824 = vmatpush1.bf16.msra.mxu1 %v9627_v16  ;;  %v10098_v15 = vrot.slane %v324_v58, %v12553_v14  ;;  %v12566_v14 = vld [vmem:[#allocation17_spill] sm:$0xff] }
 0x16c   :  { %2010 = vmatprep.subr.bf16.mxu0 %v9636_v17  ;;  %2051 = vmatprep.subr.bf16.mxu1 %v9648_v20  ;;  %v12555_v17 = vsub.s32 2, %v9823_v51 }
 0x16d   :  { %12554 = vst [vmem:[#allocation49_spill] sm:$0xff] %v10098_v15 }
 0x16e   :  { %v10103_v20 = vrot.slane %v324_v58, %v12555_v17  ;;  %v12568_v17 = vld [vmem:[#allocation18_spill] sm:$0xff] }
 0x170   :  { %12556 = vst [vmem:[#allocation50_spill] sm:$0xff] %v10103_v20 }
 0x201   :  { %v1160_v63 = vpop.f32.mrb[20].mxu0  ;;  %v1201_v0 = vpop.f32.mrb[20].mxu1 }
 0x202   :  { %v8287_v2 = vadd.f32 %v1160_v63, %v10088_v60  ;;  %v1162_v3 = vpop.f32.mrb[21].mxu0  ;;  %v1203_v4 = vpop.f32.mrb[21].mxu1  ;;  %v8289_v39 = vadd.f32 %v1201_v0, %v10103_v20 }
 0x203   :  { %v8288_v5 = vadd.f32 %v1162_v3, %v10092_v62  ;;  %v1164_v6 = vpop.f32.mrb[22].mxu0  ;;  %v1205_v7 = vpop.f32.mrb[22].mxu1  ;;  %v8290_v16 = vadd.f32 %v1203_v4, %v10098_v15 }
 0x204   :  { %v7563_v8 = vmul.f32 -1.442695, %v8287_v2  ;;  %v1165_v9 = vpop.f32.mrb[23].mxu0  ;;  %v1206_v10 = vpop.f32.mrb[23].mxu1  ;;  %v9275_v7 = vld [vmem:[%s12349_s4 + $0x8] ss:$16 sps:$4 sm:$0xff]  }
 0x205   :  { %v7564_v12 = vmul.f32 -1.442695, %v8288_v5  ;;  %v7565_v36 = vmul.f32 -1.442695, %v8290_v16  ;;  %v12567_v16 = vld [vmem:[#allocation16_spill] sm:$0xff] }
 0x206   :  { %8992 = vpow2.f32 %v7563_v8 }
 0x207   :  { %8994 = vpow2.f32 %v7564_v12  ;;  %v12565_v12 = vld [vmem:[#allocation15_spill] sm:$0xff] }
 0x208   :  { %8996 = vpow2.f32 %v7565_v36 }
 0x209   :  { %8998 = vtanh.f32 %v8289_v39  ;;  %v12569_v39 = vld [vmem:[#allocation19_spill] sm:$0xff] }
 0x210   :  { %v8993_v45 = vpop.eup %8992 }
 0x211   :  { %v8995_v44 = vpop.eup %8994  ;;  %v1211_v38 = vadd.f32 1.0, %v8993_v45  ;;  %v12570_v45 = vld [vmem:[#allocation20_spill] sm:$0xff] }
 0x212   :  { %v1217_v48 = vadd.f32 1.0, %v8995_v44  ;;  %v8997_v47 = vpop.eup %8996  ;;  %v10157_v44 = vld [vmem:[%s12347_s3 + $0x4] ss:$16 sps:$4 sm:$0xff]  }
 0x213   :  { %9000 = vrcp.f32 %v1211_v38  ;;  %v8999_v55 = vpop.eup %8998  ;;  %v1224_v1 = vadd.f32 1.0, %v8997_v47  ;;  %v10162_v38 = vld [vmem:[%s12347_s3 + $0xc] ss:$16 sps:$4 sm:$0xff]  }
 0x214   :  { %9002 = vrcp.f32 %v1217_v48 }
 0x215   :  { %9004 = vrcp.f32 %v1224_v1 }
 0x21d   :  { %v9001_v49 = vpop.eup %9000 }
 0x21e   :  { %v9003_v13 = vpop.eup %9002  ;;  %v1228_v11 = vmul.f32 %v9001_v49, %v8999_v55  ;;  %v12571_v55 = vld [vmem:[#allocation21_spill] sm:$0xff]  ;;  %v12572_v49 = vld [vmem:[#allocation22_spill] sm:$0xff] }
 0x21f   :  { %v1227_v51 = vmul.f32 0.0, %v9003_v13  ;;  %v9005_v0 = vpop.eup %9004  ;;  %v10169_v13 = vld [vmem:[%s12347_s3] ss:$16 sps:$4 sm:$0xff]  }
 0x221   :  { %v10106_v57 = vadd.f32 %v1228_v11, %v1227_v51  ;;  %v1460_v18 = vpop.f32.mrb[24].mxu0  ;;  %v1501_v19 = vpop.f32.mrb[24].mxu1  ;;  %v10174_v11 = vld [vmem:[%s12347_s3 + $0x8] ss:$16 sps:$4 sm:$0xff]   ;;  %v10183_v51 = vld [vmem:[%s12347_s3 + $0x24] ss:$16 sps:$4 sm:$0xff]  }
 0x222   :  { %v1547_v42 = vadd.f32 %v1460_v18, %v9848_v52  ;;  %v1549_v56 = vadd.f32 %v1501_v19, %v9851_v46  ;;  %v1462_v37 = vpop.f32.mrb[25].mxu0  ;;  %v1503_v21 = vpop.f32.mrb[25].mxu1  ;;  %v10188_v18 = vld [vmem:[%s12347_s3 + $0x2c] ss:$16 sps:$4 sm:$0xff]   ;;  %v10197_v19 = vld [vmem:[%s12347_s3 + $0x20] ss:$16 sps:$4 sm:$0xff]  }
 0x223   :  { %9006 = vtanh.f32 %v10106_v57  ;;  %v1548_v40 = vadd.f32 %v1462_v37, %v9853_v43  ;;  %v1550_v35 = vadd.f32 %v1503_v21, %v9856_v53  ;;  %v1464_v50 = vpop.f32.mrb[26].mxu0  ;;  %v1505_v41 = vpop.f32.mrb[26].mxu1  ;;  %v9274_v53 = vld [vmem:[%s12349_s4] ss:$16 sps:$4 sm:$0xff]   ;;  %v10214_v37 = vld [vmem:[%s12347_s3 + $0x4c] ss:$16 sps:$4 sm:$0xff]  }
 0x224   :  { %v7598_v58 = vmul.f32 -1.442695, %v1547_v42  ;;  %v1465_v59 = vpop.f32.mrb[27].mxu0  ;;  %v1506_v61 = vpop.f32.mrb[27].mxu1  ;;  %v10202_v42 = vld [vmem:[%s12347_s3 + $0x28] ss:$16 sps:$4 sm:$0xff]  }
 0x225   :  { %v7599_v63 = vmul.f32 -1.442695, %v1548_v40  ;;  %v7600_v2 = vmul.f32 -1.442695, %v1550_v35  ;;  %v10223_v21 = vld [vmem:[%s12347_s3 + $0x40] ss:$16 sps:$4 sm:$0xff]  }
 0x226   :  { %9008 = vpow2.f32 %v7598_v58  ;;  %v10228_v40 = vld [vmem:[%s12347_s3 + $0x48] ss:$16 sps:$4 sm:$0xff]   ;;  %v10235_v35 = vld [vmem:[%s12347_s3 + $0x64] ss:$16 sps:$4 sm:$0xff]   ;;  %v10240_v50 = vld [vmem:[%s12347_s3 + $0x6c] ss:$16 sps:$4 sm:$0xff]  }
 0x227   :  { %9010 = vpow2.f32 %v7599_v63  ;;  %v10247_v41 = vld [vmem:[%s12347_s3 + $0x60] ss:$16 sps:$4 sm:$0xff]   ;;  %v10252_v58 = vld [vmem:[%s12347_s3 + $0x68] ss:$16 sps:$4 sm:$0xff]   ;;  %v10259_v59 = vld [vmem:[%s12347_s3 + $0x84] ss:$16 sps:$4 sm:$0xff]  }
 0x228   :  { %9012 = vpow2.f32 %v7600_v2  ;;  %v10264_v61 = vld [vmem:[%s12347_s3 + $0x8c] ss:$16 sps:$4 sm:$0xff]   ;;  %v10271_v63 = vld [vmem:[%s12347_s3 + $0x80] ss:$16 sps:$4 sm:$0xff]  }
 0x229   :  { %9014 = vtanh.f32 %v1549_v56  ;;  %v10209_v56 = vld [vmem:[%s12347_s3 + $0x44] ss:$16 sps:$4 sm:$0xff]   ;;  %v10288_v2 = vld [vmem:[%s12347_s3 + $0xac] ss:$16 sps:$4 sm:$0xff]  }
 0x22d   :  { %v9007_v52 = vpop.eup %9006 }
 0x22e   :  { %v1231_v46 = vmul.f32 %v9007_v52, %v9005_v0  ;;  %v10276_v0 = vld [vmem:[%s12347_s3 + $0x88] ss:$16 sps:$4 sm:$0xff]   ;;  %v10283_v52 = vld [vmem:[%s12347_s3 + $0xa4] ss:$16 sps:$4 sm:$0xff]  }
 0x230   :  { %v9009_v3 = vpop.eup %9008  ;;  %v1232_v4 = vpack.c.bf16 %v1231_v46, %v1231_v46  ;;  %v10295_v46 = vld [vmem:[%s12347_s3 + $0xa0] ss:$16 sps:$4 sm:$0xff]  }
 0x231   :  { %v9011_v5 = vpop.eup %9010  ;;  %v1554_v6 = vadd.f32 1.0, %v9009_v3  ;;  %v10300_v3 = vld [vmem:[%s12347_s3 + $0xa8] ss:$16 sps:$4 sm:$0xff]  }
 0x232   :  { %v1560_v43 = vadd.f32 1.0, %v9011_v5  ;;  %1233 = vst [vmem:[%s12352_s7] sm:$0xf] %v1232_v4  ;;  %1801 = vmatmul.mubr.bf16.vlgmr.msra.gmra.mrb[28].mxu0 %v1232_v4  ;;  %1842 = vmatmul.mubr.bf16.vlgmr.msra.gmra.mrb[28].mxu1 %v1232_v4  ;;  %v9013_v8 = vpop.eup %9012  ;;  %v10307_v4 = vld [vmem:[%s12347_s3 + $0xc4] ss:$16 sps:$4 sm:$0xff]   ;;  %v10312_v5 = vld [vmem:[%s12347_s3 + $0xcc] ss:$16 sps:$4 sm:$0xff]  }
 0x233   :  { %9016 = vrcp.f32 %v1554_v6  ;;  %2011 = vmatpush1.bf16.msra.mxu0 %v9274_v53  ;;  %2052 = vmatpush1.bf16.msra.mxu1 %v9275_v7  ;;  %v10319_v6 = vld [vmem:[%s12347_s3 + $0xc0] ss:$16 sps:$4 sm:$0xff]   ;;  %v10331_v53 = vld [vmem:[%s12347_s3 + $0xe4] ss:$16 sps:$4 sm:$0xff]   ;;  %v10336_v7 = vld [vmem:[%s12347_s3 + $0xec] ss:$16 sps:$4 sm:$0xff]  }
 0x234   :  { %9018 = vrcp.f32 %v1560_v43  ;;  %2012 = vmatprep.subr.bf16.mxu0 %v9654_v22  ;;  %2053 = vmatprep.subr.bf16.mxu1 %v9659_v23  ;;  %v9015_v22 = vpop.eup %9014  ;;  %v10324_v43 = vld [vmem:[%s12347_s3 + $0xc8] ss:$16 sps:$4 sm:$0xff]  }
 0x235   :  { %2042 = vmatprep.mubr.bf16.mxu0 %v12548_v54  ;;  %2083 = vmatprep.mubr.bf16.mxu1 %v12548_v54 }
 0x237   :  { %2013 = vmatpush1.bf16.msra.mxu0 %v9664_v24  ;;  %2054 = vmatpush1.bf16.msra.mxu1 %v9669_v25  ;;  %v1567_v24 = vadd.f32 1.0, %v9013_v8  ;;  %v10343_v8 = vld [vmem:[%s12347_s3 + $0xe0] ss:$16 sps:$4 sm:$0xff]  }
 0x238   :  { %2014 = vmatprep.subr.bf16.mxu0 %v9679_v26  ;;  %2055 = vmatprep.subr.bf16.mxu1 %v9684_v27  ;;  %v12557_v26 = vld [vmem:[#allocation7_spill] sm:$0xff]  ;;  %v12558_v27 = vld [vmem:[#allocation8_spill] sm:$0xff] }
 0x239   :  { %9020 = vrcp.f32 %v1567_v24  ;;  %v10376_v24 = vld [vmem:[%s12348_s5 + $0x8] ss:$16 sps:$4 sm:$0xff]  }
 0x23b   :  { %2015 = vmatpush1.bf16.msra.mxu0 %v9690_v28  ;;  %2056 = vmatpush1.bf16.msra.mxu1 %v9695_v29  ;;  %v12559_v29 = vld [vmem:[#allocation9_spill] sm:$0xff] }
 0x23c   :  { %2016 = vmatprep.subr.bf16.mxu0 %v9703_v30  ;;  %2057 = vmatprep.subr.bf16.mxu1 %v9708_v31  ;;  %v12560_v30 = vld [vmem:[#allocation10_spill] sm:$0xff]  ;;  %v12561_v31 = vld [vmem:[#allocation11_spill] sm:$0xff] }
 0x23d   :  { %v9017_v23 = vpop.eup %9016 }
 0x23e   :  { %v9019_v9 = vpop.eup %9018  ;;  %v1571_v10 = vmul.f32 %v9017_v23, %v9015_v22  ;;  %v10348_v22 = vld [vmem:[%s12347_s3 + $0xe8] ss:$16 sps:$4 sm:$0xff]   ;;  %v10361_v23 = vld [vmem:[%s12348_s5 + $0x4] ss:$16 sps:$4 sm:$0xff]  }
 0x23f   :  { %v1570_v25 = vmul.f32 %v9019_v9, %v9922_v34  ;;  %2017 = vmatpush1.bf16.msra.mxu0 %v9714_v32  ;;  %2058 = vmatpush1.bf16.msra.mxu1 %v9719_v33  ;;  %v12562_v34 = vld [vmem:[#allocation13_spill] sm:$0xff]  ;;  %v12563_v32 = vld [vmem:[#allocation12_spill] sm:$0xff]  ;;  %v12564_v33 = vld [vmem:[#allocation14_spill] sm:$0xff] }
 0x240   :  { %2018 = vmatprep.subr.bf16.mxu0 %v12557_v26  ;;  %2059 = vmatprep.subr.bf16.mxu1 %v12558_v27  ;;  %v10366_v9 = vld [vmem:[%s12348_s5 + $0xc] ss:$16 sps:$4 sm:$0xff]   ;;  %v10395_v27 = vld [vmem:[%s12348_s5 + $0x20] ss:$16 sps:$4 sm:$0xff]  }
 0x241   :  { %v10139_v28 = vadd.f32 %v1571_v10, %v1570_v25  ;;  %v10371_v10 = vld [vmem:[%s12348_s5] ss:$16 sps:$4 sm:$0xff]   ;;  %v10385_v25 = vld [vmem:[%s12348_s5 + $0x24] ss:$16 sps:$4 sm:$0xff]   ;;  %v10390_v26 = vld [vmem:[%s12348_s5 + $0x2c] ss:$16 sps:$4 sm:$0xff]  }
 0x243   :  { %2019 = vmatpush1.bf16.msra.mxu0 %v12559_v29  ;;  %2060 = vmatpush1.bf16.msra.mxu1 %v12560_v30  ;;  %9022 = vtanh.f32 %v10139_v28  ;;  %v9021_v36 = vpop.eup %9020  ;;  %v10400_v29 = vld [vmem:[%s12348_s5 + $0x28] ss:$16 sps:$4 sm:$0xff]   ;;  %v10409_v30 = vld [vmem:[%s12348_s5 + $0x44] ss:$16 sps:$4 sm:$0xff]  }
 0x244   :  { %2020 = vmatprep.subr.bf16.mxu0 %v12561_v31  ;;  %2061 = vmatprep.subr.bf16.mxu1 %v12562_v34  ;;  %12573 = vst [vmem:[#allocation7_spill] sm:$0xff] %v10409_v30  ;;  %v10414_v31 = vld [vmem:[%s12348_s5 + $0x4c] ss:$16 sps:$4 sm:$0xff]   ;;  %v10419_v34 = vld [vmem:[%s12348_s5 + $0x40] ss:$16 sps:$4 sm:$0xff]  }
 0x245   :  { %12574 = vst [vmem:[#allocation8_spill] sm:$0xff] %v10414_v31  ;;  %12575 = vst [vmem:[#allocation9_spill] sm:$0xff] %v10419_v34 }
 0x247   :  { %2021 = vmatpush1.bf16.msra.mxu0 %v12563_v32  ;;  %2062 = vmatpush1.bf16.msra.mxu1 %v12564_v33  ;;  %v10424_v32 = vld [vmem:[%s12348_s5 + $0x48] ss:$16 sps:$4 sm:$0xff]   ;;  %v10433_v33 = vld [vmem:[%s12348_s5 + $0x64] ss:$16 sps:$4 sm:$0xff]  }
 0x248   :  { %2022 = vmatprep.subr.bf16.mxu0 %v12565_v12  ;;  %2063 = vmatprep.subr.bf16.mxu1 %v12566_v14  ;;  %12576 = vst [vmem:[#allocation10_spill] sm:$0xff] %v10424_v32  ;;  %12577 = vst [vmem:[#allocation11_spill] sm:$0xff] %v10433_v33  ;;  %v10438_v12 = vld [vmem:[%s12348_s5 + $0x6c] ss:$16 sps:$4 sm:$0xff]   ;;  %v10443_v14 = vld [vmem:[%s12348_s5 + $0x60] ss:$16 sps:$4 sm:$0xff]  }
 0x249   :  { %12578 = vst [vmem:[#allocation13_spill] sm:$0xff] %v10438_v12  ;;  %12579 = vst [vmem:[#allocation12_spill] sm:$0xff] %v10443_v14 }
 0x24b   :  { %2023 = vmatpush1.bf16.msra.mxu0 %v12567_v16  ;;  %2064 = vmatpush1.bf16.msra.mxu1 %v12568_v17  ;;  %v10448_v16 = vld [vmem:[%s12348_s5 + $0x68] ss:$16 sps:$4 sm:$0xff]   ;;  %v10457_v17 = vld [vmem:[%s12348_s5 + $0x84] ss:$16 sps:$4 sm:$0xff]  }
 0x24c   :  { %2024 = vmatprep.subr.bf16.mxu0 %v12569_v39  ;;  %2065 = vmatprep.subr.bf16.mxu1 %v12570_v45  ;;  %12580 = vst [vmem:[#allocation14_spill] sm:$0xff] %v10448_v16  ;;  %12581 = vst [vmem:[#allocation15_spill] sm:$0xff] %v10457_v17  ;;  %v10467_v39 = vld [vmem:[%s12348_s5 + $0x80] ss:$16 sps:$4 sm:$0xff]   ;;  %v10472_v45 = vld [vmem:[%s12348_s5 + $0x88] ss:$16 sps:$4 sm:$0xff]  }
 0x24d   :  { %v9023_v48 = vpop.eup %9022  ;;  %12583 = vst [vmem:[#allocation16_spill] sm:$0xff] %v10467_v39  ;;  %12584 = vst [vmem:[#allocation18_spill] sm:$0xff] %v10472_v45 }
 0x24e   :  { %v1574_v47 = vmul.f32 %v9023_v48, %v9021_v36  ;;  %v10462_v36 = vld [vmem:[%s12348_s5 + $0x8c] ss:$16 sps:$4 sm:$0xff]   ;;  %v10481_v48 = vld [vmem:[%s12348_s5 + $0xa4] ss:$16 sps:$4 sm:$0xff]  }
 0x24f   :  { %2025 = vmatpush1.bf16.msra.mxu0 %v12571_v55  ;;  %2066 = vmatpush1.bf16.msra.mxu1 %v12572_v49  ;;  %12582 = vst [vmem:[#allocation17_spill] sm:$0xff] %v10462_v36  ;;  %12585 = vst [vmem:[#allocation19_spill] sm:$0xff] %v10481_v48  ;;  %v10491_v55 = vld [vmem:[%s12348_s5 + $0xa0] ss:$16 sps:$4 sm:$0xff]   ;;  %v10496_v49 = vld [vmem:[%s12348_s5 + $0xa8] ss:$16 sps:$4 sm:$0xff]  }
 0x250   :  { %v10176_v1 = vpack.c.bf16 %v1574_v47, %v1574_v47  ;;  %2311 = vmatprep.subr.bf16.mxu0 %v10157_v44  ;;  %2352 = vmatprep.subr.bf16.mxu1 %v10162_v38  ;;  %v10486_v47 = vld [vmem:[%s12348_s5 + $0xac] ss:$16 sps:$4 sm:$0xff]   ;;  %12587 = vst [vmem:[#allocation21_spill] sm:$0xff] %v10491_v55  ;;  %12588 = vst [vmem:[#allocation22_spill] sm:$0xff] %v10496_v49 }
 0x251   :  { %12586 = vst [vmem:[#allocation20_spill] sm:$0xff] %v10486_v47 }
 0x252   :  { %2043 = vmatmul.mubr.bf16.vlgmr.msra.gmra.mrb[28].mxu0 %v10176_v1  ;;  %2084 = vmatmul.mubr.bf16.vlgmr.msra.gmra.mrb[28].mxu1 %v10176_v1 }
 0x253   :  { %2312 = vmatpush1.bf16.msra.mxu0 %v10169_v13  ;;  %2353 = vmatpush1.bf16.msra.mxu1 %v10174_v11 }
 0x254   :  { %2313 = vmatprep.subr.bf16.mxu0 %v10183_v51  ;;  %2354 = vmatprep.subr.bf16.mxu1 %v10188_v18 }
 0x255   :  { %2343 = vmatprep.mubr.bf16.mxu0 %v12548_v54  ;;  %2384 = vmatprep.mubr.bf16.mxu1 %v12548_v54 }
 0x257   :  { %2314 = vmatpush1.bf16.msra.mxu0 %v10197_v19  ;;  %2355 = vmatpush1.bf16.msra.mxu1 %v10202_v42 }
 0x258   :  { %2315 = vmatprep.subr.bf16.mxu0 %v10209_v56  ;;  %2356 = vmatprep.subr.bf16.mxu1 %v10214_v37 }
 0x25b   :  { %2316 = vmatpush1.bf16.msra.mxu0 %v10223_v21  ;;  %2357 = vmatpush1.bf16.msra.mxu1 %v10228_v40 }
 0x25c   :  { %2317 = vmatprep.subr.bf16.mxu0 %v10235_v35  ;;  %2358 = vmatprep.subr.bf16.mxu1 %v10240_v50 }
 0x25f   :  { %2318 = vmatpush1.bf16.msra.mxu0 %v10247_v41  ;;  %2359 = vmatpush1.bf16.msra.mxu1 %v10252_v58 }
 0x260   :  { %2319 = vmatprep.subr.bf16.mxu0 %v10259_v59  ;;  %2360 = vmatprep.subr.bf16.mxu1 %v10264_v61 }
 0x263   :  { %2320 = vmatpush1.bf16.msra.mxu0 %v10271_v63  ;;  %2361 = vmatpush1.bf16.msra.mxu1 %v10276_v0 }
 0x264   :  { %2321 = vmatprep.subr.bf16.mxu0 %v10283_v52  ;;  %2362 = vmatprep.subr.bf16.mxu1 %v10288_v2 }
 0x267   :  { %2322 = vmatpush1.bf16.msra.mxu0 %v10295_v46  ;;  %2363 = vmatpush1.bf16.msra.mxu1 %v10300_v3 }
 0x268   :  { %2323 = vmatprep.subr.bf16.mxu0 %v10307_v4  ;;  %2364 = vmatprep.subr.bf16.mxu1 %v10312_v5 }
 0x26b   :  { %2324 = vmatpush1.bf16.msra.mxu0 %v10319_v6  ;;  %2365 = vmatpush1.bf16.msra.mxu1 %v10324_v43 }
 0x26c   :  { %2325 = vmatprep.subr.bf16.mxu0 %v10331_v53  ;;  %2366 = vmatprep.subr.bf16.mxu1 %v10336_v7 }
 0x26f   :  { %2326 = vmatpush1.bf16.msra.mxu0 %v10343_v8  ;;  %2367 = vmatpush1.bf16.msra.mxu1 %v10348_v22 }
 0x270   :  { %2653 = vmatprep.subr.bf16.mxu0 %v10361_v23  ;;  %2694 = vmatprep.subr.bf16.mxu1 %v10366_v9 }
 0x272   :  { %2344 = vmatmul.mubr.bf16.vlgmr.msra.gmra.mrb[32].mxu0 %v10176_v1  ;;  %2385 = vmatmul.mubr.bf16.vlgmr.msra.gmra.mrb[32].mxu1 %v10176_v1  ;;  %v10505_v1 = vld [vmem:[%s12348_s5 + $0xc4] ss:$16 sps:$4 sm:$0xff]  }
 0x273   :  { %2685 = vmatprep.mubr.bf16.mxu0 %v12548_v54  ;;  %2726 = vmatprep.mubr.bf16.mxu1 %v12548_v54  ;;  %12589 = vst [vmem:[#allocation51_spill] sm:$0xff] %v10505_v1 }
 0x274   :  { %2654 = vmatpush1.bf16.msra.mxu0 %v10371_v10  ;;  %2695 = vmatpush1.bf16.msra.mxu1 %v10376_v24 }
 0x275   :  { %2655 = vmatprep.subr.bf16.mxu0 %v10385_v25  ;;  %2696 = vmatprep.subr.bf16.mxu1 %v10390_v26 }
 0x278   :  { %2656 = vmatpush1.bf16.msra.mxu0 %v10395_v27  ;;  %2697 = vmatpush1.bf16.msra.mxu1 %v10400_v29 }
 0x279   :  { %2657 = vmatprep.subr.bf16.mxu0 %v10409_v30  ;;  %2698 = vmatprep.subr.bf16.mxu1 %v10414_v31 }
 0x27c   :  { %2658 = vmatpush1.bf16.msra.mxu0 %v10419_v34  ;;  %2699 = vmatpush1.bf16.msra.mxu1 %v10424_v32 }
 0x27d   :  { %2659 = vmatprep.subr.bf16.mxu0 %v10433_v33  ;;  %2700 = vmatprep.subr.bf16.mxu1 %v10438_v12 }
 0x280   :  { %2660 = vmatpush1.bf16.msra.mxu0 %v10443_v14  ;;  %2701 = vmatpush1.bf16.msra.mxu1 %v10448_v16 }
 0x281   :  { %2661 = vmatprep.subr.bf16.mxu0 %v10457_v17  ;;  %2702 = vmatprep.subr.bf16.mxu1 %v10462_v36 }
 0x284   :  { %2662 = vmatpush1.bf16.msra.mxu0 %v10467_v39  ;;  %2703 = vmatpush1.bf16.msra.mxu1 %v10472_v45  ;;  %v10510_v45 = vld [vmem:[%s12348_s5 + $0xcc] ss:$16 sps:$4 sm:$0xff]  }
 0x285   :  { %2663 = vmatprep.subr.bf16.mxu0 %v10481_v48  ;;  %2704 = vmatprep.subr.bf16.mxu1 %v10486_v47  ;;  %12590 = vst [vmem:[#allocation52_spill] sm:$0xff] %v10510_v45  ;;  %v10515_v48 = vld [vmem:[%s12348_s5 + $0xc0] ss:$16 sps:$4 sm:$0xff]   ;;  %v10534_v47 = vld [vmem:[%s12348_s5 + $0xec] ss:$16 sps:$4 sm:$0xff]  }
 0x286   :  { %12591 = vst [vmem:[#allocation53_spill] sm:$0xff] %v10515_v48  ;;  %12594 = vst [vmem:[#allocation56_spill] sm:$0xff] %v10534_v47 }
 0x288   :  { %2664 = vmatpush1.bf16.msra.mxu0 %v10491_v55  ;;  %2705 = vmatpush1.bf16.msra.mxu1 %v10496_v49  ;;  %v10520_v55 = vld [vmem:[%s12348_s5 + $0xc8] ss:$16 sps:$4 sm:$0xff]   ;;  %v10529_v49 = vld [vmem:[%s12348_s5 + $0xe4] ss:$16 sps:$4 sm:$0xff]  }
 0x289   :  { %12592 = vst [vmem:[#allocation54_spill] sm:$0xff] %v10520_v55  ;;  %2665 = vmatprep.subr.bf16.mxu0 %v10505_v1  ;;  %2706 = vmatprep.subr.bf16.mxu1 %v10510_v45  ;;  %12593 = vst [vmem:[#allocation55_spill] sm:$0xff] %v10529_v49  ;;  %v10539_v1 = vld [vmem:[%s12348_s5 + $0xe0] ss:$16 sps:$4 sm:$0xff]   ;;  %v10558_v45 = vld [vmem:[%s12349_s4 + $0xc] ss:$16 sps:$4 sm:$0xff]  }
 0x28a   :  { %12595 = vst [vmem:[#allocation57_spill] sm:$0xff] %v10539_v1  ;;  %12598 = vst [vmem:[#allocation60_spill] sm:$0xff] %v10558_v45 }
 0x28c   :  { %2666 = vmatpush1.bf16.msra.mxu0 %v10515_v48  ;;  %2707 = vmatpush1.bf16.msra.mxu1 %v10520_v55  ;;  %v10544_v48 = vld [vmem:[%s12348_s5 + $0xe8] ss:$16 sps:$4 sm:$0xff]   ;;  %v10553_v55 = vld [vmem:[%s12349_s4 + $0x4] ss:$16 sps:$4 sm:$0xff]  }
 0x28d   :  { %12596 = vst [vmem:[#allocation58_spill] sm:$0xff] %v10544_v48  ;;  %2667 = vmatprep.subr.bf16.mxu0 %v10529_v49  ;;  %2708 = vmatprep.subr.bf16.mxu1 %v10534_v47  ;;  %12597 = vst [vmem:[#allocation59_spill] sm:$0xff] %v10553_v55 }
 0x290   :  { %2668 = vmatpush1.bf16.msra.mxu0 %v10539_v1  ;;  %2709 = vmatpush1.bf16.msra.mxu1 %v10544_v48 }
 0x291   :  { %2895 = vmatprep.subr.bf16.mxu0 %v10553_v55  ;;  %2936 = vmatprep.subr.bf16.mxu1 %v10558_v45 }
 0x325   :  { %v2044_v49 = vpop.f32.mrb[28].mxu0  ;;  %v2085_v47 = vpop.f32.mrb[28].mxu1 }
 0x326   :  { %v8291_v1 = vadd.f32 %v2044_v49, %v10088_v60  ;;  %v2046_v39 = vpop.f32.mrb[29].mxu0  ;;  %v2087_v48 = vpop.f32.mrb[29].mxu1  ;;  %v8293_v45 = vadd.f32 %v2085_v47, %v10103_v20  ;;  %v12602_v20 = vld [vmem:[#allocation26_spill] sm:$0xff] }
 0x327   :  { %v8292_v36 = vadd.f32 %v2046_v39, %v10092_v62  ;;  %v2048_v17 = vpop.f32.mrb[30].mxu0  ;;  %v2089_v16 = vpop.f32.mrb[30].mxu1  ;;  %v8294_v55 = vadd.f32 %v2087_v48, %v10098_v15 }
 0x328   :  { %v7665_v14 = vmul.f32 -1.442695, %v8291_v1  ;;  %v2049_v12 = vpop.f32.mrb[31].mxu0  ;;  %v2090_v33 = vpop.f32.mrb[31].mxu1 }
 0x329   :  { %v7666_v32 = vmul.f32 -1.442695, %v8292_v36  ;;  %v7667_v34 = vmul.f32 -1.442695, %v8294_v55  ;;  %v12599_v55 = vld [vmem:[#allocation23_spill] sm:$0xff] }
 0x32a   :  { %9024 = vpow2.f32 %v7665_v14 }
 0x32b   :  { %9026 = vpow2.f32 %v7666_v32 }
 0x32c   :  { %9028 = vpow2.f32 %v7667_v34  ;;  %v12600_v34 = vld [vmem:[#allocation24_spill] sm:$0xff] }
 0x32d   :  { %9030 = vtanh.f32 %v8293_v45 }
 0x334   :  { %v9025_v31 = vpop.eup %9024 }
 0x335   :  { %v9027_v30 = vpop.eup %9026  ;;  %v2095_v49 = vadd.f32 1.0, %v9025_v31 }
 0x336   :  { %v2101_v60 = vadd.f32 1.0, %v9027_v30  ;;  %v9029_v16 = vpop.eup %9028 }
 0x337   :  { %9032 = vrcp.f32 %v2095_v49  ;;  %v9031_v17 = vpop.eup %9030  ;;  %v2108_v14 = vadd.f32 1.0, %v9029_v16 }
 0x338   :  { %9034 = vrcp.f32 %v2101_v60  ;;  %v12601_v60 = vld [vmem:[#allocation25_spill] sm:$0xff] }
 0x339   :  { %9036 = vrcp.f32 %v2108_v14 }
 0x341   :  { %v9033_v12 = vpop.eup %9032 }
 0x342   :  { %v9035_v33 = vpop.eup %9034  ;;  %v2112_v36 = vmul.f32 %v9033_v12, %v9031_v17 }
 0x343   :  { %v2111_v32 = vmul.f32 %v9035_v33, %v10106_v57 }
 0x345   :  { %v10567_v39 = vadd.f32 %v2112_v36, %v2111_v32  ;;  %v2345_v48 = vpop.f32.mrb[32].mxu0  ;;  %v2386_v47 = vpop.f32.mrb[32].mxu1 }
 0x346   :  { %v2432_v31 = vadd.f32 %v2345_v48, %v12599_v55  ;;  %v2434_v45 = vadd.f32 %v2386_v47, %v12600_v34  ;;  %v2347_v30 = vpop.f32.mrb[33].mxu0  ;;  %v2388_v1 = vpop.f32.mrb[33].mxu1  ;;  %v10577_v47 = vld [vmem:[%s12349_s4] ss:$16 sps:$4 sm:$0xff]  }
 0x347   :  { %v2433_v49 = vadd.f32 %v2347_v30, %v12601_v60  ;;  %v2435_v15 = vadd.f32 %v2388_v1, %v12602_v20  ;;  %v2349_v62 = vpop.f32.mrb[34].mxu0  ;;  %v2390_v17 = vpop.f32.mrb[34].mxu1  ;;  %9038 = vtanh.f32 %v10567_v39  ;;  %v10602_v60 = vld [vmem:[%s12349_s4 + $0x20] ss:$16 sps:$4 sm:$0xff]  }
 0x348   :  { %v7701_v57 = vmul.f32 -1.442695, %v2432_v31  ;;  %v2350_v16 = vpop.f32.mrb[35].mxu0  ;;  %v2391_v12 = vpop.f32.mrb[35].mxu1  ;;  %v10582_v62 = vld [vmem:[%s12349_s4 + $0x8] ss:$16 sps:$4 sm:$0xff]  }
 0x349   :  { %v7702_v33 = vmul.f32 -1.442695, %v2433_v49  ;;  %v9037_v36 = vpop.eup %9036  ;;  %v7703_v32 = vmul.f32 -1.442695, %v2435_v15  ;;  %v10587_v31 = vld [vmem:[%s12349_s4 + $0x24] ss:$16 sps:$4 sm:$0xff]  }
 0x34a   :  { %9040 = vpow2.f32 %v7701_v57  ;;  %v10592_v15 = vld [vmem:[%s12349_s4 + $0x2c] ss:$16 sps:$4 sm:$0xff]   ;;  %v10614_v49 = vld [vmem:[%s12349_s4 + $0x44] ss:$16 sps:$4 sm:$0xff]   ;;  %v10628_v57 = vld [vmem:[%s12349_s4 + $0x40] ss:$16 sps:$4 sm:$0xff]  }
 0x34b   :  { %9042 = vpow2.f32 %v7702_v33  ;;  %v10619_v17 = vld [vmem:[%s12349_s4 + $0x4c] ss:$16 sps:$4 sm:$0xff]   ;;  %12603 = vst [vmem:[#allocation23_spill] sm:$0xff] %v10628_v57  ;;  %v10633_v16 = vld [vmem:[%s12349_s4 + $0x48] ss:$16 sps:$4 sm:$0xff]  }
 0x34c   :  { %9044 = vpow2.f32 %v7703_v32  ;;  %12604 = vst [vmem:[#allocation24_spill] sm:$0xff] %v10633_v16  ;;  %v10640_v12 = vld [vmem:[%s12349_s4 + $0x64] ss:$16 sps:$4 sm:$0xff]   ;;  %v10645_v33 = vld [vmem:[%s12349_s4 + $0x6c] ss:$16 sps:$4 sm:$0xff]  }
 0x34d   :  { %9046 = vtanh.f32 %v2434_v45  ;;  %v10607_v45 = vld [vmem:[%s12349_s4 + $0x28] ss:$16 sps:$4 sm:$0xff]   ;;  %12605 = vst [vmem:[#allocation25_spill] sm:$0xff] %v10640_v12  ;;  %12606 = vst [vmem:[#allocation26_spill] sm:$0xff] %v10645_v33 }
 0x34e   :  { %v10657_v32 = vld [vmem:[%s12349_s4 + $0x68] ss:$16 sps:$4 sm:$0xff]  }
 0x351   :  { %v9039_v14 = vpop.eup %9038 }
 0x352   :  { %v2115_v48 = vmul.f32 %v9039_v14, %v9037_v36  ;;  %v10652_v14 = vld [vmem:[%s12349_s4 + $0x60] ss:$16 sps:$4 sm:$0xff]  }
 0x354   :  { %v9041_v20 = vpop.eup %9040  ;;  %v2116_v55 = vpack.c.bf16 %v2115_v48, %v2115_v48 }
 0x355   :  { %v9043_v34 = vpop.eup %9042  ;;  %v2439_v30 = vadd.f32 1.0, %v9041_v20  ;;  %v10664_v20 = vld [vmem:[%s12349_s4 + $0x84] ss:$16 sps:$4 sm:$0xff]  }
 0x356   :  { %v2445_v1 = vadd.f32 1.0, %v9043_v34  ;;  %7668 = vst [vmem:[%s12352_s7 + $0x4] sm:$0xf] %v2116_v55  ;;  %2686 = vmatmul.mubr.bf16.vlgmr.msra.gmra.mrb[36].mxu0 %v2116_v55  ;;  %2727 = vmatmul.mubr.bf16.vlgmr.msra.gmra.mrb[36].mxu1 %v2116_v55  ;;  %v9045_v36 = vpop.eup %9044  ;;  %v10669_v55 = vld [vmem:[%s12349_s4 + $0x8c] ss:$16 sps:$4 sm:$0xff]  }
 0x357   :  { %9048 = vrcp.f32 %v2439_v30  ;;  %2896 = vmatpush1.bf16.msra.mxu0 %v10577_v47  ;;  %2937 = vmatpush1.bf16.msra.mxu1 %v10582_v62  ;;  %v9047_v48 = vpop.eup %9046 }
 0x358   :  { %9050 = vrcp.f32 %v2445_v1  ;;  %2897 = vmatprep.subr.bf16.mxu0 %v10587_v31  ;;  %2938 = vmatprep.subr.bf16.mxu1 %v10592_v15 }
 0x359   :  { %2927 = vmatprep.mubr.bf16.mxu0 %v12548_v54  ;;  %2968 = vmatprep.mubr.bf16.mxu1 %v12548_v54 }
 0x35b   :  { %2898 = vmatpush1.bf16.msra.mxu0 %v10602_v60  ;;  %2939 = vmatpush1.bf16.msra.mxu1 %v10607_v45 }
 0x35c   :  { %2899 = vmatprep.subr.bf16.mxu0 %v10614_v49  ;;  %2940 = vmatprep.subr.bf16.mxu1 %v10619_v17 }
 0x35f   :  { %2900 = vmatpush1.bf16.msra.mxu0 %v10628_v57  ;;  %2941 = vmatpush1.bf16.msra.mxu1 %v10633_v16  ;;  %v2452_v16 = vadd.f32 1.0, %v9045_v36  ;;  %v10694_v36 = vld [vmem:[%s12349_s4 + $0xac] ss:$16 sps:$4 sm:$0xff]  }
 0x360   :  { %2901 = vmatprep.subr.bf16.mxu0 %v10640_v12  ;;  %2942 = vmatprep.subr.bf16.mxu1 %v10645_v33  ;;  %v10677_v33 = vld [vmem:[%s12349_s4 + $0x80] ss:$16 sps:$4 sm:$0xff]   ;;  %v10682_v12 = vld [vmem:[%s12349_s4 + $0x88] ss:$16 sps:$4 sm:$0xff]   ;;  %12610 = vst [vmem:[#allocation64_spill] sm:$0xff] %v10694_v36 }
 0x361   :  { %v9049_v34 = vpop.eup %9048  ;;  %12607 = vst [vmem:[#allocation61_spill] sm:$0xff] %v10677_v33  ;;  %12608 = vst [vmem:[#allocation62_spill] sm:$0xff] %v10682_v12  ;;  %9052 = vrcp.f32 %v2452_v16  ;;  %v10721_v16 = vld [vmem:[%s12349_s4 + $0xcc] ss:$16 sps:$4 sm:$0xff]  }
 0x362   :  { %v9051_v30 = vpop.eup %9050  ;;  %v2456_v1 = vmul.f32 %v9049_v34, %v9047_v48  ;;  %v10703_v34 = vld [vmem:[%s12349_s4 + $0xa0] ss:$16 sps:$4 sm:$0xff]   ;;  %12614 = vst [vmem:[#allocation68_spill] sm:$0xff] %v10721_v16 }
 0x363   :  { %v2455_v57 = vmul.f32 %v9051_v30, %v10139_v28  ;;  %2902 = vmatpush1.bf16.msra.mxu0 %v10652_v14  ;;  %2943 = vmatpush1.bf16.msra.mxu1 %v10657_v32  ;;  %v10689_v28 = vld [vmem:[%s12349_s4 + $0xa4] ss:$16 sps:$4 sm:$0xff]   ;;  %12611 = vst [vmem:[#allocation65_spill] sm:$0xff] %v10703_v34  ;;  %v10708_v30 = vld [vmem:[%s12349_s4 + $0xa8] ss:$16 sps:$4 sm:$0xff]  }
 0x364   :  { %2903 = vmatprep.subr.bf16.mxu0 %v10664_v20  ;;  %2944 = vmatprep.subr.bf16.mxu1 %v10669_v55  ;;  %12609 = vst [vmem:[#allocation63_spill] sm:$0xff] %v10689_v28  ;;  %12612 = vst [vmem:[#allocation66_spill] sm:$0xff] %v10708_v30 }
 0x365   :  { %v10696_v48 = vadd.f32 %v2456_v1, %v2455_v57  ;;  %v10716_v57 = vld [vmem:[%s12349_s4 + $0xc4] ss:$16 sps:$4 sm:$0xff]   ;;  %v10728_v1 = vld [vmem:[%s12349_s4 + $0xc0] ss:$16 sps:$4 sm:$0xff]  }
 0x366   :  { %12613 = vst [vmem:[#allocation67_spill] sm:$0xff] %v10716_v57 }
 0x367   :  { %2904 = vmatpush1.bf16.msra.mxu0 %v10677_v33  ;;  %2945 = vmatpush1.bf16.msra.mxu1 %v10682_v12  ;;  %9054 = vtanh.f32 %v10696_v48 }
 0x368   :  { %2905 = vmatprep.subr.bf16.mxu0 %v10689_v28  ;;  %2946 = vmatprep.subr.bf16.mxu1 %v10694_v36  ;;  %v10733_v36 = vld [vmem:[%s12349_s4 + $0xc8] ss:$16 sps:$4 sm:$0xff]  }
 0x369   :  { %12615 = vst [vmem:[#allocation69_spill] sm:$0xff] %v10733_v36 }
 0x36b   :  { %2906 = vmatpush1.bf16.msra.mxu0 %v10703_v34  ;;  %2947 = vmatpush1.bf16.msra.mxu1 %v10708_v30  ;;  %v10740_v34 = vld [vmem:[%s12349_s4 + $0xe4] ss:$16 sps:$4 sm:$0xff]   ;;  %v10745_v30 = vld [vmem:[%s12349_s4 + $0xec] ss:$16 sps:$4 sm:$0xff]   ;;  %v9053_v28 = vpop.eup %9052 }
 0x36c   :  { %2907 = vmatprep.subr.bf16.mxu0 %v10716_v57  ;;  %2948 = vmatprep.subr.bf16.mxu1 %v10721_v16  ;;  %v10752_v57 = vld [vmem:[%s12349_s4 + $0xe0] ss:$16 sps:$4 sm:$0xff]   ;;  %v10757_v16 = vld [vmem:[%s12349_s4 + $0xe8] ss:$16 sps:$4 sm:$0xff]  }
 0x36f   :  { %2908 = vmatpush1.bf16.msra.mxu0 %v10728_v1  ;;  %2949 = vmatpush1.bf16.msra.mxu1 %v10733_v36 }
 0x370   :  { %2909 = vmatprep.subr.bf16.mxu0 %v10740_v34  ;;  %2950 = vmatprep.subr.bf16.mxu1 %v10745_v30 }
 0x371   :  { %v9055_v12 = vpop.eup %9054 }
 0x372   :  { %v2459_v33 = vmul.f32 %v9055_v12, %v9053_v28  ;;  %v12644_v12 = vld [vmem:[#allocation49_spill] sm:$0xff] }
 0x373   :  { %2910 = vmatpush1.bf16.msra.mxu0 %v10752_v57  ;;  %2951 = vmatpush1.bf16.msra.mxu1 %v10757_v16 }
 0x374   :  { %3196 = vmatprep.subr.bf16.mxu0 %v10157_v44  ;;  %3237 = vmatprep.subr.bf16.mxu1 %v10162_v38  ;;  %v2460_v36 = vpack.c.bf16 %v2459_v33, %v2459_v33  ;;  %v12616_v44 = vld [vmem:[#allocation7_spill] sm:$0xff]  ;;  %v12617_v38 = vld [vmem:[#allocation8_spill] sm:$0xff] }
 0x376   :  { %2928 = vmatmul.mubr.bf16.vlgmr.msra.gmra.mrb[36].mxu0 %v2460_v36  ;;  %2969 = vmatmul.mubr.bf16.vlgmr.msra.gmra.mrb[36].mxu1 %v2460_v36 }
 0x377   :  { %3197 = vmatpush1.bf16.msra.mxu0 %v10169_v13  ;;  %3238 = vmatpush1.bf16.msra.mxu1 %v10174_v11  ;;  %v12618_v13 = vld [vmem:[#allocation9_spill] sm:$0xff]  ;;  %v12619_v11 = vld [vmem:[#allocation10_spill] sm:$0xff] }
 0x378   :  { %3198 = vmatprep.subr.bf16.mxu0 %v10183_v51  ;;  %3239 = vmatprep.subr.bf16.mxu1 %v10188_v18  ;;  %v12620_v51 = vld [vmem:[#allocation11_spill] sm:$0xff]  ;;  %v12621_v18 = vld [vmem:[#allocation13_spill] sm:$0xff] }
 0x379   :  { %3228 = vmatprep.mubr.bf16.mxu0 %v12548_v54  ;;  %3269 = vmatprep.mubr.bf16.mxu1 %v12548_v54 }
 0x37b   :  { %3199 = vmatpush1.bf16.msra.mxu0 %v10197_v19  ;;  %3240 = vmatpush1.bf16.msra.mxu1 %v10202_v42  ;;  %v12622_v19 = vld [vmem:[#allocation12_spill] sm:$0xff]  ;;  %v12623_v42 = vld [vmem:[#allocation14_spill] sm:$0xff] }
 0x37c   :  { %3200 = vmatprep.subr.bf16.mxu0 %v10209_v56  ;;  %3241 = vmatprep.subr.bf16.mxu1 %v10214_v37  ;;  %v12624_v56 = vld [vmem:[#allocation15_spill] sm:$0xff]  ;;  %v12625_v37 = vld [vmem:[#allocation17_spill] sm:$0xff] }
 0x37f   :  { %3201 = vmatpush1.bf16.msra.mxu0 %v10223_v21  ;;  %3242 = vmatpush1.bf16.msra.mxu1 %v10228_v40  ;;  %v12626_v21 = vld [vmem:[#allocation16_spill] sm:$0xff]  ;;  %v12627_v40 = vld [vmem:[#allocation18_spill] sm:$0xff] }
 0x380   :  { %3202 = vmatprep.subr.bf16.mxu0 %v10235_v35  ;;  %3243 = vmatprep.subr.bf16.mxu1 %v10240_v50  ;;  %v12628_v35 = vld [vmem:[#allocation19_spill] sm:$0xff]  ;;  %v12629_v50 = vld [vmem:[#allocation20_spill] sm:$0xff] }
 0x383   :  { %3203 = vmatpush1.bf16.msra.mxu0 %v10247_v41  ;;  %3244 = vmatpush1.bf16.msra.mxu1 %v10252_v58  ;;  %v12630_v41 = vld [vmem:[#allocation21_spill] sm:$0xff]  ;;  %v12631_v58 = vld [vmem:[#allocation22_spill] sm:$0xff] }
 0x384   :  { %3204 = vmatprep.subr.bf16.mxu0 %v10259_v59  ;;  %3245 = vmatprep.subr.bf16.mxu1 %v10264_v61  ;;  %v12632_v59 = vld [vmem:[#allocation51_spill] sm:$0xff]  ;;  %v12633_v61 = vld [vmem:[#allocation52_spill] sm:$0xff] }
 0x387   :  { %3205 = vmatpush1.bf16.msra.mxu0 %v10271_v63  ;;  %3246 = vmatpush1.bf16.msra.mxu1 %v10276_v0  ;;  %v12634_v63 = vld [vmem:[#allocation53_spill] sm:$0xff]  ;;  %v12635_v0 = vld [vmem:[#allocation54_spill] sm:$0xff] }
 0x388   :  { %3206 = vmatprep.subr.bf16.mxu0 %v10283_v52  ;;  %3247 = vmatprep.subr.bf16.mxu1 %v10288_v2  ;;  %v12636_v52 = vld [vmem:[#allocation55_spill] sm:$0xff]  ;;  %v12637_v2 = vld [vmem:[#allocation56_spill] sm:$0xff] }
 0x38b   :  { %3207 = vmatpush1.bf16.msra.mxu0 %v10295_v46  ;;  %3248 = vmatpush1.bf16.msra.mxu1 %v10300_v3  ;;  %v12638_v46 = vld [vmem:[#allocation57_spill] sm:$0xff]  ;;  %v12639_v3 = vld [vmem:[#allocation58_spill] sm:$0xff] }
 0x38c   :  { %3208 = vmatprep.subr.bf16.mxu0 %v10307_v4  ;;  %3249 = vmatprep.subr.bf16.mxu1 %v10312_v5  ;;  %v12640_v4 = vld [vmem:[#allocation59_spill] sm:$0xff]  ;;  %v12641_v5 = vld [vmem:[#allocation60_spill] sm:$0xff] }
 0x38f   :  { %3209 = vmatpush1.bf16.msra.mxu0 %v10319_v6  ;;  %3250 = vmatpush1.bf16.msra.mxu1 %v10324_v43 }
 0x390   :  { %3210 = vmatprep.subr.bf16.mxu0 %v10331_v53  ;;  %3251 = vmatprep.subr.bf16.mxu1 %v10336_v7  ;;  %v12642_v53 = vld [vmem:[#allocation47_spill] sm:$0xff] }
 0x393   :  { %3211 = vmatpush1.bf16.msra.mxu0 %v10343_v8  ;;  %3252 = vmatpush1.bf16.msra.mxu1 %v10348_v22 }
 0x394   :  { %3538 = vmatprep.subr.bf16.mxu0 %v10361_v23  ;;  %3579 = vmatprep.subr.bf16.mxu1 %v10366_v9  ;;  %v12643_v23 = vld [vmem:[#allocation48_spill] sm:$0xff] }
 0x396   :  { %3229 = vmatmul.mubr.bf16.vlgmr.msra.gmra.mrb[40].mxu0 %v2460_v36  ;;  %3270 = vmatmul.mubr.bf16.vlgmr.msra.gmra.mrb[40].mxu1 %v2460_v36  ;;  %v12645_v36 = vld [vmem:[#allocation50_spill] sm:$0xff] }
 0x397   :  { %3539 = vmatpush1.bf16.msra.mxu0 %v10371_v10  ;;  %3580 = vmatpush1.bf16.msra.mxu1 %v10376_v24 }
 0x398   :  { %3540 = vmatprep.subr.bf16.mxu0 %v10385_v25  ;;  %3581 = vmatprep.subr.bf16.mxu1 %v10390_v26 }
 0x399   :  { %3570 = vmatprep.mubr.bf16.mxu0 %v12548_v54  ;;  %3611 = vmatprep.mubr.bf16.mxu1 %v12548_v54 }
 0x39b   :  { %3541 = vmatpush1.bf16.msra.mxu0 %v10395_v27  ;;  %3582 = vmatpush1.bf16.msra.mxu1 %v10400_v29 }
 0x39c   :  { %3542 = vmatprep.subr.bf16.mxu0 %v12616_v44  ;;  %3583 = vmatprep.subr.bf16.mxu1 %v12617_v38 }
 0x39f   :  { %3543 = vmatpush1.bf16.msra.mxu0 %v12618_v13  ;;  %3584 = vmatpush1.bf16.msra.mxu1 %v12619_v11 }
 0x3a0   :  { %3544 = vmatprep.subr.bf16.mxu0 %v12620_v51  ;;  %3585 = vmatprep.subr.bf16.mxu1 %v12621_v18 }
 0x3a3   :  { %3545 = vmatpush1.bf16.msra.mxu0 %v12622_v19  ;;  %3586 = vmatpush1.bf16.msra.mxu1 %v12623_v42 }
 0x3a4   :  { %3546 = vmatprep.subr.bf16.mxu0 %v12624_v56  ;;  %3587 = vmatprep.subr.bf16.mxu1 %v12625_v37 }
 0x3a7   :  { %3547 = vmatpush1.bf16.msra.mxu0 %v12626_v21  ;;  %3588 = vmatpush1.bf16.msra.mxu1 %v12627_v40 }
 0x3a8   :  { %3548 = vmatprep.subr.bf16.mxu0 %v12628_v35  ;;  %3589 = vmatprep.subr.bf16.mxu1 %v12629_v50 }
 0x3ab   :  { %3549 = vmatpush1.bf16.msra.mxu0 %v12630_v41  ;;  %3590 = vmatpush1.bf16.msra.mxu1 %v12631_v58  ;;  %v12646_v58 = vld [vmem:[#allocation27_spill] sm:$0xff] }
 0x3ac   :  { %3550 = vmatprep.subr.bf16.mxu0 %v12632_v59  ;;  %3591 = vmatprep.subr.bf16.mxu1 %v12633_v61  ;;  %v12647_v61 = vld [vmem:[#allocation28_spill] sm:$0xff] }
 0x3af   :  { %3551 = vmatpush1.bf16.msra.mxu0 %v12634_v63  ;;  %3592 = vmatpush1.bf16.msra.mxu1 %v12635_v0 }
 0x3b0   :  { %3552 = vmatprep.subr.bf16.mxu0 %v12636_v52  ;;  %3593 = vmatprep.subr.bf16.mxu1 %v12637_v2  ;;  %v12648_v2 = vld [vmem:[#allocation29_spill] sm:$0xff] }
 0x3b3   :  { %3553 = vmatpush1.bf16.msra.mxu0 %v12638_v46  ;;  %3594 = vmatpush1.bf16.msra.mxu1 %v12639_v3  ;;  %v12649_v3 = vld [vmem:[#allocation30_spill] sm:$0xff] }
 0x3b4   :  { %3780 = vmatprep.subr.bf16.mxu0 %v12640_v4  ;;  %3821 = vmatprep.subr.bf16.mxu1 %v12641_v5 }
 0x449   :  { %v2929_v6 = vpop.f32.mrb[36].mxu0  ;;  %v2970_v43 = vpop.f32.mrb[36].mxu1 }
 0x44a   :  { %v8295_v7 = vadd.f32 %v2929_v6, %v12642_v53  ;;  %v2931_v8 = vpop.f32.mrb[37].mxu0  ;;  %v2972_v22 = vpop.f32.mrb[37].mxu1  ;;  %v8297_v44 = vadd.f32 %v2970_v43, %v12645_v36 }
 0x44b   :  { %v8296_v9 = vadd.f32 %v2931_v8, %v12643_v23  ;;  %v2933_v10 = vpop.f32.mrb[38].mxu0  ;;  %v2974_v24 = vpop.f32.mrb[38].mxu1  ;;  %v8298_v33 = vadd.f32 %v2972_v22, %v12644_v12 }
 0x44c   :  { %v7768_v25 = vmul.f32 -1.442695, %v8295_v7  ;;  %v2934_v26 = vpop.f32.mrb[39].mxu0  ;;  %v2975_v27 = vpop.f32.mrb[39].mxu1 }
 0x44d   :  { %v7769_v29 = vmul.f32 -1.442695, %v8296_v9  ;;  %v7770_v28 = vmul.f32 -1.442695, %v8298_v33 }
 0x44e   :  { %9056 = vpow2.f32 %v7768_v25 }
 0x44f   :  { %9058 = vpow2.f32 %v7769_v29 }
 0x450   :  { %9060 = vpow2.f32 %v7770_v28  ;;  %v12650_v28 = vld [vmem:[#allocation23_spill] sm:$0xff] }
 0x451   :  { %9062 = vtanh.f32 %v8297_v44  ;;  %v12652_v44 = vld [vmem:[#allocation25_spill] sm:$0xff] }
 0x458   :  { %v9057_v38 = vpop.eup %9056 }
 0x459   :  { %v9059_v13 = vpop.eup %9058  ;;  %v2980_v11 = vadd.f32 1.0, %v9057_v38 }
 0x45a   :  { %v2986_v51 = vadd.f32 1.0, %v9059_v13  ;;  %v9061_v18 = vpop.eup %9060 }
 0x45b   :  { %9064 = vrcp.f32 %v2980_v11  ;;  %v9063_v19 = vpop.eup %9062  ;;  %v2993_v21 = vadd.f32 1.0, %v9061_v18  ;;  %v12656_v18 = vld [vmem:[#allocation63_spill] sm:$0xff] }
 0x45c   :  { %9066 = vrcp.f32 %v2986_v51  ;;  %v12655_v51 = vld [vmem:[#allocation62_spill] sm:$0xff] }
 0x45d   :  { %9068 = vrcp.f32 %v2993_v21 }
 0x465   :  { %v9065_v42 = vpop.eup %9064 }
 0x466   :  { %v9067_v56 = vpop.eup %9066  ;;  %v2997_v37 = vmul.f32 %v9065_v42, %v9063_v19  ;;  %v12662_v19 = vld [vmem:[#allocation69_spill] sm:$0xff] }
 0x467   :  { %v2996_v40 = vmul.f32 %v9067_v56, %v10567_v39  ;;  %v9069_v22 = vpop.eup %9068  ;;  %v10885_v56 = vld [vmem:[%s12347_s3 + $0x4] ss:$16 sps:$4 sm:$0xff]  }
 0x469   :  { %v10838_v35 = vadd.f32 %v2997_v37, %v2996_v40  ;;  %v3230_v50 = vpop.f32.mrb[40].mxu0  ;;  %v3271_v41 = vpop.f32.mrb[40].mxu1  ;;  %v10890_v37 = vld [vmem:[%s12347_s3 + $0xc] ss:$16 sps:$4 sm:$0xff]  }
 0x46a   :  { %v3317_v59 = vadd.f32 %v3230_v50, %v12646_v58  ;;  %v3319_v63 = vadd.f32 %v3271_v41, %v12647_v61  ;;  %v3232_v0 = vpop.f32.mrb[41].mxu0  ;;  %v3273_v52 = vpop.f32.mrb[41].mxu1  ;;  %v10925_v50 = vld [vmem:[%s12347_s3 + $0x20] ss:$16 sps:$4 sm:$0xff]   ;;  %v10930_v41 = vld [vmem:[%s12347_s3 + $0x28] ss:$16 sps:$4 sm:$0xff]  }
 0x46b   :  { %v3318_v46 = vadd.f32 %v3232_v0, %v12648_v2  ;;  %v3320_v4 = vadd.f32 %v3273_v52, %v12649_v3  ;;  %v3234_v5 = vpop.f32.mrb[42].mxu0  ;;  %v3275_v6 = vpop.f32.mrb[42].mxu1  ;;  %9070 = vtanh.f32 %v10838_v35  ;;  %v10937_v58 = vld [vmem:[%s12347_s3 + $0x44] ss:$16 sps:$4 sm:$0xff]   ;;  %v10951_v61 = vld [vmem:[%s12347_s3 + $0x40] ss:$16 sps:$4 sm:$0xff]  }
 0x46c   :  { %v7804_v39 = vmul.f32 -1.442695, %v3317_v59  ;;  %v3235_v43 = vpop.f32.mrb[43].mxu0  ;;  %v3276_v7 = vpop.f32.mrb[43].mxu1  ;;  %v10942_v59 = vld [vmem:[%s12347_s3 + $0x4c] ss:$16 sps:$4 sm:$0xff]  }
 0x46d   :  { %v7805_v8 = vmul.f32 -1.442695, %v3318_v46  ;;  %v7806_v10 = vmul.f32 -1.442695, %v3320_v4  ;;  %v10963_v0 = vld [vmem:[%s12347_s3 + $0x64] ss:$16 sps:$4 sm:$0xff]  }
 0x46e   :  { %9072 = vpow2.f32 %v7804_v39  ;;  %v10968_v52 = vld [vmem:[%s12347_s3 + $0x6c] ss:$16 sps:$4 sm:$0xff]   ;;  %v10975_v2 = vld [vmem:[%s12347_s3 + $0x60] ss:$16 sps:$4 sm:$0xff]   ;;  %v10980_v46 = vld [vmem:[%s12347_s3 + $0x68] ss:$16 sps:$4 sm:$0xff]  }
 0x46f   :  { %9074 = vpow2.f32 %v7805_v8  ;;  %v10987_v3 = vld [vmem:[%s12347_s3 + $0x84] ss:$16 sps:$4 sm:$0xff]   ;;  %v10992_v4 = vld [vmem:[%s12347_s3 + $0x8c] ss:$16 sps:$4 sm:$0xff]   ;;  %v10999_v5 = vld [vmem:[%s12347_s3 + $0x80] ss:$16 sps:$4 sm:$0xff]  }
 0x470   :  { %9076 = vpow2.f32 %v7806_v10  ;;  %v11004_v6 = vld [vmem:[%s12347_s3 + $0x88] ss:$16 sps:$4 sm:$0xff]   ;;  %v11011_v39 = vld [vmem:[%s12347_s3 + $0xa4] ss:$16 sps:$4 sm:$0xff]   ;;  %v11016_v43 = vld [vmem:[%s12347_s3 + $0xac] ss:$16 sps:$4 sm:$0xff]  }
 0x471   :  { %9078 = vtanh.f32 %v3319_v63  ;;  %v10956_v63 = vld [vmem:[%s12347_s3 + $0x48] ss:$16 sps:$4 sm:$0xff]   ;;  %v11023_v7 = vld [vmem:[%s12347_s3 + $0xa0] ss:$16 sps:$4 sm:$0xff]  }
 0x472   :  { %v11028_v8 = vld [vmem:[%s12347_s3 + $0xa8] ss:$16 sps:$4 sm:$0xff]   ;;  %v11047_v10 = vld [vmem:[%s12347_s3 + $0xc0] ss:$16 sps:$4 sm:$0xff]  }
 0x475   :  { %v9071_v9 = vpop.eup %9070 }
 0x476   :  { %v3000_v24 = vmul.f32 %v9071_v9, %v9069_v22  ;;  %v11035_v22 = vld [vmem:[%s12347_s3 + $0xc4] ss:$16 sps:$4 sm:$0xff]   ;;  %v11040_v9 = vld [vmem:[%s12347_s3 + $0xcc] ss:$16 sps:$4 sm:$0xff]  }
 0x478   :  { %v9073_v25 = vpop.eup %9072  ;;  %v3001_v26 = vpack.c.bf16 %v3000_v24, %v3000_v24  ;;  %v11052_v24 = vld [vmem:[%s12347_s3 + $0xc8] ss:$16 sps:$4 sm:$0xff]  }
 0x479   :  { %v9075_v27 = vpop.eup %9074  ;;  %v3324_v29 = vadd.f32 1.0, %v9073_v25  ;;  %v11059_v25 = vld [vmem:[%s12347_s3 + $0xe4] ss:$16 sps:$4 sm:$0xff]  }
 0x47a   :  { %v3330_v33 = vadd.f32 1.0, %v9075_v27  ;;  %7771 = vst [vmem:[%s12352_s7 + $0x8] sm:$0xf] %v3001_v26  ;;  %3571 = vmatmul.mubr.bf16.vlgmr.msra.gmra.mrb[44].mxu0 %v3001_v26  ;;  %3612 = vmatmul.mubr.bf16.vlgmr.msra.gmra.mrb[44].mxu1 %v3001_v26  ;;  %v11064_v26 = vld [vmem:[%s12347_s3 + $0xec] ss:$16 sps:$4 sm:$0xff]  }
 0x47b   :  { %9080 = vrcp.f32 %v3324_v29  ;;  %3781 = vmatpush1.bf16.msra.mxu0 %v10577_v47  ;;  %3822 = vmatpush1.bf16.msra.mxu1 %v10582_v62  ;;  %v9077_v47 = vpop.eup %9076  ;;  %v12651_v62 = vld [vmem:[#allocation24_spill] sm:$0xff]  ;;  %v11076_v29 = vld [vmem:[%s12347_s3 + $0xe8] ss:$16 sps:$4 sm:$0xff]  }
 0x47c   :  { %9082 = vrcp.f32 %v3330_v33  ;;  %3782 = vmatprep.subr.bf16.mxu0 %v10587_v31  ;;  %3823 = vmatprep.subr.bf16.mxu1 %v10592_v15  ;;  %v9079_v31 = vpop.eup %9078  ;;  %v12653_v15 = vld [vmem:[#allocation26_spill] sm:$0xff] }
 0x47d   :  { %3812 = vmatprep.mubr.bf16.mxu0 %v12548_v54  ;;  %3853 = vmatprep.mubr.bf16.mxu1 %v12548_v54  ;;  %v11071_v27 = vld [vmem:[%s12347_s3 + $0xe0] ss:$16 sps:$4 sm:$0xff]   ;;  %v11089_v33 = vld [vmem:[%s12348_s5 + $0x4] ss:$16 sps:$4 sm:$0xff]  }
 0x47f   :  { %3783 = vmatpush1.bf16.msra.mxu0 %v10602_v60  ;;  %3824 = vmatpush1.bf16.msra.mxu1 %v10607_v45  ;;  %v3337_v60 = vadd.f32 1.0, %v9077_v47  ;;  %v11094_v47 = vld [vmem:[%s12348_s5 + $0xc] ss:$16 sps:$4 sm:$0xff]  }
 0x480   :  { %3784 = vmatprep.subr.bf16.mxu0 %v10614_v49  ;;  %3825 = vmatprep.subr.bf16.mxu1 %v10619_v17  ;;  %v12654_v17 = vld [vmem:[#allocation61_spill] sm:$0xff] }
 0x481   :  { %9084 = vrcp.f32 %v3337_v60  ;;  %v11147_v60 = vld [vmem:[%s12348_s5 + $0x40] ss:$16 sps:$4 sm:$0xff]  }
 0x482   :  { %12665 = vst [vmem:[#allocation9_spill] sm:$0xff] %v11147_v60 }
 0x483   :  { %3785 = vmatpush1.bf16.msra.mxu0 %v12650_v28  ;;  %3826 = vmatpush1.bf16.msra.mxu1 %v12651_v62  ;;  %v11099_v28 = vld [vmem:[%s12348_s5] ss:$16 sps:$4 sm:$0xff]   ;;  %v11104_v62 = vld [vmem:[%s12348_s5 + $0x8] ss:$16 sps:$4 sm:$0xff]  }
 0x484   :  { %3786 = vmatprep.subr.bf16.mxu0 %v12652_v44  ;;  %3827 = vmatprep.subr.bf16.mxu1 %v12653_v15  ;;  %v11118_v44 = vld [vmem:[%s12348_s5 + $0x2c] ss:$16 sps:$4 sm:$0xff]   ;;  %v11123_v15 = vld [vmem:[%s12348_s5 + $0x20] ss:$16 sps:$4 sm:$0xff]  }
 0x485   :  { %v9081_v38 = vpop.eup %9080 }
 0x486   :  { %v9083_v13 = vpop.eup %9082  ;;  %v3341_v11 = vmul.f32 %v9081_v38, %v9079_v31  ;;  %v11113_v31 = vld [vmem:[%s12348_s5 + $0x24] ss:$16 sps:$4 sm:$0xff]   ;;  %v11128_v38 = vld [vmem:[%s12348_s5 + $0x28] ss:$16 sps:$4 sm:$0xff]  }
 0x487   :  { %v3340_v45 = vmul.f32 %v9083_v13, %v10696_v48  ;;  %3787 = vmatpush1.bf16.msra.mxu0 %v10652_v14  ;;  %3828 = vmatpush1.bf16.msra.mxu1 %v10657_v32  ;;  %v12657_v48 = vld [vmem:[#allocation64_spill] sm:$0xff]  ;;  %v12658_v14 = vld [vmem:[#allocation65_spill] sm:$0xff]  ;;  %v12659_v32 = vld [vmem:[#allocation66_spill] sm:$0xff] }
 0x488   :  { %3788 = vmatprep.subr.bf16.mxu0 %v10664_v20  ;;  %3829 = vmatprep.subr.bf16.mxu1 %v10669_v55  ;;  %v12660_v20 = vld [vmem:[#allocation67_spill] sm:$0xff]  ;;  %v12661_v55 = vld [vmem:[#allocation68_spill] sm:$0xff] }
 0x489   :  { %v10867_v49 = vadd.f32 %v3341_v11, %v3340_v45  ;;  %v11137_v13 = vld [vmem:[%s12348_s5 + $0x44] ss:$16 sps:$4 sm:$0xff]   ;;  %v11142_v11 = vld [vmem:[%s12348_s5 + $0x4c] ss:$16 sps:$4 sm:$0xff]   ;;  %v11152_v45 = vld [vmem:[%s12348_s5 + $0x48] ss:$16 sps:$4 sm:$0xff]  }
 0x48a   :  { %12663 = vst [vmem:[#allocation7_spill] sm:$0xff] %v11137_v13  ;;  %12664 = vst [vmem:[#allocation8_spill] sm:$0xff] %v11142_v11 }
 0x48b   :  { %3789 = vmatpush1.bf16.msra.mxu0 %v12654_v17  ;;  %3830 = vmatpush1.bf16.msra.mxu1 %v12655_v51  ;;  %9086 = vtanh.f32 %v10867_v49  ;;  %v9085_v42 = vpop.eup %9084  ;;  %12666 = vst [vmem:[#allocation10_spill] sm:$0xff] %v11152_v45  ;;  %v11161_v17 = vld [vmem:[%s12348_s5 + $0x64] ss:$16 sps:$4 sm:$0xff]   ;;  %v11166_v51 = vld [vmem:[%s12348_s5 + $0x6c] ss:$16 sps:$4 sm:$0xff]  }
 0x48c   :  { %3790 = vmatprep.subr.bf16.mxu0 %v12656_v18  ;;  %3831 = vmatprep.subr.bf16.mxu1 %v12657_v48  ;;  %12667 = vst [vmem:[#allocation11_spill] sm:$0xff] %v11161_v17  ;;  %12668 = vst [vmem:[#allocation13_spill] sm:$0xff] %v11166_v51  ;;  %v11171_v18 = vld [vmem:[%s12348_s5 + $0x60] ss:$16 sps:$4 sm:$0xff]   ;;  %v11176_v48 = vld [vmem:[%s12348_s5 + $0x68] ss:$16 sps:$4 sm:$0xff]  }
 0x48d   :  { %12669 = vst [vmem:[#allocation12_spill] sm:$0xff] %v11171_v18  ;;  %12670 = vst [vmem:[#allocation14_spill] sm:$0xff] %v11176_v48 }
 0x48f   :  { %3791 = vmatpush1.bf16.msra.mxu0 %v12658_v14  ;;  %3832 = vmatpush1.bf16.msra.mxu1 %v12659_v32  ;;  %v11185_v14 = vld [vmem:[%s12348_s5 + $0x84] ss:$16 sps:$4 sm:$0xff]   ;;  %v11190_v32 = vld [vmem:[%s12348_s5 + $0x8c] ss:$16 sps:$4 sm:$0xff]  }
 0x490   :  { %3792 = vmatprep.subr.bf16.mxu0 %v12660_v20  ;;  %3833 = vmatprep.subr.bf16.mxu1 %v12661_v55  ;;  %12671 = vst [vmem:[#allocation15_spill] sm:$0xff] %v11185_v14  ;;  %12672 = vst [vmem:[#allocation17_spill] sm:$0xff] %v11190_v32  ;;  %v11195_v20 = vld [vmem:[%s12348_s5 + $0x80] ss:$16 sps:$4 sm:$0xff]   ;;  %v11200_v55 = vld [vmem:[%s12348_s5 + $0x88] ss:$16 sps:$4 sm:$0xff]  }
 0x491   :  { %12673 = vst [vmem:[#allocation16_spill] sm:$0xff] %v11195_v20  ;;  %12674 = vst [vmem:[#allocation18_spill] sm:$0xff] %v11200_v55 }
 0x493   :  { %3793 = vmatpush1.bf16.msra.mxu0 %v10728_v1  ;;  %3834 = vmatpush1.bf16.msra.mxu1 %v12662_v19  ;;  %v11209_v19 = vld [vmem:[%s12348_s5 + $0xa4] ss:$16 sps:$4 sm:$0xff]  }
 0x494   :  { %3794 = vmatprep.subr.bf16.mxu0 %v10740_v34  ;;  %3835 = vmatprep.subr.bf16.mxu1 %v10745_v30  ;;  %v10897_v34 = vld [vmem:[%s12347_s3] ss:$16 sps:$4 sm:$0xff]   ;;  %v10902_v30 = vld [vmem:[%s12347_s3 + $0x8] ss:$16 sps:$4 sm:$0xff]   ;;  %12675 = vst [vmem:[#allocation19_spill] sm:$0xff] %v11209_v19 }
 0x495   :  { %v9087_v21 = vpop.eup %9086 }
 0x496   :  { %v3344_v40 = vmul.f32 %v9087_v21, %v9085_v42  ;;  %v11214_v42 = vld [vmem:[%s12348_s5 + $0xac] ss:$16 sps:$4 sm:$0xff]   ;;  %v11219_v21 = vld [vmem:[%s12348_s5 + $0xa0] ss:$16 sps:$4 sm:$0xff]  }
 0x497   :  { %3795 = vmatpush1.bf16.msra.mxu0 %v10752_v57  ;;  %3836 = vmatpush1.bf16.msra.mxu1 %v10757_v16  ;;  %v10911_v57 = vld [vmem:[%s12347_s3 + $0x24] ss:$16 sps:$4 sm:$0xff]   ;;  %v10916_v16 = vld [vmem:[%s12347_s3 + $0x2c] ss:$16 sps:$4 sm:$0xff]   ;;  %12676 = vst [vmem:[#allocation20_spill] sm:$0xff] %v11214_v42  ;;  %12677 = vst [vmem:[#allocation21_spill] sm:$0xff] %v11219_v21 }
 0x498   :  { %v10904_v1 = vpack.c.bf16 %v3344_v40, %v3344_v40  ;;  %4081 = vmatprep.subr.bf16.mxu0 %v10885_v56  ;;  %4122 = vmatprep.subr.bf16.mxu1 %v10890_v37  ;;  %v11224_v40 = vld [vmem:[%s12348_s5 + $0xa8] ss:$16 sps:$4 sm:$0xff]  }
 0x499   :  { %12678 = vst [vmem:[#allocation22_spill] sm:$0xff] %v11224_v40 }
 0x49a   :  { %3813 = vmatmul.mubr.bf16.vlgmr.msra.gmra.mrb[44].mxu0 %v10904_v1  ;;  %3854 = vmatmul.mubr.bf16.vlgmr.msra.gmra.mrb[44].mxu1 %v10904_v1 }
 0x49b   :  { %4082 = vmatpush1.bf16.msra.mxu0 %v10897_v34  ;;  %4123 = vmatpush1.bf16.msra.mxu1 %v10902_v30 }
 0x49c   :  { %4083 = vmatprep.subr.bf16.mxu0 %v10911_v57  ;;  %4124 = vmatprep.subr.bf16.mxu1 %v10916_v16 }
 0x49d   :  { %4113 = vmatprep.mubr.bf16.mxu0 %v12548_v54  ;;  %4154 = vmatprep.mubr.bf16.mxu1 %v12548_v54 }
 0x49f   :  { %4084 = vmatpush1.bf16.msra.mxu0 %v10925_v50  ;;  %4125 = vmatpush1.bf16.msra.mxu1 %v10930_v41 }
 0x4a0   :  { %4085 = vmatprep.subr.bf16.mxu0 %v10937_v58  ;;  %4126 = vmatprep.subr.bf16.mxu1 %v10942_v59 }
 0x4a3   :  { %4086 = vmatpush1.bf16.msra.mxu0 %v10951_v61  ;;  %4127 = vmatpush1.bf16.msra.mxu1 %v10956_v63 }
 0x4a4   :  { %4087 = vmatprep.subr.bf16.mxu0 %v10963_v0  ;;  %4128 = vmatprep.subr.bf16.mxu1 %v10968_v52 }
 0x4a7   :  { %4088 = vmatpush1.bf16.msra.mxu0 %v10975_v2  ;;  %4129 = vmatpush1.bf16.msra.mxu1 %v10980_v46 }
 0x4a8   :  { %4089 = vmatprep.subr.bf16.mxu0 %v10987_v3  ;;  %4130 = vmatprep.subr.bf16.mxu1 %v10992_v4 }
 0x4ab   :  { %4090 = vmatpush1.bf16.msra.mxu0 %v10999_v5  ;;  %4131 = vmatpush1.bf16.msra.mxu1 %v11004_v6 }
 0x4ac   :  { %4091 = vmatprep.subr.bf16.mxu0 %v11011_v39  ;;  %4132 = vmatprep.subr.bf16.mxu1 %v11016_v43 }
 0x4af   :  { %4092 = vmatpush1.bf16.msra.mxu0 %v11023_v7  ;;  %4133 = vmatpush1.bf16.msra.mxu1 %v11028_v8 }
 0x4b0   :  { %4093 = vmatprep.subr.bf16.mxu0 %v11035_v22  ;;  %4134 = vmatprep.subr.bf16.mxu1 %v11040_v9 }
 0x4b3   :  { %4094 = vmatpush1.bf16.msra.mxu0 %v11047_v10  ;;  %4135 = vmatpush1.bf16.msra.mxu1 %v11052_v24 }
 0x4b4   :  { %4095 = vmatprep.subr.bf16.mxu0 %v11059_v25  ;;  %4136 = vmatprep.subr.bf16.mxu1 %v11064_v26 }
 0x4b7   :  { %4096 = vmatpush1.bf16.msra.mxu0 %v11071_v27  ;;  %4137 = vmatpush1.bf16.msra.mxu1 %v11076_v29 }
 0x4b8   :  { %4423 = vmatprep.subr.bf16.mxu0 %v11089_v33  ;;  %4464 = vmatprep.subr.bf16.mxu1 %v11094_v47 }
 0x4ba   :  { %4114 = vmatmul.mubr.bf16.vlgmr.msra.gmra.mrb[48].mxu0 %v10904_v1  ;;  %4155 = vmatmul.mubr.bf16.vlgmr.msra.gmra.mrb[48].mxu1 %v10904_v1  ;;  %v11233_v1 = vld [vmem:[%s12348_s5 + $0xc4] ss:$16 sps:$4 sm:$0xff]  }
 0x4bb   :  { %4455 = vmatprep.mubr.bf16.mxu0 %v12548_v54  ;;  %4496 = vmatprep.mubr.bf16.mxu1 %v12548_v54  ;;  %12679 = vst [vmem:[#allocation51_spill] sm:$0xff] %v11233_v1 }
 0x4bc   :  { %4424 = vmatpush1.bf16.msra.mxu0 %v11099_v28  ;;  %4465 = vmatpush1.bf16.msra.mxu1 %v11104_v62 }
 0x4bd   :  { %4425 = vmatprep.subr.bf16.mxu0 %v11113_v31  ;;  %4466 = vmatprep.subr.bf16.mxu1 %v11118_v44 }
 0x4c0   :  { %4426 = vmatpush1.bf16.msra.mxu0 %v11123_v15  ;;  %4467 = vmatpush1.bf16.msra.mxu1 %v11128_v38 }
 0x4c1   :  { %4427 = vmatprep.subr.bf16.mxu0 %v11137_v13  ;;  %4468 = vmatprep.subr.bf16.mxu1 %v11142_v11 }
 0x4c4   :  { %4428 = vmatpush1.bf16.msra.mxu0 %v11147_v60  ;;  %4469 = vmatpush1.bf16.msra.mxu1 %v11152_v45 }
 0x4c5   :  { %4429 = vmatprep.subr.bf16.mxu0 %v11161_v17  ;;  %4470 = vmatprep.subr.bf16.mxu1 %v11166_v51 }
 0x4c8   :  { %4430 = vmatpush1.bf16.msra.mxu0 %v11171_v18  ;;  %4471 = vmatpush1.bf16.msra.mxu1 %v11176_v48 }
 0x4c9   :  { %4431 = vmatprep.subr.bf16.mxu0 %v11185_v14  ;;  %4472 = vmatprep.subr.bf16.mxu1 %v11190_v32 }
 0x4cc   :  { %4432 = vmatpush1.bf16.msra.mxu0 %v11195_v20  ;;  %4473 = vmatpush1.bf16.msra.mxu1 %v11200_v55  ;;  %v11238_v55 = vld [vmem:[%s12348_s5 + $0xcc] ss:$16 sps:$4 sm:$0xff]  }
 0x4cd   :  { %4433 = vmatprep.subr.bf16.mxu0 %v11209_v19  ;;  %4474 = vmatprep.subr.bf16.mxu1 %v11214_v42  ;;  %12680 = vst [vmem:[#allocation52_spill] sm:$0xff] %v11238_v55  ;;  %v11243_v19 = vld [vmem:[%s12348_s5 + $0xc0] ss:$16 sps:$4 sm:$0xff]   ;;  %v11262_v42 = vld [vmem:[%s12348_s5 + $0xec] ss:$16 sps:$4 sm:$0xff]  }
 0x4ce   :  { %12681 = vst [vmem:[#allocation53_spill] sm:$0xff] %v11243_v19  ;;  %12684 = vst [vmem:[#allocation56_spill] sm:$0xff] %v11262_v42 }
 0x4d0   :  { %4434 = vmatpush1.bf16.msra.mxu0 %v11219_v21  ;;  %4475 = vmatpush1.bf16.msra.mxu1 %v11224_v40  ;;  %v11248_v21 = vld [vmem:[%s12348_s5 + $0xc8] ss:$16 sps:$4 sm:$0xff]   ;;  %v11257_v40 = vld [vmem:[%s12348_s5 + $0xe4] ss:$16 sps:$4 sm:$0xff]  }
 0x4d1   :  { %12682 = vst [vmem:[#allocation54_spill] sm:$0xff] %v11248_v21  ;;  %4435 = vmatprep.subr.bf16.mxu0 %v11233_v1  ;;  %4476 = vmatprep.subr.bf16.mxu1 %v11238_v55  ;;  %12683 = vst [vmem:[#allocation55_spill] sm:$0xff] %v11257_v40  ;;  %v11267_v1 = vld [vmem:[%s12348_s5 + $0xe0] ss:$16 sps:$4 sm:$0xff]   ;;  %v11286_v55 = vld [vmem:[%s12349_s4 + $0xc] ss:$16 sps:$4 sm:$0xff]  }
 0x4d2   :  { %12685 = vst [vmem:[#allocation57_spill] sm:$0xff] %v11267_v1  ;;  %12688 = vst [vmem:[#allocation60_spill] sm:$0xff] %v11286_v55 }
 0x4d4   :  { %4436 = vmatpush1.bf16.msra.mxu0 %v11243_v19  ;;  %4477 = vmatpush1.bf16.msra.mxu1 %v11248_v21  ;;  %v11272_v19 = vld [vmem:[%s12348_s5 + $0xe8] ss:$16 sps:$4 sm:$0xff]   ;;  %v11281_v21 = vld [vmem:[%s12349_s4 + $0x4] ss:$16 sps:$4 sm:$0xff]  }
 0x4d5   :  { %12686 = vst [vmem:[#allocation58_spill] sm:$0xff] %v11272_v19  ;;  %4437 = vmatprep.subr.bf16.mxu0 %v11257_v40  ;;  %4478 = vmatprep.subr.bf16.mxu1 %v11262_v42  ;;  %12687 = vst [vmem:[#allocation59_spill] sm:$0xff] %v11281_v21 }
 0x4d8   :  { %4438 = vmatpush1.bf16.msra.mxu0 %v11267_v1  ;;  %4479 = vmatpush1.bf16.msra.mxu1 %v11272_v19 }
 0x4d9   :  { %4665 = vmatprep.subr.bf16.mxu0 %v11281_v21  ;;  %4706 = vmatprep.subr.bf16.mxu1 %v11286_v55 }
 0x56d   :  { %v3814_v40 = vpop.f32.mrb[44].mxu0  ;;  %v3855_v42 = vpop.f32.mrb[44].mxu1 }
 0x56e   :  { %v8299_v1 = vadd.f32 %v3814_v40, %v12642_v53  ;;  %v3816_v20 = vpop.f32.mrb[45].mxu0  ;;  %v3857_v19 = vpop.f32.mrb[45].mxu1  ;;  %v8301_v55 = vadd.f32 %v3855_v42, %v12645_v36  ;;  %v12692_v36 = vld [vmem:[#allocation34_spill] sm:$0xff] }
 0x56f   :  { %v8300_v32 = vadd.f32 %v3816_v20, %v12643_v23  ;;  %v3818_v14 = vpop.f32.mrb[46].mxu0  ;;  %v3859_v48 = vpop.f32.mrb[46].mxu1  ;;  %v8302_v21 = vadd.f32 %v3857_v19, %v12644_v12 }
 0x570   :  { %v7871_v18 = vmul.f32 -1.442695, %v8299_v1  ;;  %v3819_v51 = vpop.f32.mrb[47].mxu0  ;;  %v3860_v17 = vpop.f32.mrb[47].mxu1 }
 0x571   :  { %v7872_v45 = vmul.f32 -1.442695, %v8300_v32  ;;  %v7873_v60 = vmul.f32 -1.442695, %v8302_v21  ;;  %v12689_v21 = vld [vmem:[#allocation31_spill] sm:$0xff] }
 0x572   :  { %9088 = vpow2.f32 %v7871_v18 }
 0x573   :  { %9090 = vpow2.f32 %v7872_v45 }
 0x574   :  { %9092 = vpow2.f32 %v7873_v60  ;;  %v12690_v60 = vld [vmem:[#allocation32_spill] sm:$0xff] }
 0x575   :  { %9094 = vtanh.f32 %v8301_v55 }
 0x57c   :  { %v9089_v11 = vpop.eup %9088 }
 0x57d   :  { %v9091_v13 = vpop.eup %9090  ;;  %v3865_v40 = vadd.f32 1.0, %v9089_v11 }
 0x57e   :  { %v3871_v53 = vadd.f32 1.0, %v9091_v13  ;;  %v9093_v48 = vpop.eup %9092 }
 0x57f   :  { %9096 = vrcp.f32 %v3865_v40  ;;  %v9095_v14 = vpop.eup %9094  ;;  %v3878_v18 = vadd.f32 1.0, %v9093_v48 }
 0x580   :  { %9098 = vrcp.f32 %v3871_v53  ;;  %v12691_v53 = vld [vmem:[#allocation33_spill] sm:$0xff] }
 0x581   :  { %9100 = vrcp.f32 %v3878_v18 }
 0x589   :  { %v9097_v51 = vpop.eup %9096 }
 0x58a   :  { %v9099_v17 = vpop.eup %9098  ;;  %v3882_v32 = vmul.f32 %v9097_v51, %v9095_v14 }
 0x58b   :  { %v3881_v45 = vmul.f32 %v9099_v17, %v10838_v35 }
 0x58d   :  { %v11295_v20 = vadd.f32 %v3882_v32, %v3881_v45  ;;  %v4115_v19 = vpop.f32.mrb[48].mxu0  ;;  %v4156_v42 = vpop.f32.mrb[48].mxu1 }
 0x58e   :  { %v4202_v11 = vadd.f32 %v4115_v19, %v12689_v21  ;;  %v4204_v55 = vadd.f32 %v4156_v42, %v12690_v60  ;;  %v4117_v13 = vpop.f32.mrb[49].mxu0  ;;  %v4158_v1 = vpop.f32.mrb[49].mxu1  ;;  %v11305_v42 = vld [vmem:[%s12349_s4] ss:$16 sps:$4 sm:$0xff]  }
 0x58f   :  { %v4203_v40 = vadd.f32 %v4117_v13, %v12691_v53  ;;  %v4205_v12 = vadd.f32 %v4158_v1, %v12692_v36  ;;  %v4119_v23 = vpop.f32.mrb[50].mxu0  ;;  %v4160_v14 = vpop.f32.mrb[50].mxu1  ;;  %9102 = vtanh.f32 %v11295_v20  ;;  %v11330_v53 = vld [vmem:[%s12349_s4 + $0x20] ss:$16 sps:$4 sm:$0xff]  }
 0x590   :  { %v7907_v35 = vmul.f32 -1.442695, %v4202_v11  ;;  %v4120_v48 = vpop.f32.mrb[51].mxu0  ;;  %v4161_v51 = vpop.f32.mrb[51].mxu1  ;;  %v11310_v23 = vld [vmem:[%s12349_s4 + $0x8] ss:$16 sps:$4 sm:$0xff]  }
 0x591   :  { %v7908_v17 = vmul.f32 -1.442695, %v4203_v40  ;;  %v9101_v32 = vpop.eup %9100  ;;  %v7909_v45 = vmul.f32 -1.442695, %v4205_v12  ;;  %v11315_v11 = vld [vmem:[%s12349_s4 + $0x24] ss:$16 sps:$4 sm:$0xff]  }
 0x592   :  { %9104 = vpow2.f32 %v7907_v35  ;;  %v11320_v12 = vld [vmem:[%s12349_s4 + $0x2c] ss:$16 sps:$4 sm:$0xff]   ;;  %v11342_v40 = vld [vmem:[%s12349_s4 + $0x44] ss:$16 sps:$4 sm:$0xff]   ;;  %v11356_v35 = vld [vmem:[%s12349_s4 + $0x40] ss:$16 sps:$4 sm:$0xff]  }
 0x593   :  { %9106 = vpow2.f32 %v7908_v17  ;;  %v11347_v14 = vld [vmem:[%s12349_s4 + $0x4c] ss:$16 sps:$4 sm:$0xff]   ;;  %12693 = vst [vmem:[#allocation27_spill] sm:$0xff] %v11356_v35  ;;  %v11361_v48 = vld [vmem:[%s12349_s4 + $0x48] ss:$16 sps:$4 sm:$0xff]  }
 0x594   :  { %9108 = vpow2.f32 %v7909_v45  ;;  %12694 = vst [vmem:[#allocation28_spill] sm:$0xff] %v11361_v48  ;;  %v11368_v51 = vld [vmem:[%s12349_s4 + $0x64] ss:$16 sps:$4 sm:$0xff]   ;;  %v11373_v17 = vld [vmem:[%s12349_s4 + $0x6c] ss:$16 sps:$4 sm:$0xff]  }
 0x595   :  { %9110 = vtanh.f32 %v4204_v55  ;;  %v11335_v55 = vld [vmem:[%s12349_s4 + $0x28] ss:$16 sps:$4 sm:$0xff]   ;;  %12695 = vst [vmem:[#allocation29_spill] sm:$0xff] %v11368_v51  ;;  %12696 = vst [vmem:[#allocation30_spill] sm:$0xff] %v11373_v17 }
 0x596   :  { %v11385_v45 = vld [vmem:[%s12349_s4 + $0x68] ss:$16 sps:$4 sm:$0xff]  }
 0x599   :  { %v9103_v18 = vpop.eup %9102 }
 0x59a   :  { %v3885_v19 = vmul.f32 %v9103_v18, %v9101_v32  ;;  %v11380_v18 = vld [vmem:[%s12349_s4 + $0x60] ss:$16 sps:$4 sm:$0xff]  }
 0x59c   :  { %v9105_v36 = vpop.eup %9104  ;;  %v3886_v21 = vpack.c.bf16 %v3885_v19, %v3885_v19 }
 0x59d   :  { %v9107_v60 = vpop.eup %9106  ;;  %v4209_v13 = vadd.f32 1.0, %v9105_v36  ;;  %v11392_v36 = vld [vmem:[%s12349_s4 + $0x84] ss:$16 sps:$4 sm:$0xff]  }
 0x59e   :  { %v4215_v1 = vadd.f32 1.0, %v9107_v60  ;;  %7874 = vst [vmem:[%s12352_s7 + $0xc] sm:$0xf] %v3886_v21  ;;  %4456 = vmatmul.mubr.bf16.vlgmr.msra.gmra.mrb[52].mxu0 %v3886_v21  ;;  %4497 = vmatmul.mubr.bf16.vlgmr.msra.gmra.mrb[52].mxu1 %v3886_v21  ;;  %v9109_v32 = vpop.eup %9108  ;;  %v11397_v21 = vld [vmem:[%s12349_s4 + $0x8c] ss:$16 sps:$4 sm:$0xff]  }
 0x59f   :  { %9112 = vrcp.f32 %v4209_v13  ;;  %4666 = vmatpush1.bf16.msra.mxu0 %v11305_v42  ;;  %4707 = vmatpush1.bf16.msra.mxu1 %v11310_v23  ;;  %v9111_v19 = vpop.eup %9110 }
 0x5a0   :  { %9114 = vrcp.f32 %v4215_v1  ;;  %4667 = vmatprep.subr.bf16.mxu0 %v11315_v11  ;;  %4708 = vmatprep.subr.bf16.mxu1 %v11320_v12 }
 0x5a1   :  { %4697 = vmatprep.mubr.bf16.mxu0 %v12548_v54  ;;  %4738 = vmatprep.mubr.bf16.mxu1 %v12548_v54 }
 0x5a3   :  { %4668 = vmatpush1.bf16.msra.mxu0 %v11330_v53  ;;  %4709 = vmatpush1.bf16.msra.mxu1 %v11335_v55 }
 0x5a4   :  { %4669 = vmatprep.subr.bf16.mxu0 %v11342_v40  ;;  %4710 = vmatprep.subr.bf16.mxu1 %v11347_v14 }
 0x5a7   :  { %4670 = vmatpush1.bf16.msra.mxu0 %v11356_v35  ;;  %4711 = vmatpush1.bf16.msra.mxu1 %v11361_v48  ;;  %v4222_v48 = vadd.f32 1.0, %v9109_v32  ;;  %v11422_v32 = vld [vmem:[%s12349_s4 + $0xac] ss:$16 sps:$4 sm:$0xff]  }
 0x5a8   :  { %4671 = vmatprep.subr.bf16.mxu0 %v11368_v51  ;;  %4712 = vmatprep.subr.bf16.mxu1 %v11373_v17  ;;  %v11405_v17 = vld [vmem:[%s12349_s4 + $0x80] ss:$16 sps:$4 sm:$0xff]   ;;  %v11410_v51 = vld [vmem:[%s12349_s4 + $0x88] ss:$16 sps:$4 sm:$0xff]   ;;  %12700 = vst [vmem:[#allocation26_spill] sm:$0xff] %v11422_v32 }
 0x5a9   :  { %v9113_v60 = vpop.eup %9112  ;;  %12697 = vst [vmem:[#allocation23_spill] sm:$0xff] %v11405_v17  ;;  %12698 = vst [vmem:[#allocation24_spill] sm:$0xff] %v11410_v51  ;;  %9116 = vrcp.f32 %v4222_v48  ;;  %v11449_v48 = vld [vmem:[%s12349_s4 + $0xcc] ss:$16 sps:$4 sm:$0xff]  }
 0x5aa   :  { %v9115_v13 = vpop.eup %9114  ;;  %v4226_v1 = vmul.f32 %v9113_v60, %v9111_v19  ;;  %v11431_v60 = vld [vmem:[%s12349_s4 + $0xa0] ss:$16 sps:$4 sm:$0xff]   ;;  %12704 = vst [vmem:[#allocation64_spill] sm:$0xff] %v11449_v48 }
 0x5ab   :  { %v4225_v35 = vmul.f32 %v9115_v13, %v10867_v49  ;;  %4672 = vmatpush1.bf16.msra.mxu0 %v11380_v18  ;;  %4713 = vmatpush1.bf16.msra.mxu1 %v11385_v45  ;;  %v11417_v49 = vld [vmem:[%s12349_s4 + $0xa4] ss:$16 sps:$4 sm:$0xff]   ;;  %12701 = vst [vmem:[#allocation61_spill] sm:$0xff] %v11431_v60  ;;  %v11436_v13 = vld [vmem:[%s12349_s4 + $0xa8] ss:$16 sps:$4 sm:$0xff]  }
 0x5ac   :  { %4673 = vmatprep.subr.bf16.mxu0 %v11392_v36  ;;  %4714 = vmatprep.subr.bf16.mxu1 %v11397_v21  ;;  %12699 = vst [vmem:[#allocation25_spill] sm:$0xff] %v11417_v49  ;;  %12702 = vst [vmem:[#allocation62_spill] sm:$0xff] %v11436_v13 }
 0x5ad   :  { %v11424_v19 = vadd.f32 %v4226_v1, %v4225_v35  ;;  %v11444_v35 = vld [vmem:[%s12349_s4 + $0xc4] ss:$16 sps:$4 sm:$0xff]   ;;  %v11456_v1 = vld [vmem:[%s12349_s4 + $0xc0] ss:$16 sps:$4 sm:$0xff]  }
 0x5ae   :  { %12703 = vst [vmem:[#allocation63_spill] sm:$0xff] %v11444_v35 }
 0x5af   :  { %4674 = vmatpush1.bf16.msra.mxu0 %v11405_v17  ;;  %4715 = vmatpush1.bf16.msra.mxu1 %v11410_v51  ;;  %9118 = vtanh.f32 %v11424_v19 }
 0x5b0   :  { %4675 = vmatprep.subr.bf16.mxu0 %v11417_v49  ;;  %4716 = vmatprep.subr.bf16.mxu1 %v11422_v32  ;;  %v11461_v32 = vld [vmem:[%s12349_s4 + $0xc8] ss:$16 sps:$4 sm:$0xff]  }
 0x5b1   :  { %12705 = vst [vmem:[#allocation65_spill] sm:$0xff] %v11461_v32 }
 0x5b3   :  { %4676 = vmatpush1.bf16.msra.mxu0 %v11431_v60  ;;  %4717 = vmatpush1.bf16.msra.mxu1 %v11436_v13  ;;  %v11468_v60 = vld [vmem:[%s12349_s4 + $0xe4] ss:$16 sps:$4 sm:$0xff]   ;;  %v11473_v13 = vld [vmem:[%s12349_s4 + $0xec] ss:$16 sps:$4 sm:$0xff]   ;;  %v9117_v49 = vpop.eup %9116 }
 0x5b4   :  { %4677 = vmatprep.subr.bf16.mxu0 %v11444_v35  ;;  %4718 = vmatprep.subr.bf16.mxu1 %v11449_v48  ;;  %v11480_v35 = vld [vmem:[%s12349_s4 + $0xe0] ss:$16 sps:$4 sm:$0xff]   ;;  %v11485_v48 = vld [vmem:[%s12349_s4 + $0xe8] ss:$16 sps:$4 sm:$0xff]  }
 0x5b7   :  { %4678 = vmatpush1.bf16.msra.mxu0 %v11456_v1  ;;  %4719 = vmatpush1.bf16.msra.mxu1 %v11461_v32 }
 0x5b8   :  { %4679 = vmatprep.subr.bf16.mxu0 %v11468_v60  ;;  %4720 = vmatprep.subr.bf16.mxu1 %v11473_v13 }
 0x5b9   :  { %v9119_v51 = vpop.eup %9118 }
 0x5ba   :  { %v4229_v17 = vmul.f32 %v9119_v51, %v9117_v49  ;;  %v12734_v51 = vld [vmem:[#allocation49_spill] sm:$0xff] }
 0x5bb   :  { %4680 = vmatpush1.bf16.msra.mxu0 %v11480_v35  ;;  %4721 = vmatpush1.bf16.msra.mxu1 %v11485_v48 }
 0x5bc   :  { %4966 = vmatprep.subr.bf16.mxu0 %v10885_v56  ;;  %5007 = vmatprep.subr.bf16.mxu1 %v10890_v37  ;;  %v4230_v32 = vpack.c.bf16 %v4229_v17, %v4229_v17  ;;  %v12706_v56 = vld [vmem:[#allocation7_spill] sm:$0xff]  ;;  %v12707_v37 = vld [vmem:[#allocation8_spill] sm:$0xff] }
 0x5be   :  { %4698 = vmatmul.mubr.bf16.vlgmr.msra.gmra.mrb[52].mxu0 %v4230_v32  ;;  %4739 = vmatmul.mubr.bf16.vlgmr.msra.gmra.mrb[52].mxu1 %v4230_v32 }
 0x5bf   :  { %4967 = vmatpush1.bf16.msra.mxu0 %v10897_v34  ;;  %5008 = vmatpush1.bf16.msra.mxu1 %v10902_v30  ;;  %v12708_v34 = vld [vmem:[#allocation9_spill] sm:$0xff]  ;;  %v12709_v30 = vld [vmem:[#allocation10_spill] sm:$0xff] }
 0x5c0   :  { %4968 = vmatprep.subr.bf16.mxu0 %v10911_v57  ;;  %5009 = vmatprep.subr.bf16.mxu1 %v10916_v16  ;;  %v12710_v57 = vld [vmem:[#allocation11_spill] sm:$0xff]  ;;  %v12711_v16 = vld [vmem:[#allocation13_spill] sm:$0xff] }
 0x5c1   :  { %4998 = vmatprep.mubr.bf16.mxu0 %v12548_v54  ;;  %5039 = vmatprep.mubr.bf16.mxu1 %v12548_v54 }
 0x5c3   :  { %4969 = vmatpush1.bf16.msra.mxu0 %v10925_v50  ;;  %5010 = vmatpush1.bf16.msra.mxu1 %v10930_v41  ;;  %v12712_v50 = vld [vmem:[#allocation12_spill] sm:$0xff]  ;;  %v12713_v41 = vld [vmem:[#allocation14_spill] sm:$0xff] }
 0x5c4   :  { %4970 = vmatprep.subr.bf16.mxu0 %v10937_v58  ;;  %5011 = vmatprep.subr.bf16.mxu1 %v10942_v59  ;;  %v12714_v58 = vld [vmem:[#allocation15_spill] sm:$0xff]  ;;  %v12715_v59 = vld [vmem:[#allocation17_spill] sm:$0xff] }
 0x5c7   :  { %4971 = vmatpush1.bf16.msra.mxu0 %v10951_v61  ;;  %5012 = vmatpush1.bf16.msra.mxu1 %v10956_v63  ;;  %v12716_v61 = vld [vmem:[#allocation16_spill] sm:$0xff]  ;;  %v12717_v63 = vld [vmem:[#allocation18_spill] sm:$0xff] }
 0x5c8   :  { %4972 = vmatprep.subr.bf16.mxu0 %v10963_v0  ;;  %5013 = vmatprep.subr.bf16.mxu1 %v10968_v52  ;;  %v12718_v0 = vld [vmem:[#allocation19_spill] sm:$0xff]  ;;  %v12719_v52 = vld [vmem:[#allocation20_spill] sm:$0xff] }
 0x5cb   :  { %4973 = vmatpush1.bf16.msra.mxu0 %v10975_v2  ;;  %5014 = vmatpush1.bf16.msra.mxu1 %v10980_v46  ;;  %v12720_v2 = vld [vmem:[#allocation21_spill] sm:$0xff]  ;;  %v12721_v46 = vld [vmem:[#allocation22_spill] sm:$0xff] }
 0x5cc   :  { %4974 = vmatprep.subr.bf16.mxu0 %v10987_v3  ;;  %5015 = vmatprep.subr.bf16.mxu1 %v10992_v4  ;;  %v12722_v3 = vld [vmem:[#allocation51_spill] sm:$0xff]  ;;  %v12723_v4 = vld [vmem:[#allocation52_spill] sm:$0xff] }
 0x5cf   :  { %4975 = vmatpush1.bf16.msra.mxu0 %v10999_v5  ;;  %5016 = vmatpush1.bf16.msra.mxu1 %v11004_v6  ;;  %v12724_v5 = vld [vmem:[#allocation53_spill] sm:$0xff]  ;;  %v12725_v6 = vld [vmem:[#allocation54_spill] sm:$0xff] }
 0x5d0   :  { %4976 = vmatprep.subr.bf16.mxu0 %v11011_v39  ;;  %5017 = vmatprep.subr.bf16.mxu1 %v11016_v43  ;;  %v12726_v39 = vld [vmem:[#allocation55_spill] sm:$0xff]  ;;  %v12727_v43 = vld [vmem:[#allocation56_spill] sm:$0xff] }
 0x5d3   :  { %4977 = vmatpush1.bf16.msra.mxu0 %v11023_v7  ;;  %5018 = vmatpush1.bf16.msra.mxu1 %v11028_v8  ;;  %v12728_v7 = vld [vmem:[#allocation57_spill] sm:$0xff]  ;;  %v12729_v8 = vld [vmem:[#allocation58_spill] sm:$0xff] }
 0x5d4   :  { %4978 = vmatprep.subr.bf16.mxu0 %v11035_v22  ;;  %5019 = vmatprep.subr.bf16.mxu1 %v11040_v9  ;;  %v12730_v22 = vld [vmem:[#allocation59_spill] sm:$0xff]  ;;  %v12731_v9 = vld [vmem:[#allocation60_spill] sm:$0xff] }
 0x5d7   :  { %4979 = vmatpush1.bf16.msra.mxu0 %v11047_v10  ;;  %5020 = vmatpush1.bf16.msra.mxu1 %v11052_v24 }
 0x5d8   :  { %4980 = vmatprep.subr.bf16.mxu0 %v11059_v25  ;;  %5021 = vmatprep.subr.bf16.mxu1 %v11064_v26  ;;  %v12732_v25 = vld [vmem:[#allocation47_spill] sm:$0xff] }
 0x5db   :  { %4981 = vmatpush1.bf16.msra.mxu0 %v11071_v27  ;;  %5022 = vmatpush1.bf16.msra.mxu1 %v11076_v29 }
 0x5dc   :  { %5308 = vmatprep.subr.bf16.mxu0 %v11089_v33  ;;  %5349 = vmatprep.subr.bf16.mxu1 %v11094_v47  ;;  %v12733_v33 = vld [vmem:[#allocation48_spill] sm:$0xff] }
 0x5de   :  { %4999 = vmatmul.mubr.bf16.vlgmr.msra.gmra.mrb[56].mxu0 %v4230_v32  ;;  %5040 = vmatmul.mubr.bf16.vlgmr.msra.gmra.mrb[56].mxu1 %v4230_v32  ;;  %v12735_v32 = vld [vmem:[#allocation50_spill] sm:$0xff] }
 0x5df   :  { %5309 = vmatpush1.bf16.msra.mxu0 %v11099_v28  ;;  %5350 = vmatpush1.bf16.msra.mxu1 %v11104_v62 }
 0x5e0   :  { %5310 = vmatprep.subr.bf16.mxu0 %v11113_v31  ;;  %5351 = vmatprep.subr.bf16.mxu1 %v11118_v44 }
 0x5e1   :  { %5340 = vmatprep.mubr.bf16.mxu0 %v12548_v54  ;;  %5381 = vmatprep.mubr.bf16.mxu1 %v12548_v54 }
 0x5e3   :  { %5311 = vmatpush1.bf16.msra.mxu0 %v11123_v15  ;;  %5352 = vmatpush1.bf16.msra.mxu1 %v11128_v38 }
 0x5e4   :  { %5312 = vmatprep.subr.bf16.mxu0 %v12706_v56  ;;  %5353 = vmatprep.subr.bf16.mxu1 %v12707_v37 }
 0x5e7   :  { %5313 = vmatpush1.bf16.msra.mxu0 %v12708_v34  ;;  %5354 = vmatpush1.bf16.msra.mxu1 %v12709_v30 }
 0x5e8   :  { %5314 = vmatprep.subr.bf16.mxu0 %v12710_v57  ;;  %5355 = vmatprep.subr.bf16.mxu1 %v12711_v16 }
 0x5eb   :  { %5315 = vmatpush1.bf16.msra.mxu0 %v12712_v50  ;;  %5356 = vmatpush1.bf16.msra.mxu1 %v12713_v41 }
 0x5ec   :  { %5316 = vmatprep.subr.bf16.mxu0 %v12714_v58  ;;  %5357 = vmatprep.subr.bf16.mxu1 %v12715_v59 }
 0x5ef   :  { %5317 = vmatpush1.bf16.msra.mxu0 %v12716_v61  ;;  %5358 = vmatpush1.bf16.msra.mxu1 %v12717_v63 }
 0x5f0   :  { %5318 = vmatprep.subr.bf16.mxu0 %v12718_v0  ;;  %5359 = vmatprep.subr.bf16.mxu1 %v12719_v52 }
 0x5f3   :  { %5319 = vmatpush1.bf16.msra.mxu0 %v12720_v2  ;;  %5360 = vmatpush1.bf16.msra.mxu1 %v12721_v46  ;;  %v12736_v46 = vld [vmem:[#allocation35_spill] sm:$0xff] }
 0x5f4   :  { %5320 = vmatprep.subr.bf16.mxu0 %v12722_v3  ;;  %5361 = vmatprep.subr.bf16.mxu1 %v12723_v4  ;;  %v12737_v4 = vld [vmem:[#allocation36_spill] sm:$0xff] }
 0x5f7   :  { %5321 = vmatpush1.bf16.msra.mxu0 %v12724_v5  ;;  %5362 = vmatpush1.bf16.msra.mxu1 %v12725_v6 }
 0x5f8   :  { %5322 = vmatprep.subr.bf16.mxu0 %v12726_v39  ;;  %5363 = vmatprep.subr.bf16.mxu1 %v12727_v43  ;;  %v12738_v43 = vld [vmem:[#allocation37_spill] sm:$0xff] }
 0x5fb   :  { %5323 = vmatpush1.bf16.msra.mxu0 %v12728_v7  ;;  %5364 = vmatpush1.bf16.msra.mxu1 %v12729_v8  ;;  %v12739_v8 = vld [vmem:[#allocation38_spill] sm:$0xff] }
 0x5fc   :  { %5550 = vmatprep.subr.bf16.mxu0 %v12730_v22  ;;  %5591 = vmatprep.subr.bf16.mxu1 %v12731_v9 }
 0x691   :  { %v4699_v10 = vpop.f32.mrb[52].mxu0  ;;  %v4740_v24 = vpop.f32.mrb[52].mxu1 }
 0x692   :  { %v8303_v26 = vadd.f32 %v4699_v10, %v12732_v25  ;;  %v4701_v27 = vpop.f32.mrb[53].mxu0  ;;  %v4742_v29 = vpop.f32.mrb[53].mxu1  ;;  %v8305_v56 = vadd.f32 %v4740_v24, %v12735_v32 }
 0x693   :  { %v8304_v47 = vadd.f32 %v4701_v27, %v12733_v33  ;;  %v4703_v28 = vpop.f32.mrb[54].mxu0  ;;  %v4744_v62 = vpop.f32.mrb[54].mxu1  ;;  %v8306_v17 = vadd.f32 %v4742_v29, %v12734_v51 }
 0x694   :  { %v7974_v31 = vmul.f32 -1.442695, %v8303_v26  ;;  %v4704_v44 = vpop.f32.mrb[55].mxu0  ;;  %v4745_v15 = vpop.f32.mrb[55].mxu1 }
 0x695   :  { %v7975_v38 = vmul.f32 -1.442695, %v8304_v47  ;;  %v7976_v49 = vmul.f32 -1.442695, %v8306_v17 }
 0x696   :  { %9120 = vpow2.f32 %v7974_v31 }
 0x697   :  { %9122 = vpow2.f32 %v7975_v38 }
 0x698   :  { %9124 = vpow2.f32 %v7976_v49  ;;  %v12740_v49 = vld [vmem:[#allocation27_spill] sm:$0xff] }
 0x699   :  { %9126 = vtanh.f32 %v8305_v56  ;;  %v12742_v56 = vld [vmem:[#allocation29_spill] sm:$0xff] }
 0x6a0   :  { %v9121_v37 = vpop.eup %9120 }
 0x6a1   :  { %v9123_v34 = vpop.eup %9122  ;;  %v4750_v30 = vadd.f32 1.0, %v9121_v37 }
 0x6a2   :  { %v4756_v57 = vadd.f32 1.0, %v9123_v34  ;;  %v9125_v16 = vpop.eup %9124 }
 0x6a3   :  { %9128 = vrcp.f32 %v4750_v30  ;;  %v9127_v50 = vpop.eup %9126  ;;  %v4763_v61 = vadd.f32 1.0, %v9125_v16  ;;  %v12746_v16 = vld [vmem:[#allocation25_spill] sm:$0xff] }
 0x6a4   :  { %9130 = vrcp.f32 %v4756_v57  ;;  %v12745_v57 = vld [vmem:[#allocation24_spill] sm:$0xff] }
 0x6a5   :  { %9132 = vrcp.f32 %v4763_v61 }
 0x6ad   :  { %v9129_v41 = vpop.eup %9128 }
 0x6ae   :  { %v9131_v58 = vpop.eup %9130  ;;  %v4767_v59 = vmul.f32 %v9129_v41, %v9127_v50  ;;  %v12752_v50 = vld [vmem:[#allocation65_spill] sm:$0xff] }
 0x6af   :  { %v4766_v63 = vmul.f32 %v9131_v58, %v11295_v20  ;;  %v9133_v29 = vpop.eup %9132  ;;  %v11613_v58 = vld [vmem:[%s12347_s3 + $0x4] ss:$16 sps:$4 sm:$0xff]  }
 0x6b1   :  { %v11566_v0 = vadd.f32 %v4767_v59, %v4766_v63  ;;  %v5000_v52 = vpop.f32.mrb[56].mxu0  ;;  %v5041_v2 = vpop.f32.mrb[56].mxu1  ;;  %v11618_v59 = vld [vmem:[%s12347_s3 + $0xc] ss:$16 sps:$4 sm:$0xff]  }
 0x6b2   :  { %v5087_v3 = vadd.f32 %v5000_v52, %v12736_v46  ;;  %v5089_v5 = vadd.f32 %v5041_v2, %v12737_v4  ;;  %v5002_v6 = vpop.f32.mrb[57].mxu0  ;;  %v5043_v39 = vpop.f32.mrb[57].mxu1  ;;  %v11653_v52 = vld [vmem:[%s12347_s3 + $0x20] ss:$16 sps:$4 sm:$0xff]   ;;  %v11658_v2 = vld [vmem:[%s12347_s3 + $0x28] ss:$16 sps:$4 sm:$0xff]  }
 0x6b3   :  { %v5088_v7 = vadd.f32 %v5002_v6, %v12738_v43  ;;  %v5090_v22 = vadd.f32 %v5043_v39, %v12739_v8  ;;  %v5004_v9 = vpop.f32.mrb[58].mxu0  ;;  %v5045_v10 = vpop.f32.mrb[58].mxu1  ;;  %9134 = vtanh.f32 %v11566_v0  ;;  %v11665_v46 = vld [vmem:[%s12347_s3 + $0x44] ss:$16 sps:$4 sm:$0xff]   ;;  %v11679_v4 = vld [vmem:[%s12347_s3 + $0x40] ss:$16 sps:$4 sm:$0xff]  }
 0x6b4   :  { %v8010_v20 = vmul.f32 -1.442695, %v5087_v3  ;;  %v5005_v24 = vpop.f32.mrb[59].mxu0  ;;  %v5046_v26 = vpop.f32.mrb[59].mxu1  ;;  %v11670_v3 = vld [vmem:[%s12347_s3 + $0x4c] ss:$16 sps:$4 sm:$0xff]  }
 0x6b5   :  { %v8011_v27 = vmul.f32 -1.442695, %v5088_v7  ;;  %v8012_v28 = vmul.f32 -1.442695, %v5090_v22  ;;  %v11691_v6 = vld [vmem:[%s12347_s3 + $0x64] ss:$16 sps:$4 sm:$0xff]  }
 0x6b6   :  { %9136 = vpow2.f32 %v8010_v20  ;;  %v11696_v39 = vld [vmem:[%s12347_s3 + $0x6c] ss:$16 sps:$4 sm:$0xff]   ;;  %v11703_v43 = vld [vmem:[%s12347_s3 + $0x60] ss:$16 sps:$4 sm:$0xff]   ;;  %v11708_v7 = vld [vmem:[%s12347_s3 + $0x68] ss:$16 sps:$4 sm:$0xff]  }
 0x6b7   :  { %9138 = vpow2.f32 %v8011_v27  ;;  %v11715_v8 = vld [vmem:[%s12347_s3 + $0x84] ss:$16 sps:$4 sm:$0xff]   ;;  %v11720_v22 = vld [vmem:[%s12347_s3 + $0x8c] ss:$16 sps:$4 sm:$0xff]   ;;  %v11727_v9 = vld [vmem:[%s12347_s3 + $0x80] ss:$16 sps:$4 sm:$0xff]  }
 0x6b8   :  { %9140 = vpow2.f32 %v8012_v28  ;;  %v11732_v10 = vld [vmem:[%s12347_s3 + $0x88] ss:$16 sps:$4 sm:$0xff]   ;;  %v11739_v20 = vld [vmem:[%s12347_s3 + $0xa4] ss:$16 sps:$4 sm:$0xff]   ;;  %v11744_v24 = vld [vmem:[%s12347_s3 + $0xac] ss:$16 sps:$4 sm:$0xff]  }
 0x6b9   :  { %9142 = vtanh.f32 %v5089_v5  ;;  %v11684_v5 = vld [vmem:[%s12347_s3 + $0x48] ss:$16 sps:$4 sm:$0xff]   ;;  %v11751_v26 = vld [vmem:[%s12347_s3 + $0xa0] ss:$16 sps:$4 sm:$0xff]  }
 0x6ba   :  { %v11756_v27 = vld [vmem:[%s12347_s3 + $0xa8] ss:$16 sps:$4 sm:$0xff]   ;;  %v11775_v28 = vld [vmem:[%s12347_s3 + $0xc0] ss:$16 sps:$4 sm:$0xff]  }
 0x6bd   :  { %v9135_v47 = vpop.eup %9134 }
 0x6be   :  { %v4770_v62 = vmul.f32 %v9135_v47, %v9133_v29  ;;  %v11763_v29 = vld [vmem:[%s12347_s3 + $0xc4] ss:$16 sps:$4 sm:$0xff]   ;;  %v11768_v47 = vld [vmem:[%s12347_s3 + $0xcc] ss:$16 sps:$4 sm:$0xff]  }
 0x6c0   :  { %v9137_v31 = vpop.eup %9136  ;;  %v4771_v44 = vpack.c.bf16 %v4770_v62, %v4770_v62  ;;  %v11780_v62 = vld [vmem:[%s12347_s3 + $0xc8] ss:$16 sps:$4 sm:$0xff]  }
 0x6c1   :  { %v9139_v15 = vpop.eup %9138  ;;  %v5094_v38 = vadd.f32 1.0, %v9137_v31  ;;  %v11787_v31 = vld [vmem:[%s12347_s3 + $0xe4] ss:$16 sps:$4 sm:$0xff]  }
 0x6c2   :  { %v5100_v17 = vadd.f32 1.0, %v9139_v15  ;;  %7977 = vst [vmem:[%s12352_s7 + $0x10] sm:$0xf] %v4771_v44  ;;  %5341 = vmatmul.mubr.bf16.vlgmr.msra.gmra.mrb[60].mxu0 %v4771_v44  ;;  %5382 = vmatmul.mubr.bf16.vlgmr.msra.gmra.mrb[60].mxu1 %v4771_v44  ;;  %v11792_v44 = vld [vmem:[%s12347_s3 + $0xec] ss:$16 sps:$4 sm:$0xff]  }
 0x6c3   :  { %9144 = vrcp.f32 %v5094_v38  ;;  %5551 = vmatpush1.bf16.msra.mxu0 %v11305_v42  ;;  %5592 = vmatpush1.bf16.msra.mxu1 %v11310_v23  ;;  %v9141_v42 = vpop.eup %9140  ;;  %v12741_v23 = vld [vmem:[#allocation28_spill] sm:$0xff]  ;;  %v11804_v38 = vld [vmem:[%s12347_s3 + $0xe8] ss:$16 sps:$4 sm:$0xff]  }
 0x6c4   :  { %9146 = vrcp.f32 %v5100_v17  ;;  %5552 = vmatprep.subr.bf16.mxu0 %v11315_v11  ;;  %5593 = vmatprep.subr.bf16.mxu1 %v11320_v12  ;;  %v9143_v11 = vpop.eup %9142  ;;  %v12743_v12 = vld [vmem:[#allocation30_spill] sm:$0xff] }
 0x6c5   :  { %5582 = vmatprep.mubr.bf16.mxu0 %v12548_v54  ;;  %5623 = vmatprep.mubr.bf16.mxu1 %v12548_v54  ;;  %v11799_v15 = vld [vmem:[%s12347_s3 + $0xe0] ss:$16 sps:$4 sm:$0xff]   ;;  %v11817_v17 = vld [vmem:[%s12348_s5 + $0x4] ss:$16 sps:$4 sm:$0xff]  }
 0x6c7   :  { %5553 = vmatpush1.bf16.msra.mxu0 %v11330_v53  ;;  %5594 = vmatpush1.bf16.msra.mxu1 %v11335_v55  ;;  %v5107_v53 = vadd.f32 1.0, %v9141_v42  ;;  %v11822_v42 = vld [vmem:[%s12348_s5 + $0xc] ss:$16 sps:$4 sm:$0xff]  }
 0x6c8   :  { %5554 = vmatprep.subr.bf16.mxu0 %v11342_v40  ;;  %5595 = vmatprep.subr.bf16.mxu1 %v11347_v14  ;;  %v12744_v14 = vld [vmem:[#allocation23_spill] sm:$0xff] }
 0x6c9   :  { %9148 = vrcp.f32 %v5107_v53  ;;  %v11875_v53 = vld [vmem:[%s12348_s5 + $0x40] ss:$16 sps:$4 sm:$0xff]  }
 0x6ca   :  { %12755 = vst [vmem:[#allocation68_spill] sm:$0xff] %v11875_v53 }
 0x6cb   :  { %5555 = vmatpush1.bf16.msra.mxu0 %v12740_v49  ;;  %5596 = vmatpush1.bf16.msra.mxu1 %v12741_v23  ;;  %v11827_v49 = vld [vmem:[%s12348_s5] ss:$16 sps:$4 sm:$0xff]   ;;  %v11832_v23 = vld [vmem:[%s12348_s5 + $0x8] ss:$16 sps:$4 sm:$0xff]  }
 0x6cc   :  { %5556 = vmatprep.subr.bf16.mxu0 %v12742_v56  ;;  %5597 = vmatprep.subr.bf16.mxu1 %v12743_v12  ;;  %v11846_v56 = vld [vmem:[%s12348_s5 + $0x2c] ss:$16 sps:$4 sm:$0xff]   ;;  %v11851_v12 = vld [vmem:[%s12348_s5 + $0x20] ss:$16 sps:$4 sm:$0xff]  }
 0x6cd   :  { %v9145_v37 = vpop.eup %9144 }
 0x6ce   :  { %v9147_v34 = vpop.eup %9146  ;;  %v5111_v30 = vmul.f32 %v9145_v37, %v9143_v11  ;;  %v11841_v11 = vld [vmem:[%s12348_s5 + $0x24] ss:$16 sps:$4 sm:$0xff]   ;;  %v11856_v37 = vld [vmem:[%s12348_s5 + $0x28] ss:$16 sps:$4 sm:$0xff]  }
 0x6cf   :  { %v5110_v55 = vmul.f32 %v9147_v34, %v11424_v19  ;;  %5557 = vmatpush1.bf16.msra.mxu0 %v11380_v18  ;;  %5598 = vmatpush1.bf16.msra.mxu1 %v11385_v45  ;;  %v12747_v19 = vld [vmem:[#allocation26_spill] sm:$0xff]  ;;  %v12748_v18 = vld [vmem:[#allocation61_spill] sm:$0xff] }
 0x6d0   :  { %5558 = vmatprep.subr.bf16.mxu0 %v11392_v36  ;;  %5599 = vmatprep.subr.bf16.mxu1 %v11397_v21  ;;  %v12749_v45 = vld [vmem:[#allocation62_spill] sm:$0xff]  ;;  %v12750_v36 = vld [vmem:[#allocation63_spill] sm:$0xff]  ;;  %v12751_v21 = vld [vmem:[#allocation64_spill] sm:$0xff] }
 0x6d1   :  { %v11595_v40 = vadd.f32 %v5111_v30, %v5110_v55  ;;  %v11865_v34 = vld [vmem:[%s12348_s5 + $0x44] ss:$16 sps:$4 sm:$0xff]   ;;  %v11870_v30 = vld [vmem:[%s12348_s5 + $0x4c] ss:$16 sps:$4 sm:$0xff]   ;;  %v11880_v55 = vld [vmem:[%s12348_s5 + $0x48] ss:$16 sps:$4 sm:$0xff]  }
 0x6d2   :  { %12753 = vst [vmem:[#allocation66_spill] sm:$0xff] %v11865_v34  ;;  %12754 = vst [vmem:[#allocation67_spill] sm:$0xff] %v11870_v30 }
 0x6d3   :  { %5559 = vmatpush1.bf16.msra.mxu0 %v12744_v14  ;;  %5600 = vmatpush1.bf16.msra.mxu1 %v12745_v57  ;;  %9150 = vtanh.f32 %v11595_v40  ;;  %v9149_v41 = vpop.eup %9148  ;;  %12756 = vst [vmem:[#allocation69_spill] sm:$0xff] %v11880_v55  ;;  %v11889_v14 = vld [vmem:[%s12348_s5 + $0x64] ss:$16 sps:$4 sm:$0xff]   ;;  %v11894_v57 = vld [vmem:[%s12348_s5 + $0x6c] ss:$16 sps:$4 sm:$0xff]  }
 0x6d4   :  { %5560 = vmatprep.subr.bf16.mxu0 %v12746_v16  ;;  %5601 = vmatprep.subr.bf16.mxu1 %v12747_v19  ;;  %12757 = vst [vmem:[#allocation31_spill] sm:$0xff] %v11889_v14  ;;  %12758 = vst [vmem:[#allocation32_spill] sm:$0xff] %v11894_v57  ;;  %v11899_v16 = vld [vmem:[%s12348_s5 + $0x60] ss:$16 sps:$4 sm:$0xff]   ;;  %v11904_v19 = vld [vmem:[%s12348_s5 + $0x68] ss:$16 sps:$4 sm:$0xff]  }
 0x6d5   :  { %12759 = vst [vmem:[#allocation33_spill] sm:$0xff] %v11899_v16  ;;  %12760 = vst [vmem:[#allocation34_spill] sm:$0xff] %v11904_v19 }
 0x6d7   :  { %5561 = vmatpush1.bf16.msra.mxu0 %v12748_v18  ;;  %5602 = vmatpush1.bf16.msra.mxu1 %v12749_v45  ;;  %v11913_v18 = vld [vmem:[%s12348_s5 + $0x84] ss:$16 sps:$4 sm:$0xff]   ;;  %v11918_v45 = vld [vmem:[%s12348_s5 + $0x8c] ss:$16 sps:$4 sm:$0xff]  }
 0x6d8   :  { %5562 = vmatprep.subr.bf16.mxu0 %v12750_v36  ;;  %5603 = vmatprep.subr.bf16.mxu1 %v12751_v21  ;;  %12761 = vst [vmem:[#allocation7_spill] sm:$0xff] %v11913_v18  ;;  %12762 = vst [vmem:[#allocation8_spill] sm:$0xff] %v11918_v45  ;;  %v11923_v36 = vld [vmem:[%s12348_s5 + $0x80] ss:$16 sps:$4 sm:$0xff]   ;;  %v11928_v21 = vld [vmem:[%s12348_s5 + $0x88] ss:$16 sps:$4 sm:$0xff]  }
 0x6d9   :  { %12763 = vst [vmem:[#allocation9_spill] sm:$0xff] %v11923_v36  ;;  %12764 = vst [vmem:[#allocation10_spill] sm:$0xff] %v11928_v21 }
 0x6db   :  { %5563 = vmatpush1.bf16.msra.mxu0 %v11456_v1  ;;  %5604 = vmatpush1.bf16.msra.mxu1 %v12752_v50  ;;  %v11937_v50 = vld [vmem:[%s12348_s5 + $0xa4] ss:$16 sps:$4 sm:$0xff]  }
 0x6dc   :  { %5564 = vmatprep.subr.bf16.mxu0 %v11468_v60  ;;  %5605 = vmatprep.subr.bf16.mxu1 %v11473_v13  ;;  %v11625_v60 = vld [vmem:[%s12347_s3] ss:$16 sps:$4 sm:$0xff]   ;;  %v11630_v13 = vld [vmem:[%s12347_s3 + $0x8] ss:$16 sps:$4 sm:$0xff]   ;;  %12765 = vst [vmem:[#allocation11_spill] sm:$0xff] %v11937_v50 }
 0x6dd   :  { %v9151_v61 = vpop.eup %9150 }
 0x6de   :  { %v5114_v63 = vmul.f32 %v9151_v61, %v9149_v41  ;;  %v11942_v41 = vld [vmem:[%s12348_s5 + $0xac] ss:$16 sps:$4 sm:$0xff]   ;;  %v11947_v61 = vld [vmem:[%s12348_s5 + $0xa0] ss:$16 sps:$4 sm:$0xff]  }
 0x6df   :  { %5565 = vmatpush1.bf16.msra.mxu0 %v11480_v35  ;;  %5606 = vmatpush1.bf16.msra.mxu1 %v11485_v48  ;;  %v11639_v35 = vld [vmem:[%s12347_s3 + $0x24] ss:$16 sps:$4 sm:$0xff]   ;;  %v11644_v48 = vld [vmem:[%s12347_s3 + $0x2c] ss:$16 sps:$4 sm:$0xff]   ;;  %12766 = vst [vmem:[#allocation13_spill] sm:$0xff] %v11942_v41  ;;  %12767 = vst [vmem:[#allocation12_spill] sm:$0xff] %v11947_v61 }
 0x6e0   :  { %v11632_v1 = vpack.c.bf16 %v5114_v63, %v5114_v63  ;;  %5851 = vmatprep.subr.bf16.mxu0 %v11613_v58  ;;  %5892 = vmatprep.subr.bf16.mxu1 %v11618_v59  ;;  %v11952_v63 = vld [vmem:[%s12348_s5 + $0xa8] ss:$16 sps:$4 sm:$0xff]  }
 0x6e1   :  { %12768 = vst [vmem:[#allocation14_spill] sm:$0xff] %v11952_v63 }
 0x6e2   :  { %5583 = vmatmul.mubr.bf16.vlgmr.msra.gmra.mrb[60].mxu0 %v11632_v1  ;;  %5624 = vmatmul.mubr.bf16.vlgmr.msra.gmra.mrb[60].mxu1 %v11632_v1 }
 0x6e3   :  { %5852 = vmatpush1.bf16.msra.mxu0 %v11625_v60  ;;  %5893 = vmatpush1.bf16.msra.mxu1 %v11630_v13 }
 0x6e4   :  { %5853 = vmatprep.subr.bf16.mxu0 %v11639_v35  ;;  %5894 = vmatprep.subr.bf16.mxu1 %v11644_v48 }
 0x6e5   :  { %5883 = vmatprep.mubr.bf16.mxu0 %v12548_v54  ;;  %5924 = vmatprep.mubr.bf16.mxu1 %v12548_v54 }
 0x6e7   :  { %5854 = vmatpush1.bf16.msra.mxu0 %v11653_v52  ;;  %5895 = vmatpush1.bf16.msra.mxu1 %v11658_v2 }
 0x6e8   :  { %5855 = vmatprep.subr.bf16.mxu0 %v11665_v46  ;;  %5896 = vmatprep.subr.bf16.mxu1 %v11670_v3 }
 0x6eb   :  { %5856 = vmatpush1.bf16.msra.mxu0 %v11679_v4  ;;  %5897 = vmatpush1.bf16.msra.mxu1 %v11684_v5 }
 0x6ec   :  { %5857 = vmatprep.subr.bf16.mxu0 %v11691_v6  ;;  %5898 = vmatprep.subr.bf16.mxu1 %v11696_v39 }
 0x6ef   :  { %5858 = vmatpush1.bf16.msra.mxu0 %v11703_v43  ;;  %5899 = vmatpush1.bf16.msra.mxu1 %v11708_v7 }
 0x6f0   :  { %5859 = vmatprep.subr.bf16.mxu0 %v11715_v8  ;;  %5900 = vmatprep.subr.bf16.mxu1 %v11720_v22 }
 0x6f3   :  { %5860 = vmatpush1.bf16.msra.mxu0 %v11727_v9  ;;  %5901 = vmatpush1.bf16.msra.mxu1 %v11732_v10 }
 0x6f4   :  { %5861 = vmatprep.subr.bf16.mxu0 %v11739_v20  ;;  %5902 = vmatprep.subr.bf16.mxu1 %v11744_v24 }
 0x6f7   :  { %5862 = vmatpush1.bf16.msra.mxu0 %v11751_v26  ;;  %5903 = vmatpush1.bf16.msra.mxu1 %v11756_v27 }
 0x6f8   :  { %5863 = vmatprep.subr.bf16.mxu0 %v11763_v29  ;;  %5904 = vmatprep.subr.bf16.mxu1 %v11768_v47 }
 0x6fb   :  { %5864 = vmatpush1.bf16.msra.mxu0 %v11775_v28  ;;  %5905 = vmatpush1.bf16.msra.mxu1 %v11780_v62 }
 0x6fc   :  { %5865 = vmatprep.subr.bf16.mxu0 %v11787_v31  ;;  %5906 = vmatprep.subr.bf16.mxu1 %v11792_v44 }
 0x6ff   :  { %5866 = vmatpush1.bf16.msra.mxu0 %v11799_v15  ;;  %5907 = vmatpush1.bf16.msra.mxu1 %v11804_v38 }
 0x700   :  { %6193 = vmatprep.subr.bf16.mxu0 %v11817_v17  ;;  %6234 = vmatprep.subr.bf16.mxu1 %v11822_v42 }
 0x702   :  { %5884 = vmatmul.mubr.bf16.vlgmr.msra.gmra.mrb[64].mxu0 %v11632_v1  ;;  %5925 = vmatmul.mubr.bf16.vlgmr.msra.gmra.mrb[64].mxu1 %v11632_v1  ;;  %v11961_v1 = vld [vmem:[%s12348_s5 + $0xc4] ss:$16 sps:$4 sm:$0xff]  }
 0x703   :  { %6225 = vmatprep.mubr.bf16.mxu0 %v12548_v54  ;;  %6266 = vmatprep.mubr.bf16.mxu1 %v12548_v54  ;;  %12769 = vst [vmem:[#allocation15_spill] sm:$0xff] %v11961_v1 }
 0x704   :  { %6194 = vmatpush1.bf16.msra.mxu0 %v11827_v49  ;;  %6235 = vmatpush1.bf16.msra.mxu1 %v11832_v23 }
 0x705   :  { %6195 = vmatprep.subr.bf16.mxu0 %v11841_v11  ;;  %6236 = vmatprep.subr.bf16.mxu1 %v11846_v56 }
 0x708   :  { %6196 = vmatpush1.bf16.msra.mxu0 %v11851_v12  ;;  %6237 = vmatpush1.bf16.msra.mxu1 %v11856_v37 }
 0x709   :  { %6197 = vmatprep.subr.bf16.mxu0 %v11865_v34  ;;  %6238 = vmatprep.subr.bf16.mxu1 %v11870_v30 }
 0x70c   :  { %6198 = vmatpush1.bf16.msra.mxu0 %v11875_v53  ;;  %6239 = vmatpush1.bf16.msra.mxu1 %v11880_v55 }
 0x70d   :  { %6199 = vmatprep.subr.bf16.mxu0 %v11889_v14  ;;  %6240 = vmatprep.subr.bf16.mxu1 %v11894_v57 }
 0x710   :  { %6200 = vmatpush1.bf16.msra.mxu0 %v11899_v16  ;;  %6241 = vmatpush1.bf16.msra.mxu1 %v11904_v19 }
 0x711   :  { %6201 = vmatprep.subr.bf16.mxu0 %v11913_v18  ;;  %6242 = vmatprep.subr.bf16.mxu1 %v11918_v45 }
 0x714   :  { %6202 = vmatpush1.bf16.msra.mxu0 %v11923_v36  ;;  %6243 = vmatpush1.bf16.msra.mxu1 %v11928_v21  ;;  %v11966_v21 = vld [vmem:[%s12348_s5 + $0xcc] ss:$16 sps:$4 sm:$0xff]  }
 0x715   :  { %6203 = vmatprep.subr.bf16.mxu0 %v11937_v50  ;;  %6244 = vmatprep.subr.bf16.mxu1 %v11942_v41  ;;  %12770 = vst [vmem:[#allocation17_spill] sm:$0xff] %v11966_v21  ;;  %v11971_v50 = vld [vmem:[%s12348_s5 + $0xc0] ss:$16 sps:$4 sm:$0xff]   ;;  %v11990_v41 = vld [vmem:[%s12348_s5 + $0xec] ss:$16 sps:$4 sm:$0xff]  }
 0x716   :  { %12771 = vst [vmem:[#allocation16_spill] sm:$0xff] %v11971_v50  ;;  %12774 = vst [vmem:[#allocation20_spill] sm:$0xff] %v11990_v41 }
 0x718   :  { %6204 = vmatpush1.bf16.msra.mxu0 %v11947_v61  ;;  %6245 = vmatpush1.bf16.msra.mxu1 %v11952_v63  ;;  %v11976_v61 = vld [vmem:[%s12348_s5 + $0xc8] ss:$16 sps:$4 sm:$0xff]   ;;  %v11985_v63 = vld [vmem:[%s12348_s5 + $0xe4] ss:$16 sps:$4 sm:$0xff]  }
 0x719   :  { %12772 = vst [vmem:[#allocation18_spill] sm:$0xff] %v11976_v61  ;;  %6205 = vmatprep.subr.bf16.mxu0 %v11961_v1  ;;  %6246 = vmatprep.subr.bf16.mxu1 %v11966_v21  ;;  %12773 = vst [vmem:[#allocation19_spill] sm:$0xff] %v11985_v63  ;;  %v11995_v1 = vld [vmem:[%s12348_s5 + $0xe0] ss:$16 sps:$4 sm:$0xff]   ;;  %v12014_v21 = vld [vmem:[%s12349_s4 + $0xc] ss:$16 sps:$4 sm:$0xff]  }
 0x71a   :  { %12775 = vst [vmem:[#allocation21_spill] sm:$0xff] %v11995_v1  ;;  %12778 = vst [vmem:[#allocation52_spill] sm:$0xff] %v12014_v21 }
 0x71c   :  { %6206 = vmatpush1.bf16.msra.mxu0 %v11971_v50  ;;  %6247 = vmatpush1.bf16.msra.mxu1 %v11976_v61  ;;  %v12000_v50 = vld [vmem:[%s12348_s5 + $0xe8] ss:$16 sps:$4 sm:$0xff]   ;;  %v12009_v61 = vld [vmem:[%s12349_s4 + $0x4] ss:$16 sps:$4 sm:$0xff]  }
 0x71d   :  { %12776 = vst [vmem:[#allocation22_spill] sm:$0xff] %v12000_v50  ;;  %6207 = vmatprep.subr.bf16.mxu0 %v11985_v63  ;;  %6248 = vmatprep.subr.bf16.mxu1 %v11990_v41  ;;  %12777 = vst [vmem:[#allocation51_spill] sm:$0xff] %v12009_v61 }
 0x720   :  { %6208 = vmatpush1.bf16.msra.mxu0 %v11995_v1  ;;  %6249 = vmatpush1.bf16.msra.mxu1 %v12000_v50 }
 0x721   :  { %6435 = vmatprep.subr.bf16.mxu0 %v12009_v61  ;;  %6476 = vmatprep.subr.bf16.mxu1 %v12014_v21 }
 0x7b5   :  { %v5584_v63 = vpop.f32.mrb[60].mxu0  ;;  %v5625_v41 = vpop.f32.mrb[60].mxu1 }
 0x7b6   :  { %v8307_v1 = vadd.f32 %v5584_v63, %v12732_v25  ;;  %v5586_v36 = vpop.f32.mrb[61].mxu0  ;;  %v5627_v50 = vpop.f32.mrb[61].mxu1  ;;  %v8309_v21 = vadd.f32 %v5625_v41, %v12735_v32  ;;  %v12782_v32 = vld [vmem:[#allocation42_spill] sm:$0xff] }
 0x7b7   :  { %v8308_v45 = vadd.f32 %v5586_v36, %v12733_v33  ;;  %v5588_v18 = vpop.f32.mrb[62].mxu0  ;;  %v5629_v19 = vpop.f32.mrb[62].mxu1  ;;  %v8310_v61 = vadd.f32 %v5627_v50, %v12734_v51 }
 0x7b8   :  { %v8077_v16 = vmul.f32 -1.442695, %v8307_v1  ;;  %v5589_v57 = vpop.f32.mrb[63].mxu0  ;;  %v5630_v14 = vpop.f32.mrb[63].mxu1 }
 0x7b9   :  { %v8078_v55 = vmul.f32 -1.442695, %v8308_v45  ;;  %v8079_v53 = vmul.f32 -1.442695, %v8310_v61  ;;  %v12779_v61 = vld [vmem:[#allocation39_spill] sm:$0xff] }
 0x7ba   :  { %9152 = vpow2.f32 %v8077_v16 }
 0x7bb   :  { %9154 = vpow2.f32 %v8078_v55 }
 0x7bc   :  { %9156 = vpow2.f32 %v8079_v53  ;;  %v12780_v53 = vld [vmem:[#allocation40_spill] sm:$0xff] }
 0x7bd   :  { %9158 = vtanh.f32 %v8309_v21 }
 0x7c4   :  { %v9153_v30 = vpop.eup %9152 }
 0x7c5   :  { %v9155_v34 = vpop.eup %9154  ;;  %v5635_v63 = vadd.f32 1.0, %v9153_v30 }
 0x7c6   :  { %v5641_v25 = vadd.f32 1.0, %v9155_v34  ;;  %v9157_v19 = vpop.eup %9156 }
 0x7c7   :  { %9160 = vrcp.f32 %v5635_v63  ;;  %v9159_v18 = vpop.eup %9158  ;;  %v5648_v16 = vadd.f32 1.0, %v9157_v19 }
 0x7c8   :  { %9162 = vrcp.f32 %v5641_v25  ;;  %v12781_v25 = vld [vmem:[#allocation41_spill] sm:$0xff] }
 0x7c9   :  { %9164 = vrcp.f32 %v5648_v16 }
 0x7d1   :  { %v9161_v57 = vpop.eup %9160 }
 0x7d2   :  { %v9163_v14 = vpop.eup %9162  ;;  %v5652_v45 = vmul.f32 %v9161_v57, %v9159_v18 }
 0x7d3   :  { %v5651_v55 = vmul.f32 %v9163_v14, %v11566_v0 }
 0x7d5   :  { %v12023_v36 = vadd.f32 %v5652_v45, %v5651_v55  ;;  %v5885_v50 = vpop.f32.mrb[64].mxu0  ;;  %v5926_v41 = vpop.f32.mrb[64].mxu1 }
 0x7d6   :  { %v5972_v30 = vadd.f32 %v5885_v50, %v12779_v61  ;;  %v5974_v21 = vadd.f32 %v5926_v41, %v12780_v53  ;;  %v5887_v34 = vpop.f32.mrb[65].mxu0  ;;  %v5928_v1 = vpop.f32.mrb[65].mxu1  ;;  %v12033_v41 = vld [vmem:[%s12349_s4] ss:$16 sps:$4 sm:$0xff]  }
 0x7d7   :  { %v5973_v63 = vadd.f32 %v5887_v34, %v12781_v25  ;;  %v5975_v51 = vadd.f32 %v5928_v1, %v12782_v32  ;;  %v5889_v33 = vpop.f32.mrb[66].mxu0  ;;  %v5930_v18 = vpop.f32.mrb[66].mxu1  ;;  %9166 = vtanh.f32 %v12023_v36  ;;  %v12058_v25 = vld [vmem:[%s12349_s4 + $0x20] ss:$16 sps:$4 sm:$0xff]  }
 0x7d8   :  { %v8113_v0 = vmul.f32 -1.442695, %v5972_v30  ;;  %v5890_v19 = vpop.f32.mrb[67].mxu0  ;;  %v5931_v57 = vpop.f32.mrb[67].mxu1  ;;  %v12038_v33 = vld [vmem:[%s12349_s4 + $0x8] ss:$16 sps:$4 sm:$0xff]  }
 0x7d9   :  { %v8114_v14 = vmul.f32 -1.442695, %v5973_v63  ;;  %v9165_v45 = vpop.eup %9164  ;;  %v8115_v55 = vmul.f32 -1.442695, %v5975_v51  ;;  %v12043_v30 = vld [vmem:[%s12349_s4 + $0x24] ss:$16 sps:$4 sm:$0xff]  }
 0x7da   :  { %9168 = vpow2.f32 %v8113_v0  ;;  %v12048_v51 = vld [vmem:[%s12349_s4 + $0x2c] ss:$16 sps:$4 sm:$0xff]   ;;  %v12070_v63 = vld [vmem:[%s12349_s4 + $0x44] ss:$16 sps:$4 sm:$0xff]   ;;  %v12084_v0 = vld [vmem:[%s12349_s4 + $0x40] ss:$16 sps:$4 sm:$0xff]  }
 0x7db   :  { %9170 = vpow2.f32 %v8114_v14  ;;  %v12075_v18 = vld [vmem:[%s12349_s4 + $0x4c] ss:$16 sps:$4 sm:$0xff]   ;;  %12783 = vst [vmem:[#allocation53_spill] sm:$0xff] %v12084_v0  ;;  %v12089_v19 = vld [vmem:[%s12349_s4 + $0x48] ss:$16 sps:$4 sm:$0xff]  }
 0x7dc   :  { %9172 = vpow2.f32 %v8115_v55  ;;  %12784 = vst [vmem:[#allocation54_spill] sm:$0xff] %v12089_v19  ;;  %v12096_v57 = vld [vmem:[%s12349_s4 + $0x64] ss:$16 sps:$4 sm:$0xff]   ;;  %v12101_v14 = vld [vmem:[%s12349_s4 + $0x6c] ss:$16 sps:$4 sm:$0xff]  }
 0x7dd   :  { %9174 = vtanh.f32 %v5974_v21  ;;  %v12063_v21 = vld [vmem:[%s12349_s4 + $0x28] ss:$16 sps:$4 sm:$0xff]   ;;  %12785 = vst [vmem:[#allocation55_spill] sm:$0xff] %v12096_v57  ;;  %12786 = vst [vmem:[#allocation56_spill] sm:$0xff] %v12101_v14 }
 0x7de   :  { %v12113_v55 = vld [vmem:[%s12349_s4 + $0x68] ss:$16 sps:$4 sm:$0xff]  }
 0x7e1   :  { %v9167_v16 = vpop.eup %9166 }
 0x7e2   :  { %v5655_v50 = vmul.f32 %v9167_v16, %v9165_v45  ;;  %v12108_v16 = vld [vmem:[%s12349_s4 + $0x60] ss:$16 sps:$4 sm:$0xff]  }
 0x7e4   :  { %v9169_v32 = vpop.eup %9168  ;;  %v5656_v61 = vpack.c.bf16 %v5655_v50, %v5655_v50 }
 0x7e5   :  { %v9171_v53 = vpop.eup %9170  ;;  %v5979_v34 = vadd.f32 1.0, %v9169_v32  ;;  %v12120_v32 = vld [vmem:[%s12349_s4 + $0x84] ss:$16 sps:$4 sm:$0xff]  }
 0x7e6   :  { %v5985_v1 = vadd.f32 1.0, %v9171_v53  ;;  %8080 = vst [vmem:[%s12352_s7 + $0x14] sm:$0xf] %v5656_v61  ;;  %6226 = vmatmul.mubr.bf16.vlgmr.msra.gmra.mrb[68].mxu0 %v5656_v61  ;;  %6267 = vmatmul.mubr.bf16.vlgmr.msra.gmra.mrb[68].mxu1 %v5656_v61  ;;  %v9173_v45 = vpop.eup %9172  ;;  %v12125_v61 = vld [vmem:[%s12349_s4 + $0x8c] ss:$16 sps:$4 sm:$0xff]  }
 0x7e7   :  { %9176 = vrcp.f32 %v5979_v34  ;;  %6436 = vmatpush1.bf16.msra.mxu0 %v12033_v41  ;;  %6477 = vmatpush1.bf16.msra.mxu1 %v12038_v33  ;;  %v9175_v50 = vpop.eup %9174 }
 0x7e8   :  { %9178 = vrcp.f32 %v5985_v1  ;;  %6437 = vmatprep.subr.bf16.mxu0 %v12043_v30  ;;  %6478 = vmatprep.subr.bf16.mxu1 %v12048_v51 }
 0x7e9   :  { %6467 = vmatprep.mubr.bf16.mxu0 %v12548_v54  ;;  %6508 = vmatprep.mubr.bf16.mxu1 %v12548_v54 }
 0x7eb   :  { %6438 = vmatpush1.bf16.msra.mxu0 %v12058_v25  ;;  %6479 = vmatpush1.bf16.msra.mxu1 %v12063_v21 }
 0x7ec   :  { %6439 = vmatprep.subr.bf16.mxu0 %v12070_v63  ;;  %6480 = vmatprep.subr.bf16.mxu1 %v12075_v18 }
 0x7ef   :  { %6440 = vmatpush1.bf16.msra.mxu0 %v12084_v0  ;;  %6481 = vmatpush1.bf16.msra.mxu1 %v12089_v19  ;;  %v5992_v19 = vadd.f32 1.0, %v9173_v45  ;;  %v12150_v45 = vld [vmem:[%s12349_s4 + $0xac] ss:$16 sps:$4 sm:$0xff]  }
 0x7f0   :  { %6441 = vmatprep.subr.bf16.mxu0 %v12096_v57  ;;  %6482 = vmatprep.subr.bf16.mxu1 %v12101_v14  ;;  %v12133_v14 = vld [vmem:[%s12349_s4 + $0x80] ss:$16 sps:$4 sm:$0xff]   ;;  %v12138_v57 = vld [vmem:[%s12349_s4 + $0x88] ss:$16 sps:$4 sm:$0xff]   ;;  %12790 = vst [vmem:[#allocation60_spill] sm:$0xff] %v12150_v45 }
 0x7f1   :  { %v9177_v53 = vpop.eup %9176  ;;  %12787 = vst [vmem:[#allocation57_spill] sm:$0xff] %v12133_v14  ;;  %12788 = vst [vmem:[#allocation58_spill] sm:$0xff] %v12138_v57  ;;  %9180 = vrcp.f32 %v5992_v19  ;;  %v12177_v19 = vld [vmem:[%s12349_s4 + $0xcc] ss:$16 sps:$4 sm:$0xff]  }
 0x7f2   :  { %v9179_v34 = vpop.eup %9178  ;;  %v5996_v1 = vmul.f32 %v9177_v53, %v9175_v50  ;;  %v12159_v53 = vld [vmem:[%s12349_s4 + $0xa0] ss:$16 sps:$4 sm:$0xff]   ;;  %12794 = vst [vmem:[#allocation38_spill] sm:$0xff] %v12177_v19 }
 0x7f3   :  { %v5995_v0 = vmul.f32 %v9179_v34, %v11595_v40  ;;  %6442 = vmatpush1.bf16.msra.mxu0 %v12108_v16  ;;  %6483 = vmatpush1.bf16.msra.mxu1 %v12113_v55  ;;  %v12145_v40 = vld [vmem:[%s12349_s4 + $0xa4] ss:$16 sps:$4 sm:$0xff]   ;;  %12791 = vst [vmem:[#allocation35_spill] sm:$0xff] %v12159_v53  ;;  %v12164_v34 = vld [vmem:[%s12349_s4 + $0xa8] ss:$16 sps:$4 sm:$0xff]  }
 0x7f4   :  { %6443 = vmatprep.subr.bf16.mxu0 %v12120_v32  ;;  %6484 = vmatprep.subr.bf16.mxu1 %v12125_v61  ;;  %12789 = vst [vmem:[#allocation59_spill] sm:$0xff] %v12145_v40  ;;  %12792 = vst [vmem:[#allocation36_spill] sm:$0xff] %v12164_v34 }
 0x7f5   :  { %v12152_v50 = vadd.f32 %v5996_v1, %v5995_v0  ;;  %v12172_v0 = vld [vmem:[%s12349_s4 + $0xc4] ss:$16 sps:$4 sm:$0xff]   ;;  %v12184_v1 = vld [vmem:[%s12349_s4 + $0xc0] ss:$16 sps:$4 sm:$0xff]  }
 0x7f6   :  { %12793 = vst [vmem:[#allocation37_spill] sm:$0xff] %v12172_v0 }
 0x7f7   :  { %6444 = vmatpush1.bf16.msra.mxu0 %v12133_v14  ;;  %6485 = vmatpush1.bf16.msra.mxu1 %v12138_v57  ;;  %9182 = vtanh.f32 %v12152_v50 }
 0x7f8   :  { %6445 = vmatprep.subr.bf16.mxu0 %v12145_v40  ;;  %6486 = vmatprep.subr.bf16.mxu1 %v12150_v45  ;;  %v12189_v45 = vld [vmem:[%s12349_s4 + $0xc8] ss:$16 sps:$4 sm:$0xff]  }
 0x7f9   :  { %12795 = vst [vmem:[#allocation27_spill] sm:$0xff] %v12189_v45 }
 0x7fb   :  { %6446 = vmatpush1.bf16.msra.mxu0 %v12159_v53  ;;  %6487 = vmatpush1.bf16.msra.mxu1 %v12164_v34  ;;  %v12196_v53 = vld [vmem:[%s12349_s4 + $0xe4] ss:$16 sps:$4 sm:$0xff]   ;;  %v12201_v34 = vld [vmem:[%s12349_s4 + $0xec] ss:$16 sps:$4 sm:$0xff]   ;;  %v9181_v40 = vpop.eup %9180 }
 0x7fc   :  { %6447 = vmatprep.subr.bf16.mxu0 %v12172_v0  ;;  %6488 = vmatprep.subr.bf16.mxu1 %v12177_v19  ;;  %v12208_v0 = vld [vmem:[%s12349_s4 + $0xe0] ss:$16 sps:$4 sm:$0xff]   ;;  %v12213_v19 = vld [vmem:[%s12349_s4 + $0xe8] ss:$16 sps:$4 sm:$0xff]  }
 0x7ff   :  { %6448 = vmatpush1.bf16.msra.mxu0 %v12184_v1  ;;  %6489 = vmatpush1.bf16.msra.mxu1 %v12189_v45 }
 0x800   :  { %6449 = vmatprep.subr.bf16.mxu0 %v12196_v53  ;;  %6490 = vmatprep.subr.bf16.mxu1 %v12201_v34 }
 0x801   :  { %v9183_v57 = vpop.eup %9182 }
 0x802   :  { %v5999_v14 = vmul.f32 %v9183_v57, %v9181_v40  ;;  %v12824_v57 = vld [vmem:[#allocation49_spill] sm:$0xff] }
 0x803   :  { %6450 = vmatpush1.bf16.msra.mxu0 %v12208_v0  ;;  %6491 = vmatpush1.bf16.msra.mxu1 %v12213_v19 }
 0x804   :  { %6736 = vmatprep.subr.bf16.mxu0 %v11613_v58  ;;  %6777 = vmatprep.subr.bf16.mxu1 %v11618_v59  ;;  %v6000_v45 = vpack.c.bf16 %v5999_v14, %v5999_v14  ;;  %v12796_v58 = vld [vmem:[#allocation66_spill] sm:$0xff]  ;;  %v12797_v59 = vld [vmem:[#allocation67_spill] sm:$0xff] }
 0x806   :  { %6468 = vmatmul.mubr.bf16.vlgmr.msra.gmra.mrb[68].mxu0 %v6000_v45  ;;  %6509 = vmatmul.mubr.bf16.vlgmr.msra.gmra.mrb[68].mxu1 %v6000_v45 }
 0x807   :  { %6737 = vmatpush1.bf16.msra.mxu0 %v11625_v60  ;;  %6778 = vmatpush1.bf16.msra.mxu1 %v11630_v13  ;;  %v12798_v60 = vld [vmem:[#allocation68_spill] sm:$0xff]  ;;  %v12799_v13 = vld [vmem:[#allocation69_spill] sm:$0xff] }
 0x808   :  { %6738 = vmatprep.subr.bf16.mxu0 %v11639_v35  ;;  %6779 = vmatprep.subr.bf16.mxu1 %v11644_v48  ;;  %v12800_v35 = vld [vmem:[#allocation31_spill] sm:$0xff]  ;;  %v12801_v48 = vld [vmem:[#allocation32_spill] sm:$0xff] }
 0x809   :  { %6768 = vmatprep.mubr.bf16.mxu0 %v12548_v54  ;;  %6809 = vmatprep.mubr.bf16.mxu1 %v12548_v54 }
 0x80b   :  { %6739 = vmatpush1.bf16.msra.mxu0 %v11653_v52  ;;  %6780 = vmatpush1.bf16.msra.mxu1 %v11658_v2  ;;  %v12802_v52 = vld [vmem:[#allocation33_spill] sm:$0xff]  ;;  %v12803_v2 = vld [vmem:[#allocation34_spill] sm:$0xff] }
 0x80c   :  { %6740 = vmatprep.subr.bf16.mxu0 %v11665_v46  ;;  %6781 = vmatprep.subr.bf16.mxu1 %v11670_v3  ;;  %v12804_v46 = vld [vmem:[#allocation7_spill] sm:$0xff]  ;;  %v12805_v3 = vld [vmem:[#allocation8_spill] sm:$0xff] }
 0x80f   :  { %6741 = vmatpush1.bf16.msra.mxu0 %v11679_v4  ;;  %6782 = vmatpush1.bf16.msra.mxu1 %v11684_v5  ;;  %v12806_v4 = vld [vmem:[#allocation9_spill] sm:$0xff]  ;;  %v12807_v5 = vld [vmem:[#allocation10_spill] sm:$0xff] }
 0x810   :  { %6742 = vmatprep.subr.bf16.mxu0 %v11691_v6  ;;  %6783 = vmatprep.subr.bf16.mxu1 %v11696_v39  ;;  %v12808_v6 = vld [vmem:[#allocation11_spill] sm:$0xff]  ;;  %v12809_v39 = vld [vmem:[#allocation13_spill] sm:$0xff] }
 0x813   :  { %6743 = vmatpush1.bf16.msra.mxu0 %v11703_v43  ;;  %6784 = vmatpush1.bf16.msra.mxu1 %v11708_v7  ;;  %v12810_v43 = vld [vmem:[#allocation12_spill] sm:$0xff]  ;;  %v12811_v7 = vld [vmem:[#allocation14_spill] sm:$0xff] }
 0x814   :  { %6744 = vmatprep.subr.bf16.mxu0 %v11715_v8  ;;  %6785 = vmatprep.subr.bf16.mxu1 %v11720_v22  ;;  %v12812_v8 = vld [vmem:[#allocation15_spill] sm:$0xff]  ;;  %v12813_v22 = vld [vmem:[#allocation17_spill] sm:$0xff] }
 0x817   :  { %6745 = vmatpush1.bf16.msra.mxu0 %v11727_v9  ;;  %6786 = vmatpush1.bf16.msra.mxu1 %v11732_v10  ;;  %v12814_v9 = vld [vmem:[#allocation16_spill] sm:$0xff]  ;;  %v12815_v10 = vld [vmem:[#allocation18_spill] sm:$0xff] }
 0x818   :  { %6746 = vmatprep.subr.bf16.mxu0 %v11739_v20  ;;  %6787 = vmatprep.subr.bf16.mxu1 %v11744_v24  ;;  %v12816_v20 = vld [vmem:[#allocation19_spill] sm:$0xff]  ;;  %v12817_v24 = vld [vmem:[#allocation20_spill] sm:$0xff] }
 0x81b   :  { %6747 = vmatpush1.bf16.msra.mxu0 %v11751_v26  ;;  %6788 = vmatpush1.bf16.msra.mxu1 %v11756_v27  ;;  %v12818_v26 = vld [vmem:[#allocation21_spill] sm:$0xff]  ;;  %v12819_v27 = vld [vmem:[#allocation22_spill] sm:$0xff] }
 0x81c   :  { %6748 = vmatprep.subr.bf16.mxu0 %v11763_v29  ;;  %6789 = vmatprep.subr.bf16.mxu1 %v11768_v47  ;;  %v12820_v29 = vld [vmem:[#allocation51_spill] sm:$0xff]  ;;  %v12821_v47 = vld [vmem:[#allocation52_spill] sm:$0xff] }
 0x81f   :  { %6749 = vmatpush1.bf16.msra.mxu0 %v11775_v28  ;;  %6790 = vmatpush1.bf16.msra.mxu1 %v11780_v62 }
 0x820   :  { %6750 = vmatprep.subr.bf16.mxu0 %v11787_v31  ;;  %6791 = vmatprep.subr.bf16.mxu1 %v11792_v44  ;;  %v12822_v31 = vld [vmem:[#allocation47_spill] sm:$0xff] }
 0x823   :  { %6751 = vmatpush1.bf16.msra.mxu0 %v11799_v15  ;;  %6792 = vmatpush1.bf16.msra.mxu1 %v11804_v38 }
 0x824   :  { %7078 = vmatprep.subr.bf16.mxu0 %v11817_v17  ;;  %7119 = vmatprep.subr.bf16.mxu1 %v11822_v42  ;;  %v12823_v17 = vld [vmem:[#allocation48_spill] sm:$0xff] }
 0x826   :  { %6769 = vmatmul.mubr.bf16.vlgmr.msra.gmra.mrb[72].mxu0 %v6000_v45  ;;  %6810 = vmatmul.mubr.bf16.vlgmr.msra.gmra.mrb[72].mxu1 %v6000_v45  ;;  %v12825_v45 = vld [vmem:[#allocation50_spill] sm:$0xff] }
 0x827   :  { %7079 = vmatpush1.bf16.msra.mxu0 %v11827_v49  ;;  %7120 = vmatpush1.bf16.msra.mxu1 %v11832_v23 }
 0x828   :  { %7080 = vmatprep.subr.bf16.mxu0 %v11841_v11  ;;  %7121 = vmatprep.subr.bf16.mxu1 %v11846_v56 }
 0x829   :  { %7110 = vmatprep.mubr.bf16.mxu0 %v12548_v54  ;;  %7151 = vmatprep.mubr.bf16.mxu1 %v12548_v54 }
 0x82b   :  { %7081 = vmatpush1.bf16.msra.mxu0 %v11851_v12  ;;  %7122 = vmatpush1.bf16.msra.mxu1 %v11856_v37 }
 0x82c   :  { %7082 = vmatprep.subr.bf16.mxu0 %v12796_v58  ;;  %7123 = vmatprep.subr.bf16.mxu1 %v12797_v59 }
 0x82f   :  { %7083 = vmatpush1.bf16.msra.mxu0 %v12798_v60  ;;  %7124 = vmatpush1.bf16.msra.mxu1 %v12799_v13 }
 0x830   :  { %7084 = vmatprep.subr.bf16.mxu0 %v12800_v35  ;;  %7125 = vmatprep.subr.bf16.mxu1 %v12801_v48 }
 0x833   :  { %7085 = vmatpush1.bf16.msra.mxu0 %v12802_v52  ;;  %7126 = vmatpush1.bf16.msra.mxu1 %v12803_v2 }
 0x834   :  { %7086 = vmatprep.subr.bf16.mxu0 %v12804_v46  ;;  %7127 = vmatprep.subr.bf16.mxu1 %v12805_v3 }
 0x837   :  { %7087 = vmatpush1.bf16.msra.mxu0 %v12806_v4  ;;  %7128 = vmatpush1.bf16.msra.mxu1 %v12807_v5 }
 0x838   :  { %7088 = vmatprep.subr.bf16.mxu0 %v12808_v6  ;;  %7129 = vmatprep.subr.bf16.mxu1 %v12809_v39 }
 0x83b   :  { %7089 = vmatpush1.bf16.msra.mxu0 %v12810_v43  ;;  %7130 = vmatpush1.bf16.msra.mxu1 %v12811_v7  ;;  %v12826_v7 = vld [vmem:[#allocation43_spill] sm:$0xff] }
 0x83c   :  { %7090 = vmatprep.subr.bf16.mxu0 %v12812_v8  ;;  %7131 = vmatprep.subr.bf16.mxu1 %v12813_v22  ;;  %v12827_v22 = vld [vmem:[#allocation44_spill] sm:$0xff] }
 0x83f   :  { %7091 = vmatpush1.bf16.msra.mxu0 %v12814_v9  ;;  %7132 = vmatpush1.bf16.msra.mxu1 %v12815_v10 }
 0x840   :  { %7092 = vmatprep.subr.bf16.mxu0 %v12816_v20  ;;  %7133 = vmatprep.subr.bf16.mxu1 %v12817_v24  ;;  %v12828_v24 = vld [vmem:[#allocation45_spill] sm:$0xff] }
 0x843   :  { %7093 = vmatpush1.bf16.msra.mxu0 %v12818_v26  ;;  %7134 = vmatpush1.bf16.msra.mxu1 %v12819_v27  ;;  %v12829_v27 = vld [vmem:[#allocation46_spill] sm:$0xff] }
 0x844   :  { %7320 = vmatprep.subr.bf16.mxu0 %v12820_v29  ;;  %7361 = vmatprep.subr.bf16.mxu1 %v12821_v47 }
 0x8d9   :  { %v6469_v28 = vpop.f32.mrb[68].mxu0  ;;  %v6510_v62 = vpop.f32.mrb[68].mxu1 }
 0x8da   :  { %v8311_v44 = vadd.f32 %v6469_v28, %v12822_v31  ;;  %v6471_v15 = vpop.f32.mrb[69].mxu0  ;;  %v6512_v38 = vpop.f32.mrb[69].mxu1  ;;  %v8313_v58 = vadd.f32 %v6510_v62, %v12825_v45 }
 0x8db   :  { %v8312_v42 = vadd.f32 %v6471_v15, %v12823_v17  ;;  %v6473_v49 = vpop.f32.mrb[70].mxu0  ;;  %v6514_v23 = vpop.f32.mrb[70].mxu1  ;;  %v8314_v14 = vadd.f32 %v6512_v38, %v12824_v57 }
 0x8dc   :  { %v8180_v11 = vmul.f32 -1.442695, %v8311_v44  ;;  %v6474_v56 = vpop.f32.mrb[71].mxu0  ;;  %v6515_v12 = vpop.f32.mrb[71].mxu1 }
 0x8dd   :  { %v8181_v37 = vmul.f32 -1.442695, %v8312_v42  ;;  %v8182_v40 = vmul.f32 -1.442695, %v8314_v14 }
 0x8de   :  { %9184 = vpow2.f32 %v8180_v11 }
 0x8df   :  { %9186 = vpow2.f32 %v8181_v37 }
 0x8e0   :  { %9188 = vpow2.f32 %v8182_v40  ;;  %v12830_v40 = vld [vmem:[#allocation53_spill] sm:$0xff] }
 0x8e1   :  { %9190 = vtanh.f32 %v8313_v58  ;;  %v12832_v58 = vld [vmem:[#allocation55_spill] sm:$0xff] }
 0x8e8   :  { %v9185_v59 = vpop.eup %9184 }
 0x8e9   :  { %v9187_v60 = vpop.eup %9186  ;;  %v6520_v13 = vadd.f32 1.0, %v9185_v59 }
 0x8ea   :  { %v6526_v35 = vadd.f32 1.0, %v9187_v60  ;;  %v9189_v48 = vpop.eup %9188 }
 0x8eb   :  { %9192 = vrcp.f32 %v6520_v13  ;;  %v9191_v52 = vpop.eup %9190  ;;  %v6533_v4 = vadd.f32 1.0, %v9189_v48  ;;  %v12835_v13 = vld [vmem:[#allocation58_spill] sm:$0xff]  ;;  %v12837_v48 = vld [vmem:[#allocation60_spill] sm:$0xff] }
 0x8ec   :  { %9194 = vrcp.f32 %v6526_v35  ;;  %v12836_v35 = vld [vmem:[#allocation59_spill] sm:$0xff] }
 0x8ed   :  { %9196 = vrcp.f32 %v6533_v4 }
 0x8f5   :  { %v9193_v2 = vpop.eup %9192 }
 0x8f6   :  { %v9195_v46 = vpop.eup %9194  ;;  %v6537_v3 = vmul.f32 %v9193_v2, %v9191_v52 }
 0x8f7   :  { %v6536_v5 = vmul.f32 %v9195_v46, %v12023_v36  ;;  %v9197_v38 = vpop.eup %9196 }
 0x8f9   :  { %v12294_v6 = vadd.f32 %v6537_v3, %v6536_v5  ;;  %v6770_v39 = vpop.f32.mrb[72].mxu0  ;;  %v6811_v43 = vpop.f32.mrb[72].mxu1 }
 0x8fa   :  { %v6857_v8 = vadd.f32 %v6770_v39, %v12826_v7  ;;  %v6859_v9 = vadd.f32 %v6811_v43, %v12827_v22  ;;  %v6772_v10 = vpop.f32.mrb[73].mxu0  ;;  %v6813_v20 = vpop.f32.mrb[73].mxu1 }
 0x8fb   :  { %v6858_v26 = vadd.f32 %v6772_v10, %v12828_v24  ;;  %v6860_v29 = vadd.f32 %v6813_v20, %v12829_v27  ;;  %v6774_v47 = vpop.f32.mrb[74].mxu0  ;;  %v6815_v28 = vpop.f32.mrb[74].mxu1  ;;  %9198 = vtanh.f32 %v12294_v6 }
 0x8fc   :  { %v8216_v36 = vmul.f32 -1.442695, %v6857_v8  ;;  %v6775_v62 = vpop.f32.mrb[75].mxu0  ;;  %v6816_v44 = vpop.f32.mrb[75].mxu1 }
 0x8fd   :  { %v8217_v15 = vmul.f32 -1.442695, %v6858_v26  ;;  %v8218_v49 = vmul.f32 -1.442695, %v6860_v29 }
 0x8fe   :  { %9200 = vpow2.f32 %v8216_v36 }
 0x8ff   :  { %9202 = vpow2.f32 %v8217_v15 }
 0x900   :  { %9204 = vpow2.f32 %v8218_v49 }
 0x901   :  { %9206 = vtanh.f32 %v6859_v9 }
 0x905   :  { %v9199_v42 = vpop.eup %9198 }
 0x906   :  { %v6540_v23 = vmul.f32 %v9199_v42, %v9197_v38 }
 0x908   :  { %v9201_v11 = vpop.eup %9200  ;;  %v6541_v56 = vpack.c.bf16 %v6540_v23, %v6540_v23 }
 0x909   :  { %v9203_v12 = vpop.eup %9202  ;;  %v6864_v37 = vadd.f32 1.0, %v9201_v11 }
 0x90a   :  { %v6870_v14 = vadd.f32 1.0, %v9203_v12  ;;  %8183 = vst [vmem:[%s12352_s7 + $0x18] sm:$0xf] %v6541_v56  ;;  %7111 = vmatmul.mubr.bf16.vlgmr.msra.gmra.mrb[76].mxu0 %v6541_v56  ;;  %7152 = vmatmul.mubr.bf16.vlgmr.msra.gmra.mrb[76].mxu1 %v6541_v56 }
 0x90b   :  { %9208 = vrcp.f32 %v6864_v37  ;;  %7321 = vmatpush1.bf16.msra.mxu0 %v12033_v41  ;;  %7362 = vmatpush1.bf16.msra.mxu1 %v12038_v33  ;;  %v9205_v41 = vpop.eup %9204  ;;  %v12831_v33 = vld [vmem:[#allocation54_spill] sm:$0xff] }
 0x90c   :  { %9210 = vrcp.f32 %v6870_v14  ;;  %7322 = vmatprep.subr.bf16.mxu0 %v12043_v30  ;;  %7363 = vmatprep.subr.bf16.mxu1 %v12048_v51  ;;  %v9207_v30 = vpop.eup %9206  ;;  %v12833_v51 = vld [vmem:[#allocation56_spill] sm:$0xff] }
 0x90d   :  { %7352 = vmatprep.mubr.bf16.mxu0 %v12548_v54  ;;  %7393 = vmatprep.mubr.bf16.mxu1 %v12548_v54 }
 0x90f   :  { %7323 = vmatpush1.bf16.msra.mxu0 %v12058_v25  ;;  %7364 = vmatpush1.bf16.msra.mxu1 %v12063_v21  ;;  %v6877_v25 = vadd.f32 1.0, %v9205_v41 }
 0x910   :  { %7324 = vmatprep.subr.bf16.mxu0 %v12070_v63  ;;  %7365 = vmatprep.subr.bf16.mxu1 %v12075_v18  ;;  %v12834_v18 = vld [vmem:[#allocation57_spill] sm:$0xff] }
 0x911   :  { %9212 = vrcp.f32 %v6877_v25 }
 0x913   :  { %7325 = vmatpush1.bf16.msra.mxu0 %v12830_v40  ;;  %7366 = vmatpush1.bf16.msra.mxu1 %v12831_v33 }
 0x914   :  { %7326 = vmatprep.subr.bf16.mxu0 %v12832_v58  ;;  %7367 = vmatprep.subr.bf16.mxu1 %v12833_v51 }
 0x915   :  { %v9209_v59 = vpop.eup %9208 }
 0x916   :  { %v9211_v54 = vpop.eup %9210  ;;  %v6881_v60 = vmul.f32 %v9209_v59, %v9207_v30 }
 0x917   :  { %v6880_v21 = vmul.f32 %v9211_v54, %v12152_v50  ;;  %7327 = vmatpush1.bf16.msra.mxu0 %v12108_v16  ;;  %7368 = vmatpush1.bf16.msra.mxu1 %v12113_v55  ;;  %v12838_v50 = vld [vmem:[#allocation35_spill] sm:$0xff]  ;;  %v12839_v16 = vld [vmem:[#allocation36_spill] sm:$0xff]  ;;  %v12840_v55 = vld [vmem:[#allocation37_spill] sm:$0xff] }
 0x918   :  { %7328 = vmatprep.subr.bf16.mxu0 %v12120_v32  ;;  %7369 = vmatprep.subr.bf16.mxu1 %v12125_v61  ;;  %v12841_v32 = vld [vmem:[#allocation38_spill] sm:$0xff]  ;;  %v12842_v61 = vld [vmem:[#allocation27_spill] sm:$0xff] }
 0x919   :  { %v6882_v63 = vadd.f32 %v6881_v60, %v6880_v21 }
 0x91b   :  { %9214 = vtanh.f32 %v6882_v63  ;;  %7329 = vmatpush1.bf16.msra.mxu0 %v12834_v18  ;;  %7370 = vmatpush1.bf16.msra.mxu1 %v12835_v13  ;;  %v9213_v52 = vpop.eup %9212 }
 0x91c   :  { %7330 = vmatprep.subr.bf16.mxu0 %v12836_v35  ;;  %7371 = vmatprep.subr.bf16.mxu1 %v12837_v48 }
 0x91f   :  { %7331 = vmatpush1.bf16.msra.mxu0 %v12838_v50  ;;  %7372 = vmatpush1.bf16.msra.mxu1 %v12839_v16 }
 0x920   :  { %7332 = vmatprep.subr.bf16.mxu0 %v12840_v55  ;;  %7373 = vmatprep.subr.bf16.mxu1 %v12841_v32 }
 0x923   :  { %7333 = vmatpush1.bf16.msra.mxu0 %v12184_v1  ;;  %7374 = vmatpush1.bf16.msra.mxu1 %v12842_v61 }
 0x924   :  { %7334 = vmatprep.subr.bf16.mxu0 %v12196_v53  ;;  %7375 = vmatprep.subr.bf16.mxu1 %v12201_v34 }
 0x925   :  { %v9215_v2 = vpop.eup %9214 }
 0x926   :  { %v6884_v46 = vmul.f32 %v9215_v2, %v9213_v52 }
 0x927   :  { %7335 = vmatpush1.bf16.msra.mxu0 %v12208_v0  ;;  %7376 = vmatpush1.bf16.msra.mxu1 %v12213_v19 }
 0x928   :  { %v6885_v3 = vpack.c.bf16 %v6884_v46, %v6884_v46 }
 0x92a   :  { %7353 = vmatmul.mubr.bf16.vlgmr.msra.gmra.mrb[76].mxu0 %v6885_v3  ;;  %7429 = vst [vmem:[#allocation3] sm:$0xf] %v6885_v3  ;;  %7394 = vmatmul.mubr.bf16.vlgmr.msra.gmra.mrb[76].mxu1 %v6885_v3 }
 0x9fd   :  { %v7354_v4 = vpop.f32.mrb[76].mxu0  ;;  %v7395_v5 = vpop.f32.mrb[76].mxu1 }
 0x9fe   :  { %v8315_v1 = vadd.f32 %v7354_v4, %v12822_v31  ;;  %v7356_v39 = vpop.f32.mrb[77].mxu0  ;;  %v7397_v43 = vpop.f32.mrb[77].mxu1  ;;  %v8317_v20 = vadd.f32 %v7395_v5, %v12825_v45 }
 0x9ff   :  { %v8316_v53 = vadd.f32 %v7356_v39, %v12823_v17  ;;  %v7358_v7 = vpop.f32.mrb[78].mxu0  ;;  %v7399_v34 = vpop.f32.mrb[78].mxu1  ;;  %v8318_v19 = vadd.f32 %v7397_v43, %v12824_v57 }
 0xa00   :  { %v8283_v8 = vmul.f32 -1.442695, %v8315_v1  ;;  %v7359_v22 = vpop.f32.mrb[79].mxu0  ;;  %v7400_v9 = vpop.f32.mrb[79].mxu1 }
 0xa01   :  { %v8284_v0 = vmul.f32 -1.442695, %v8316_v53  ;;  %v8285_v10 = vmul.f32 -1.442695, %v8318_v19 }
 0xa02   :  { %9216 = vpow2.f32 %v8283_v8 }
 0xa03   :  { %9218 = vpow2.f32 %v8284_v0 }
 0xa04   :  { %9220 = vpow2.f32 %v8285_v10 }
 0xa05   :  { %9222 = vtanh.f32 %v8317_v20 }
 0xa0c   :  { %v9217_v24 = vpop.eup %9216 }
 0xa0d   :  { %v9219_v26 = vpop.eup %9218  ;;  %v7405_v31 = vadd.f32 1.0, %v9217_v24 }
 0xa0e   :  { %v7411_v27 = vadd.f32 1.0, %v9219_v26  ;;  %v9221_v17 = vpop.eup %9220 }
 0xa0f   :  { %9224 = vrcp.f32 %v7405_v31  ;;  %v9223_v29 = vpop.eup %9222  ;;  %v7418_v62 = vadd.f32 1.0, %v9221_v17 }
 0xa10   :  { %9226 = vrcp.f32 %v7411_v27 }
 0xa11   :  { %9228 = vrcp.f32 %v7418_v62 }
 0xa19   :  { %v9225_v47 = vpop.eup %9224 }
 0xa1a   :  { %v9227_v28 = vpop.eup %9226  ;;  %v7422_v36 = vmul.f32 %v9225_v47, %v9223_v29 }
 0xa1b   :  { %v7421_v44 = vmul.f32 %v9227_v28, %v12294_v6  ;;  %v9229_v45 = vpop.eup %9228 }
 0xa1d   :  { %v7423_v57 = vadd.f32 %v7422_v36, %v7421_v44 }
 0xa1f   :  { %9230 = vtanh.f32 %v7423_v57 }
 0xa29   :  { %v9231_v15 = vpop.eup %9230 }
 0xa2a   :  { %v7425_v38 = vmul.f32 %v9231_v15, %v9229_v45 }
 0xa2c   :  { %v7426_v42 = vpack.c.bf16 %v7425_v38, %v7425_v38 }
 0xa2e   :  { %8286 = vst [vmem:[%s12352_s7 + $0x1c] sm:$0xf] %v7426_v42  ;;  %7431 = vst [vmem:[#allocation5] sm:$0xf] %v7426_v42 }

</bundles_post_ra>
